<compile_context>
chip_gen: v7x
topology: tpu7x:2x2x1
jax: 0.10.0
libtpu: 0.0.40
codegen_flags: <defaults>
</compile_context>

<pallas_src>
import functools

import jax
import jax.numpy as jnp
import numpy as np
from jax.experimental import pallas as pl
from jax.experimental.pallas import tpu as pltpu


def _dynamic_mlp_b_kernel(img_ref, loc_ref,
                          w11_ref, b11_ref,
                          w12r_ref, b12r_ref,
                          w21_ref, b21_ref,
                          w22_ref, b22_ref,
                          gamma_ref, beta_ref,
                          w3_ref, b3_ref,
                          out_ref,
                          *, inplanes, planes, eps):
    f32 = jnp.float32
    bf16 = jnp.bfloat16

    img = img_ref[...]                      # (tm, C)  bf16
    loc = loc_ref[...]                      # (tm, L)  bf16

    # conv11: Linear(C -> C) + ReLU   (bf16 operands, f32 accumulation)
    h11 = jnp.dot(img, w11_ref[...], preferred_element_type=f32) + b11_ref[...]
    h11 = jnp.maximum(h11, 0.0)

    # conv12 with column-replicated weight: output is w12 broadcast along P,
    # already in the lane-dense (c*P + p) layout of w22 (no in-kernel relayout).
    w12r = jnp.dot(h11.astype(bf16), w12r_ref[...],
                   preferred_element_type=f32) + b12r_ref[...]      # (tm, C*P)

    # conv21: Linear(L -> C) + ReLU
    h21 = jnp.dot(loc, w21_ref[...], preferred_element_type=f32) + b21_ref[...]
    h21 = jnp.maximum(h21, 0.0)

    # conv22: Linear(C -> C*P)
    w22 = jnp.dot(h21.astype(bf16), w22_ref[...],
                  preferred_element_type=f32) + b22_ref[...]        # (tm, C*P)

    # Dynamic per-row matmul: y[m, p] = sum_c w12[m, c] * w22[m, c*P + p]
    prod = w12r * w22                                               # lane-dense f32
    if inplanes & (inplanes - 1) == 0:
        # fold-in-half lane reduction over the C groups (C is a power of two)
        acc = prod
        n_c = inplanes
        while n_c > 1:
            half = (n_c // 2) * planes
            acc = acc[:, :half] + acc[:, half:]
            n_c //= 2
        y = acc                                                     # (tm, P)
    else:
        # generic fallback (relayout + cross-sublane reduce)
        tm = prod.shape[0]
        y = jnp.sum(prod.reshape(tm, inplanes, planes), axis=1)

    # LayerNorm(P) + ReLU (f32, biased variance, eps like torch.nn.LayerNorm)
    mean = jnp.mean(y, axis=-1, keepdims=True)
    var = jnp.mean((y - mean) ** 2, axis=-1, keepdims=True)
    y = (y - mean) * jax.lax.rsqrt(var + eps)
    y = y * gamma_ref[...] + beta_ref[...]
    y = jnp.maximum(y, 0.0)

    # conv3: Linear(P -> P), no activation
    out = jnp.dot(y.astype(bf16), w3_ref[...],
                  preferred_element_type=f32) + b3_ref[...]
    out_ref[...] = out.astype(out_ref.dtype)


def init_params(key, inplanes, planes, loc_planes, dtype=jnp.float32):
    """Deterministic synthetic parameters (weights stored as (in, out))."""
    ks = jax.random.split(key, 6)
    c, p, l = inplanes, planes, loc_planes

    def lin(k, fan_in, fan_out):
        kw, kb = jax.random.split(k)
        bound = 1.0 / np.sqrt(fan_in)
        w = jax.random.uniform(kw, (fan_in, fan_out), dtype, -bound, bound)
        b = jax.random.uniform(kb, (1, fan_out), dtype, -bound, bound)
        return w, b

    w11, b11 = lin(ks[0], c, c)          # conv11: Basic1d(C, C, ReLU)
    w12, b12 = lin(ks[1], c, c)          # conv12: Linear(C, C)
    w21, b21 = lin(ks[2], l, c)          # conv21: Basic1d(L, C, ReLU)
    w22, b22 = lin(ks[3], c, c * p)      # conv22: Linear(C, C*P)
    gamma = jnp.ones((1, p), dtype)      # LayerNorm(P)
    beta = jnp.zeros((1, p), dtype)
    w3, b3 = lin(ks[4], p, p)            # conv3: Basic1d(P, P, no act)
    return dict(w11=w11, b11=b11, w12=w12, b12=b12,
                w21=w21, b21=b21, w22=w22, b22=b22,
                gamma=gamma, beta=beta, w3=w3, b3=b3)


def dynamic_mlp_b(img_fea, loc_fea, params, *, tile_m=256, eps=1e-5):
    """Dynamic_MLP_B.forward. img_fea: (M, C), loc_fea: (M, L) -> (M, P)."""
    M, C = img_fea.shape
    L = loc_fea.shape[-1]
    P = params["gamma"].shape[-1]

    n_tiles = pl.cdiv(M, tile_m)
    m_pad = n_tiles * tile_m

    bf16, f32 = jnp.bfloat16, jnp.float32

    img = img_fea.astype(bf16)
    loc = loc_fea.astype(bf16)
    if m_pad != M:
        img = jnp.pad(img, ((0, m_pad - M), (0, 0)))
        loc = jnp.pad(loc, ((0, m_pad - M), (0, 0)))

    # bf16 MXU operands; biases / LayerNorm params stay f32.
    w11 = params["w11"].astype(bf16); b11 = params["b11"].astype(f32)
    w21 = params["w21"].astype(bf16); b21 = params["b21"].astype(f32)
    # conv12 weight/bias replicated P times along output columns so the kernel
    # gets w12 directly in the lane-dense (c*P + p) layout of w22.
    w12r = jnp.repeat(params["w12"], P, axis=1).astype(bf16)
    b12r = jnp.repeat(params["b12"], P, axis=1).astype(f32)
    w22 = params["w22"].astype(bf16); b22 = params["b22"].astype(f32)
    gamma = params["gamma"].astype(f32); beta = params["beta"].astype(f32)
    w3 = params["w3"].astype(bf16); b3 = params["b3"].astype(f32)

    weight_args = (w11, b11, w12r, b12r, w21, b21, w22, b22,
                   gamma, beta, w3, b3)

    def full(a):
        return pl.BlockSpec(a.shape, lambda i: (0,) * a.ndim)

    kernel = functools.partial(_dynamic_mlp_b_kernel,
                               inplanes=C, planes=P, eps=eps)

    out = pl.pallas_call(
        kernel,
        out_shape=jax.ShapeDtypeStruct((m_pad, P), img_fea.dtype),
        grid_spec=pltpu.PrefetchScalarGridSpec(
            num_scalar_prefetch=0,
            grid=(n_tiles,),
            in_specs=[pl.BlockSpec((tile_m, C), lambda i: (i, 0)),
                      pl.BlockSpec((tile_m, L), lambda i: (i, 0))]
                     + [full(a) for a in weight_args],
            out_specs=pl.BlockSpec((tile_m, P), lambda i: (i, 0)),
        ),
        compiler_params=pltpu.CompilerParams(
            dimension_semantics=("parallel",),
            # per-step footprint: ~3 x tile_m x 4 KiB f32 intermediates
            # + double-buffered bf16 row tiles + ~0.2 MiB resident weights;
            # 32 MiB is safe on v5e/v6e and within v7x's 64 MiB physical VMEM.
            vmem_limit_bytes=32 * 1024 * 1024),
    )(img, loc, *weight_args)

    return out[:M]


def _reference(img_fea, loc_fea, params, eps=1e-5):
    """Pure-JAX reference mirroring Dynamic_MLP_B with bf16 matmul operands."""
    bf16, f32 = jnp.bfloat16, jnp.float32
    M, C = img_fea.shape
    P = params["gamma"].shape[-1]

    def dot(a, w):
        return jnp.dot(a.astype(bf16), w.astype(bf16),
                       preferred_element_type=f32)

    h11 = jax.nn.relu(dot(img_fea, params["w11"]) + params["b11"])
    w12 = dot(h11, params["w12"]) + params["b12"]
    h21 = jax.nn.relu(dot(loc_fea, params["w21"]) + params["b21"])
    w22 = (dot(h21, params["w22"]) + params["b22"]).reshape(M, C, P)
    y = jnp.sum(w12[:, :, None] * w22, axis=1)
    mean = y.mean(-1, keepdims=True)
    var = ((y - mean) ** 2).mean(-1, keepdims=True)
    y = (y - mean) * jax.lax.rsqrt(var + eps)
    y = y * params["gamma"] + params["beta"]
    y = jax.nn.relu(y)
    return dot(y, params["w3"]) + params["b3"]


if __name__ == "__main__":
    # Small shapes consistent with the module's 2-D row inputs.
    M = 200                      # deliberately not a multiple of tile_m
    inplanes, planes, loc_planes = 32, 32, 8

    key = jax.random.PRNGKey(0)
    k_img, k_loc, k_par = jax.random.split(key, 3)
    img_fea = jax.random.normal(k_img, (M, inplanes), jnp.float32)
    loc_fea = jax.random.normal(k_loc, (M, loc_planes), jnp.float32)
    params = init_params(k_par, inplanes, planes, loc_planes)

    out = dynamic_mlp_b(img_fea, loc_fea, params)
    out = jax.block_until_ready(out)

    ref = _reference(img_fea, loc_fea, params)
    np.testing.assert_allclose(np.asarray(out), np.asarray(ref),
                               rtol=1e-3, atol=1e-3)

    print("KERNEL_OK")
</pallas_src>

<mosaic_0001>
module attributes {stable_mosaic.version = 11 : i64} {
  func.func @_dynamic_mlp_b_kernel(%arg0: i32, %arg1: memref<256x32xbf16, #tpu.memory_space<vmem>>, %arg2: memref<256x8xbf16, #tpu.memory_space<vmem>>, %arg3: memref<32x32xbf16, #tpu.memory_space<vmem>>, %arg4: memref<1x32xf32, #tpu.memory_space<vmem>>, %arg5: memref<32x1024xbf16, #tpu.memory_space<vmem>>, %arg6: memref<1x1024xf32, #tpu.memory_space<vmem>>, %arg7: memref<8x32xbf16, #tpu.memory_space<vmem>>, %arg8: memref<1x32xf32, #tpu.memory_space<vmem>>, %arg9: memref<32x1024xbf16, #tpu.memory_space<vmem>>, %arg10: memref<1x1024xf32, #tpu.memory_space<vmem>>, %arg11: memref<1x32xf32, #tpu.memory_space<vmem>>, %arg12: memref<1x32xf32, #tpu.memory_space<vmem>>, %arg13: memref<32x32xbf16, #tpu.memory_space<vmem>>, %arg14: memref<1x32xf32, #tpu.memory_space<vmem>>, %arg15: memref<256x32xf32, #tpu.memory_space<vmem>>) attributes {dimension_semantics = [#tpu.dimension_semantics<parallel>], iteration_bounds = array<i64: 1>, scalar_prefetch = 0 : i64, scratch_operands = 0 : i64, tpu.core_type = #tpu.core_type<tc>, window_params = [{transform_indices = @transform_0, window_bounds = array<i64: 256, 32>}, {transform_indices = @transform_1, window_bounds = array<i64: 256, 8>}, {pipeline_mode = #tpu.pipeline_mode<synchronous>, transform_indices = @transform_2, window_bounds = array<i64: 32, 32>}, {pipeline_mode = #tpu.pipeline_mode<synchronous>, transform_indices = @transform_3, window_bounds = array<i64: 1, 32>}, {pipeline_mode = #tpu.pipeline_mode<synchronous>, transform_indices = @transform_4, window_bounds = array<i64: 32, 1024>}, {pipeline_mode = #tpu.pipeline_mode<synchronous>, transform_indices = @transform_5, window_bounds = array<i64: 1, 1024>}, {pipeline_mode = #tpu.pipeline_mode<synchronous>, transform_indices = @transform_6, window_bounds = array<i64: 8, 32>}, {pipeline_mode = #tpu.pipeline_mode<synchronous>, transform_indices = @transform_7, window_bounds = array<i64: 1, 32>}, {pipeline_mode = #tpu.pipeline_mode<synchronous>, transform_indices = @transform_8, window_bounds = array<i64: 32, 1024>}, {pipeline_mode = #tpu.pipeline_mode<synchronous>, transform_indices = @transform_9, window_bounds = array<i64: 1, 1024>}, {pipeline_mode = #tpu.pipeline_mode<synchronous>, transform_indices = @transform_10, window_bounds = array<i64: 1, 32>}, {pipeline_mode = #tpu.pipeline_mode<synchronous>, transform_indices = @transform_11, window_bounds = array<i64: 1, 32>}, {pipeline_mode = #tpu.pipeline_mode<synchronous>, transform_indices = @transform_12, window_bounds = array<i64: 32, 32>}, {pipeline_mode = #tpu.pipeline_mode<synchronous>, transform_indices = @transform_13, window_bounds = array<i64: 1, 32>}, {transform_indices = @transform_14, window_bounds = array<i64: 256, 32>}]} {
    %c0 = arith.constant 0 : index
    %c0_0 = arith.constant 0 : index
    %0 = vector.load %arg1[%c0, %c0_0] : memref<256x32xbf16, #tpu.memory_space<vmem>>, vector<256x32xbf16>
    %c0_1 = arith.constant 0 : index
    %c0_2 = arith.constant 0 : index
    %1 = vector.load %arg2[%c0_1, %c0_2] : memref<256x8xbf16, #tpu.memory_space<vmem>>, vector<256x8xbf16>
    %c0_3 = arith.constant 0 : index
    %c0_4 = arith.constant 0 : index
    %2 = vector.load %arg3[%c0_3, %c0_4] : memref<32x32xbf16, #tpu.memory_space<vmem>>, vector<32x32xbf16>
    %cst = arith.constant dense<0.000000e+00> : vector<256x32xf32>
    %3 = tpu.matmul %0, %2, %cst {dimension_numbers = #tpu.dot_dimension_numbers<[1], [0], [0], [1], [0, 0, 1, 1], [], []>} : vector<256x32xbf16>, vector<32x32xbf16>, vector<256x32xf32> -> vector<256x32xf32>
    %c0_5 = arith.constant 0 : index
    %c0_6 = arith.constant 0 : index
    %4 = vector.load %arg4[%c0_5, %c0_6] : memref<1x32xf32, #tpu.memory_space<vmem>>, vector<1x32xf32>
    %5 = vector.broadcast %4 : vector<1x32xf32> to vector<256x32xf32>
    %6 = arith.addf %3, %5 : vector<256x32xf32>
    %cst_7 = arith.constant 0.000000e+00 : f32
    %7 = vector.broadcast %cst_7 : f32 to vector<256x32xf32>
    %8 = arith.maximumf %6, %7 : vector<256x32xf32>
    %9 = arith.truncf %8 : vector<256x32xf32> to vector<256x32xbf16>
    %c0_8 = arith.constant 0 : index
    %c0_9 = arith.constant 0 : index
    %10 = vector.load %arg5[%c0_8, %c0_9] : memref<32x1024xbf16, #tpu.memory_space<vmem>>, vector<32x1024xbf16>
    %cst_10 = arith.constant dense<0.000000e+00> : vector<256x1024xf32>
    %11 = tpu.matmul %9, %10, %cst_10 {dimension_numbers = #tpu.dot_dimension_numbers<[1], [0], [0], [1], [0, 0, 1, 1], [], []>} : vector<256x32xbf16>, vector<32x1024xbf16>, vector<256x1024xf32> -> vector<256x1024xf32>
    %c0_11 = arith.constant 0 : index
    %c0_12 = arith.constant 0 : index
    %12 = vector.load %arg6[%c0_11, %c0_12] : memref<1x1024xf32, #tpu.memory_space<vmem>>, vector<1x1024xf32>
    %13 = vector.broadcast %12 : vector<1x1024xf32> to vector<256x1024xf32>
    %14 = arith.addf %11, %13 : vector<256x1024xf32>
    %c0_13 = arith.constant 0 : index
    %c0_14 = arith.constant 0 : index
    %15 = vector.load %arg7[%c0_13, %c0_14] : memref<8x32xbf16, #tpu.memory_space<vmem>>, vector<8x32xbf16>
    %cst_15 = arith.constant dense<0.000000e+00> : vector<256x32xf32>
    %16 = tpu.matmul %1, %15, %cst_15 {dimension_numbers = #tpu.dot_dimension_numbers<[1], [0], [0], [1], [0, 0, 1, 1], [], []>} : vector<256x8xbf16>, vector<8x32xbf16>, vector<256x32xf32> -> vector<256x32xf32>
    %c0_16 = arith.constant 0 : index
    %c0_17 = arith.constant 0 : index
    %17 = vector.load %arg8[%c0_16, %c0_17] : memref<1x32xf32, #tpu.memory_space<vmem>>, vector<1x32xf32>
    %18 = vector.broadcast %17 : vector<1x32xf32> to vector<256x32xf32>
    %19 = arith.addf %16, %18 : vector<256x32xf32>
    %cst_18 = arith.constant 0.000000e+00 : f32
    %20 = vector.broadcast %cst_18 : f32 to vector<256x32xf32>
    %21 = arith.maximumf %19, %20 : vector<256x32xf32>
    %22 = arith.truncf %21 : vector<256x32xf32> to vector<256x32xbf16>
    %c0_19 = arith.constant 0 : index
    %c0_20 = arith.constant 0 : index
    %23 = vector.load %arg9[%c0_19, %c0_20] : memref<32x1024xbf16, #tpu.memory_space<vmem>>, vector<32x1024xbf16>
    %cst_21 = arith.constant dense<0.000000e+00> : vector<256x1024xf32>
    %24 = tpu.matmul %22, %23, %cst_21 {dimension_numbers = #tpu.dot_dimension_numbers<[1], [0], [0], [1], [0, 0, 1, 1], [], []>} : vector<256x32xbf16>, vector<32x1024xbf16>, vector<256x1024xf32> -> vector<256x1024xf32>
    %c0_22 = arith.constant 0 : index
    %c0_23 = arith.constant 0 : index
    %25 = vector.load %arg10[%c0_22, %c0_23] : memref<1x1024xf32, #tpu.memory_space<vmem>>, vector<1x1024xf32>
    %26 = vector.broadcast %25 : vector<1x1024xf32> to vector<256x1024xf32>
    %27 = arith.addf %24, %26 : vector<256x1024xf32>
    %28 = arith.mulf %14, %27 : vector<256x1024xf32>
    %29 = vector.extract_strided_slice %28 {offsets = [0, 0], sizes = [256, 512], strides = [1, 1]} : vector<256x1024xf32> to vector<256x512xf32>
    %30 = vector.extract_strided_slice %28 {offsets = [0, 512], sizes = [256, 512], strides = [1, 1]} : vector<256x1024xf32> to vector<256x512xf32>
    %31 = arith.addf %29, %30 : vector<256x512xf32>
    %32 = vector.extract_strided_slice %31 {offsets = [0, 0], sizes = [256, 256], strides = [1, 1]} : vector<256x512xf32> to vector<256x256xf32>
    %33 = vector.extract_strided_slice %31 {offsets = [0, 256], sizes = [256, 256], strides = [1, 1]} : vector<256x512xf32> to vector<256x256xf32>
    %34 = arith.addf %32, %33 : vector<256x256xf32>
    %35 = vector.extract_strided_slice %34 {offsets = [0, 0], sizes = [256, 128], strides = [1, 1]} : vector<256x256xf32> to vector<256x128xf32>
    %36 = vector.extract_strided_slice %34 {offsets = [0, 128], sizes = [256, 128], strides = [1, 1]} : vector<256x256xf32> to vector<256x128xf32>
    %37 = arith.addf %35, %36 : vector<256x128xf32>
    %38 = vector.extract_strided_slice %37 {offsets = [0, 0], sizes = [256, 64], strides = [1, 1]} : vector<256x128xf32> to vector<256x64xf32>
    %39 = vector.extract_strided_slice %37 {offsets = [0, 64], sizes = [256, 64], strides = [1, 1]} : vector<256x128xf32> to vector<256x64xf32>
    %40 = arith.addf %38, %39 : vector<256x64xf32>
    %41 = vector.extract_strided_slice %40 {offsets = [0, 0], sizes = [256, 32], strides = [1, 1]} : vector<256x64xf32> to vector<256x32xf32>
    %42 = vector.extract_strided_slice %40 {offsets = [0, 32], sizes = [256, 32], strides = [1, 1]} : vector<256x64xf32> to vector<256x32xf32>
    %43 = arith.addf %41, %42 : vector<256x32xf32>
    %cst_24 = arith.constant dense<0.000000e+00> : vector<256xf32>
    %44 = vector.multi_reduction <add>, %43, %cst_24 [1] : vector<256x32xf32> to vector<256xf32>
    %45 = vector.shape_cast %44 : vector<256xf32> to vector<256x1xf32>
    %cst_25 = arith.constant 3.200000e+01 : f32
    %46 = vector.broadcast %cst_25 : f32 to vector<256x1xf32>
    %47 = arith.divf %45, %46 : vector<256x1xf32>
    %48 = vector.broadcast %47 : vector<256x1xf32> to vector<256x32xf32>
    %49 = arith.subf %43, %48 : vector<256x32xf32>
    %50 = arith.mulf %49, %49 : vector<256x32xf32>
    %cst_26 = arith.constant dense<0.000000e+00> : vector<256xf32>
    %51 = vector.multi_reduction <add>, %50, %cst_26 [1] : vector<256x32xf32> to vector<256xf32>
    %52 = vector.shape_cast %51 : vector<256xf32> to vector<256x1xf32>
    %cst_27 = arith.constant 3.200000e+01 : f32
    %53 = vector.broadcast %cst_27 : f32 to vector<256x1xf32>
    %54 = arith.divf %52, %53 : vector<256x1xf32>
    %55 = vector.broadcast %47 : vector<256x1xf32> to vector<256x32xf32>
    %56 = arith.subf %43, %55 : vector<256x32xf32>
    %cst_28 = arith.constant 9.99999974E-6 : f32
    %57 = vector.broadcast %cst_28 : f32 to vector<256x1xf32>
    %58 = arith.addf %54, %57 : vector<256x1xf32>
    %59 = math.rsqrt %58 : vector<256x1xf32>
    %60 = vector.broadcast %59 : vector<256x1xf32> to vector<256x32xf32>
    %61 = arith.mulf %56, %60 : vector<256x32xf32>
    %c0_29 = arith.constant 0 : index
    %c0_30 = arith.constant 0 : index
    %62 = vector.load %arg11[%c0_29, %c0_30] : memref<1x32xf32, #tpu.memory_space<vmem>>, vector<1x32xf32>
    %63 = vector.broadcast %62 : vector<1x32xf32> to vector<256x32xf32>
    %64 = arith.mulf %61, %63 : vector<256x32xf32>
    %c0_31 = arith.constant 0 : index
    %c0_32 = arith.constant 0 : index
    %65 = vector.load %arg12[%c0_31, %c0_32] : memref<1x32xf32, #tpu.memory_space<vmem>>, vector<1x32xf32>
    %66 = vector.broadcast %65 : vector<1x32xf32> to vector<256x32xf32>
    %67 = arith.addf %64, %66 : vector<256x32xf32>
    %cst_33 = arith.constant 0.000000e+00 : f32
    %68 = vector.broadcast %cst_33 : f32 to vector<256x32xf32>
    %69 = arith.maximumf %67, %68 : vector<256x32xf32>
    %70 = arith.truncf %69 : vector<256x32xf32> to vector<256x32xbf16>
    %c0_34 = arith.constant 0 : index
    %c0_35 = arith.constant 0 : index
    %71 = vector.load %arg13[%c0_34, %c0_35] : memref<32x32xbf16, #tpu.memory_space<vmem>>, vector<32x32xbf16>
    %cst_36 = arith.constant dense<0.000000e+00> : vector<256x32xf32>
    %72 = tpu.matmul %70, %71, %cst_36 {dimension_numbers = #tpu.dot_dimension_numbers<[1], [0], [0], [1], [0, 0, 1, 1], [], []>} : vector<256x32xbf16>, vector<32x32xbf16>, vector<256x32xf32> -> vector<256x32xf32>
    %c0_37 = arith.constant 0 : index
    %c0_38 = arith.constant 0 : index
    %73 = vector.load %arg14[%c0_37, %c0_38] : memref<1x32xf32, #tpu.memory_space<vmem>>, vector<1x32xf32>
    %74 = vector.broadcast %73 : vector<1x32xf32> to vector<256x32xf32>
    %75 = arith.addf %72, %74 : vector<256x32xf32>
    %c0_39 = arith.constant 0 : index
    %c0_40 = arith.constant 0 : index
    %76 = vector.load %arg15[%c0_39, %c0_40] : memref<256x32xf32, #tpu.memory_space<vmem>>, vector<256x32xf32>
    tpu.vector_store %arg15[%c0_39, %c0_40], %75 {strides = array<i32>} : memref<256x32xf32, #tpu.memory_space<vmem>>, vector<256x32xf32>,
    return
  }
  func.func @transform_0(%arg0: i32) -> (i32, i32) {
    %c0_i32 = arith.constant 0 : i32
    %c0_i32_0 = arith.constant 0 : i32
    return %arg0, %c0_i32 : i32, i32
  }
  func.func @transform_1(%arg0: i32) -> (i32, i32) {
    %c0_i32 = arith.constant 0 : i32
    %c0_i32_0 = arith.constant 0 : i32
    return %arg0, %c0_i32 : i32, i32
  }
  func.func @transform_2(%arg0: i32) -> (i32, i32) {
    %c0_i32 = arith.constant 0 : i32
    %c0_i32_0 = arith.constant 0 : i32
    %c0_i32_1 = arith.constant 0 : i32
    return %c0_i32, %c0_i32_0 : i32, i32
  }
  func.func @transform_3(%arg0: i32) -> (i32, i32) {
    %c0_i32 = arith.constant 0 : i32
    %c0_i32_0 = arith.constant 0 : i32
    %c0_i32_1 = arith.constant 0 : i32
    return %c0_i32, %c0_i32_0 : i32, i32
  }
  func.func @transform_4(%arg0: i32) -> (i32, i32) {
    %c0_i32 = arith.constant 0 : i32
    %c0_i32_0 = arith.constant 0 : i32
    %c0_i32_1 = arith.constant 0 : i32
    return %c0_i32, %c0_i32_0 : i32, i32
  }
  func.func @transform_5(%arg0: i32) -> (i32, i32) {
    %c0_i32 = arith.constant 0 : i32
    %c0_i32_0 = arith.constant 0 : i32
    %c0_i32_1 = arith.constant 0 : i32
    return %c0_i32, %c0_i32_0 : i32, i32
  }
  func.func @transform_6(%arg0: i32) -> (i32, i32) {
    %c0_i32 = arith.constant 0 : i32
    %c0_i32_0 = arith.constant 0 : i32
    %c0_i32_1 = arith.constant 0 : i32
    return %c0_i32, %c0_i32_0 : i32, i32
  }
  func.func @transform_7(%arg0: i32) -> (i32, i32) {
    %c0_i32 = arith.constant 0 : i32
    %c0_i32_0 = arith.constant 0 : i32
    %c0_i32_1 = arith.constant 0 : i32
    return %c0_i32, %c0_i32_0 : i32, i32
  }
  func.func @transform_8(%arg0: i32) -> (i32, i32) {
    %c0_i32 = arith.constant 0 : i32
    %c0_i32_0 = arith.constant 0 : i32
    %c0_i32_1 = arith.constant 0 : i32
    return %c0_i32, %c0_i32_0 : i32, i32
  }
  func.func @transform_9(%arg0: i32) -> (i32, i32) {
    %c0_i32 = arith.constant 0 : i32
    %c0_i32_0 = arith.constant 0 : i32
    %c0_i32_1 = arith.constant 0 : i32
    return %c0_i32, %c0_i32_0 : i32, i32
  }
  func.func @transform_10(%arg0: i32) -> (i32, i32) {
    %c0_i32 = arith.constant 0 : i32
    %c0_i32_0 = arith.constant 0 : i32
    %c0_i32_1 = arith.constant 0 : i32
    return %c0_i32, %c0_i32_0 : i32, i32
  }
  func.func @transform_11(%arg0: i32) -> (i32, i32) {
    %c0_i32 = arith.constant 0 : i32
    %c0_i32_0 = arith.constant 0 : i32
    %c0_i32_1 = arith.constant 0 : i32
    return %c0_i32, %c0_i32_0 : i32, i32
  }
  func.func @transform_12(%arg0: i32) -> (i32, i32) {
    %c0_i32 = arith.constant 0 : i32
    %c0_i32_0 = arith.constant 0 : i32
    %c0_i32_1 = arith.constant 0 : i32
    return %c0_i32, %c0_i32_0 : i32, i32
  }
  func.func @transform_13(%arg0: i32) -> (i32, i32) {
    %c0_i32 = arith.constant 0 : i32
    %c0_i32_0 = arith.constant 0 : i32
    %c0_i32_1 = arith.constant 0 : i32
    return %c0_i32, %c0_i32_0 : i32, i32
  }
  func.func @transform_14(%arg0: i32) -> (i32, i32) {
    %c0_i32 = arith.constant 0 : i32
    %c0_i32_0 = arith.constant 0 : i32
    return %arg0, %c0_i32 : i32, i32
  }
}

</mosaic_0001>

<bundles_post_ra>
// kernel: tpu_custom_call.1
= control target key start
LH: loop header
LB: loop body
LE: loop exit
PB: predicated region body
PF: predicated region fallthrough
CT: control target
= control target key end

     0   :  { %vm215_vm0 = vcmask 261120   ;;  %v9018_v36 = vmov 0   ;;  %vm1568_vm1 = vcmask 1043456   ;;  %vm1519_vm2 = vcmask 64512   ;;  %s4869_s16 = smov 96   ;;  %s9003_s2 = inlined_call_operand.vmem [shape: bf16[32,32], index: 2, kind: input, shape index: {}]   ;;  %s9004_s0 = inlined_call_operand.vmem [shape: bf16[256,32], index: 0, kind: input, shape index: {}]   ;;  %s9005_s4 = inlined_call_operand.vmem [shape: bf16[32,1024], index: 4, kind: input, shape index: {}]   ;;  %s9006_s3 = inlined_call_operand.vmem [shape: f32[1,32], index: 3, kind: input, shape index: {}]   ;;  %s9007_s6 = inlined_call_operand.vmem [shape: bf16[8,32], index: 6, kind: input, shape index: {}]   ;;  %s9008_s1 = inlined_call_operand.vmem [shape: bf16[256,8], index: 1, kind: input, shape index: {}]   ;;  %s9009_s8 = inlined_call_operand.vmem [shape: bf16[32,1024], index: 8, kind: input, shape index: {}]   ;;  %s9010_s7 = inlined_call_operand.vmem [shape: f32[1,32], index: 7, kind: input, shape index: {}]   ;;  %s9011_s5 = inlined_call_operand.vmem [shape: f32[1,1024], index: 5, kind: input, shape index: {}]   ;;  %s9012_s9 = inlined_call_operand.vmem [shape: f32[1,1024], index: 9, kind: input, shape index: {}]   ;;  %s9013_s12 = inlined_call_operand.vmem [shape: bf16[32,32], index: 12, kind: input, shape index: {}]   ;;  %s9014_s10 = inlined_call_operand.vmem [shape: f32[1,32], index: 10, kind: input, shape index: {}]   ;;  %s9015_s11 = inlined_call_operand.vmem [shape: f32[1,32], index: 11, kind: input, shape index: {}]   ;;  %s9016_s13 = inlined_call_operand.vmem [shape: f32[1,32], index: 13, kind: input, shape index: {}]   ;;  %s9017_s14 = inlined_call_operand.vmem [shape: f32[256,32], index: 14, kind: output, shape index: {}]  }
   0x1   :  { %v4766_v0 = vld [vmem:[%s9003_s2] sm:$0xff]   ;;  %v4767_v1 = vld [vmem:[%s9003_s2 + $0x8] sm:$0xff]   ;;  %v4770_v4 = vld [vmem:[%s9004_s0 + $0x10] sm:$0xff]  }
   0x2   :  { %4652 = vmatprep.subr.bf16.mxu0 %v4766_v0  ;;  %v4768_v2 = vld [vmem:[%s9004_s0] sm:$0xff]   ;;  %4758 = vmatprep.subr.bf16.mxu1 %v4766_v0  ;;  %v4769_v3 = vld [vmem:[%s9004_s0 + $0x8] sm:$0xff]   ;;  %v4778_v7 = vld [vmem:[%s9004_s0 + $0x50] sm:$0xff]  }
   0x3   :  { %4653 = vmatpush3.bf16.msra.mxu0 %v4766_v0  ;;  %4760 = vmatpush3.bf16.msra.mxu1 %v4766_v0  ;;  %v4776_v5 = vld [vmem:[%s9004_s0 + $0x40] sm:$0xff]   ;;  %v4777_v6 = vld [vmem:[%s9004_s0 + $0x48] sm:$0xff]   ;;  %v4771_v8 = vld [vmem:[%s9004_s0 + $0x18] sm:$0xff]  }
   0x4   :  { %4654 = vmatprep.subr.bf16.mxu0 %v4767_v1  ;;  %4656 = vmatprep.mubr.msk.bf16.mxu0 %vm215_vm0, %v4768_v2  ;;  %v4772_v9 = vld [vmem:[%s9004_s0 + $0x20] sm:$0xff]   ;;  %v4779_v10 = vld [vmem:[%s9004_s0 + $0x58] sm:$0xff]   ;;  %v4773_v19 = vld [vmem:[%s9004_s0 + $0x28] sm:$0xff]  }
   0x5   :  { %4759 = vmatprep.subr.bf16.mxu1 %v4767_v1  ;;  %4672 = vmatprep.mubr.msk.bf16.mxu1 %vm215_vm0, %v4776_v5  ;;  %v4780_v11 = vld [vmem:[%s9004_s0 + $0x60] sm:$0xff]   ;;  %v4774_v21 = vld [vmem:[%s9004_s0 + $0x30] sm:$0xff]   ;;  %v4781_v22 = vld [vmem:[%s9004_s0 + $0x68] sm:$0xff]  }
   0x6   :  { %v473_v12 = vld [vmem:[%s9005_s4] sm:$0xff]  ;;  %v4782_v23 = vld [vmem:[%s9004_s0 + $0x70] sm:$0xff]   ;;  %v4775_v24 = vld [vmem:[%s9004_s0 + $0x38] sm:$0xff]  }
   0x7   :  { %4655 = vmatpush3.bf16.msra.mxu0 %v4767_v1  ;;  %4761 = vmatpush3.bf16.msra.mxu1 %v4767_v1  ;;  %v477_v13 = vld [vmem:[%s9005_s4 + $0x20] sm:$0xff]  ;;  %v4783_v25 = vld [vmem:[%s9004_s0 + $0x78] sm:$0xff]   ;;  %v474_v26 = vld [vmem:[%s9005_s4 + $0x8] sm:$0xff] }
   0x8   :  { %v481_v14 = vld [vmem:[%s9005_s4 + $0x40] sm:$0xff]  ;;  %v4385_v15 = vcombine.low %v473_v12, %v477_v13  ;;  %v4386_v16 = vcombine.high %v473_v12, %v477_v13  ;;  %v478_v27 = vld [vmem:[%s9005_s4 + $0x28] sm:$0xff]  ;;  %v475_v34 = vld [vmem:[%s9005_s4 + $0x10] sm:$0xff] }
   0x9   :  { %v485_v17 = vld [vmem:[%s9005_s4 + $0x60] sm:$0xff]  ;;  %v4388_v28 = vcombine.high %v474_v26, %v478_v27  ;;  %v4387_v29 = vcombine.low %v474_v26, %v478_v27  ;;  %v482_v30 = vld [vmem:[%s9005_s4 + $0x48] sm:$0xff]  ;;  %v479_v35 = vld [vmem:[%s9005_s4 + $0x30] sm:$0xff] }
   0xa   :  { %4657 = vmatmul.mubr.msk.bf16.vlgmr.msra.gmra.mrb[0].mxu0 %vm215_vm0, %v4769_v3  ;;  %4673 = vmatmul.mubr.msk.bf16.vlgmr.msra.gmra.mrb[0].mxu1 %vm215_vm0, %v4777_v6  ;;  %v4394_v18 = vcombine.high %v481_v14, %v485_v17  ;;  %v4393_v20 = vcombine.low %v481_v14, %v485_v17  ;;  %v486_v31 = vld [vmem:[%s9005_s4 + $0x68] sm:$0xff]  ;;  %v4389_v37 = vcombine.low %v475_v34, %v479_v35  ;;  %v5050_v39 = vld [vmem:[%s9006_s3] ss:$0 sm:$0xff]  ;;  %v5055_v40 = vld [vmem:[%s9005_s4 + $0x18] sm:$0xff] }
   0xb   :  { %4660 = vmatprep.mubr.msk.bf16.mxu0 %vm215_vm0, %v4770_v4  ;;  %4676 = vmatprep.mubr.msk.bf16.mxu1 %vm215_vm0, %v4778_v7  ;;  %v4396_v32 = vcombine.high %v482_v30, %v486_v31  ;;  %v4395_v33 = vcombine.low %v482_v30, %v486_v31  ;;  %v4390_v38 = vcombine.high %v475_v34, %v479_v35  ;;  %v5060_v41 = vld [vmem:[%s9005_s4 + $0x38] sm:$0xff]  ;;  %v483_v58 = vld [vmem:[%s9005_s4 + $0x50] sm:$0xff]  ;;  %v1431_v6 = vld [vmem:[%s9007_s6] sm:$0xf] }
   0xc   :  { %659 = vmatprep.subr.bf16.mxu1 %v4386_v16  ;;  %852 = vmatprep.subr.bf16.mxu0 %v4388_v28  ;;  %v4392_v43 = vcombine.high %v5055_v40, %v5060_v41  ;;  %v487_v59 = vld [vmem:[%s9005_s4 + $0x70] sm:$0xff]  ;;  %v484_v4 = vld [vmem:[%s9005_s4 + $0x58] sm:$0xff]  ;;  %v4391_v14 = vcombine.low %v5055_v40, %v5060_v41 }
   0xd   :  { %660 = vmatpush1.bf16.msra.mxu1 %v4385_v15  ;;  %853 = vmatpush1.bf16.msra.mxu0 %v4387_v29  ;;  %v488_v5 = vld [vmem:[%s9005_s4 + $0x78] sm:$0xff] }
   0xe   :  { %661 = vmatprep.subr.bf16.mxu1 %v4394_v18  ;;  %854 = vmatprep.subr.bf16.mxu0 %v4396_v32  ;;  %v4400_v18 = vcombine.high %v484_v4, %v488_v5 }
  0x11   :  { %662 = vmatpush1.bf16.msra.mxu1 %v4393_v20  ;;  %855 = vmatpush1.bf16.msra.mxu0 %v4395_v33  ;;  %v4399_v33 = vcombine.low %v484_v4, %v488_v5 }
  0x12   :  { %4661 = vmatmul.mubr.msk.bf16.gmra.mrb[4].mxu0 %vm215_vm0, %v4771_v8  ;;  %4677 = vmatmul.mubr.msk.bf16.gmra.mrb[4].mxu1 %vm215_vm0, %v4779_v10  ;;  %v4398_v10 = vcombine.high %v483_v58, %v487_v59 }
  0x13   :  { %4664 = vmatprep.mubr.msk.bf16.mxu0 %vm215_vm0, %v4772_v9  ;;  %4680 = vmatprep.mubr.msk.bf16.mxu1 %vm215_vm0, %v4780_v11 }
  0x14   :  { %1045 = vmatprep.subr.bf16.mxu1 %v4390_v38  ;;  %1238 = vmatprep.subr.bf16.mxu0 %v4392_v43 }
  0x1a   :  { %4665 = vmatmul.mubr.msk.bf16.gmra.mrb[8].mxu0 %vm215_vm0, %v4773_v19  ;;  %4681 = vmatmul.mubr.msk.bf16.gmra.mrb[8].mxu1 %vm215_vm0, %v4781_v22  ;;  %v5102_v19 = vsel %vm1568_vm1, %v1431_v6, 0 }
  0x1b   :  { %4668 = vmatprep.mubr.msk.bf16.mxu0 %vm215_vm0, %v4774_v21  ;;  %4684 = vmatprep.mubr.msk.bf16.mxu1 %vm215_vm0, %v4782_v23 }
  0x22   :  { %4669 = vmatmul.mubr.msk.bf16.gmra.mrb[12].mxu0 %vm215_vm0, %v4775_v24  ;;  %4685 = vmatmul.mubr.msk.bf16.gmra.mrb[12].mxu1 %vm215_vm0, %v4783_v25  ;;  %v4397_v24 = vcombine.low %v483_v58, %v487_v59 }
  0x23   :  { %691 = vmatprep.mubr.bf16.mxu1 %v9018_v36  ;;  %884 = vmatprep.mubr.bf16.mxu0 %v9018_v36 }
  0xdd   :  { %v4658_v42 = vpop.f32.mrb[0].mxu0  ;;  %v4674_v50 = vpop.f32.mrb[0].mxu1 }
  0xde   :  { %v307_v44 = vadd.f32 %v4658_v42, %v5050_v39  ;;  %v298_v45 = vpop.f32.mrb[1].mxu0  ;;  %v371_v52 = vadd.f32 %v4674_v50, %v5050_v39  ;;  %v362_v53 = vpop.f32.mrb[1].mxu1 }
  0xdf   :  { %v299_v46 = vadd.f32 %v5050_v39, %v298_v45  ;;  %v4659_v47 = vpop.f32.mrb[2].mxu0  ;;  %v363_v56 = vadd.f32 %v5050_v39, %v362_v53  ;;  %v4675_v57 = vpop.f32.mrb[2].mxu1 }
  0xe0   :  { %v310_v48 = vadd.f32 %v4659_v47, %v5050_v39  ;;  %v301_v49 = vpop.f32.mrb[3].mxu0  ;;  %v427_v54 = vmax.f32 %v307_v44, 0.0  ;;  %v443_v62 = vmax.f32 %v371_v52, 0.0  ;;  %v374_v63 = vadd.f32 %v4675_v57, %v5050_v39  ;;  %v365_v0 = vpop.f32.mrb[3].mxu1 }
  0xe1   :  { %v302_v51 = vadd.f32 %v5050_v39, %v301_v49  ;;  %v425_v60 = vmax.f32 %v299_v46, 0.0  ;;  %v441_v2 = vmax.f32 %v363_v56, 0.0  ;;  %v366_v3 = vadd.f32 %v5050_v39, %v365_v0 }
  0xe2   :  { %v428_v55 = vmax.f32 %v310_v48, 0.0  ;;  %v444_v9 = vmax.f32 %v374_v63, 0.0 }
  0xe3   :  { %v426_v61 = vmax.f32 %v302_v51, 0.0  ;;  %v442_v13 = vmax.f32 %v366_v3, 0.0 }
  0xe4   :  { %v5077_v1 = vpack.c.bf16 %v428_v55, %v427_v54  ;;  %v5099_v17 = vpack.c.bf16 %v444_v9, %v443_v62 }
  0xe5   :  { %v5089_v7 = vpack.c.bf16 %v426_v61, %v425_v60  ;;  %v4662_v8 = vpop.f32.mrb[4].mxu0  ;;  %v5106_v23 = vpack.c.bf16 %v442_v13, %v441_v2  ;;  %v4678_v25 = vpop.f32.mrb[4].mxu1 }
  0xe6   :  { %v323_v11 = vadd.f32 %v4662_v8, %v5050_v39  ;;  %v314_v12 = vpop.f32.mrb[5].mxu0  ;;  %v387_v28 = vadd.f32 %v4678_v25, %v5050_v39  ;;  %v378_v29 = vpop.f32.mrb[5].mxu1 }
  0xe7   :  { %4401 = vmatmul.mubr.msk.bf16.vlgmr.msra.gmra.mrb[16].mxu1 %vm215_vm0, %v5089_v7  ;;  %4417 = vmatmul.mubr.msk.bf16.vlgmr.msra.gmra.mrb[16].mxu0 %vm215_vm0, %v5089_v7  ;;  %v315_v15 = vadd.f32 %v5050_v39, %v314_v12  ;;  %v4663_v16 = vpop.f32.mrb[6].mxu0  ;;  %v379_v31 = vadd.f32 %v5050_v39, %v378_v29  ;;  %v4679_v32 = vpop.f32.mrb[6].mxu1 }
  0xe8   :  { %1046 = vmatpush1.bf16.msra.mxu1 %v4389_v37  ;;  %v431_v20 = vmax.f32 %v323_v11, 0.0  ;;  %v326_v21 = vadd.f32 %v4663_v16, %v5050_v39  ;;  %v317_v22 = vpop.f32.mrb[7].mxu0  ;;  %701 = vmatprep.mubr.bf16.mxu1 %v9018_v36  ;;  %v447_v35 = vmax.f32 %v387_v28, 0.0  ;;  %v390_v37 = vadd.f32 %v4679_v32, %v5050_v39  ;;  %v381_v38 = vpop.f32.mrb[7].mxu1 }
  0xe9   :  { %v429_v26 = vmax.f32 %v315_v15, 0.0  ;;  %v318_v27 = vadd.f32 %v5050_v39, %v317_v22  ;;  %894 = vmatprep.mubr.bf16.mxu0 %v9018_v36  ;;  %1047 = vmatprep.subr.bf16.mxu1 %v4398_v10  ;;  %v445_v41 = vmax.f32 %v379_v31, 0.0  ;;  %v382_v42 = vadd.f32 %v5050_v39, %v381_v38 }
  0xea   :  { %v432_v30 = vmax.f32 %v326_v21, 0.0  ;;  %1239 = vmatpush1.bf16.msra.mxu0 %v4391_v14  ;;  %v448_v45 = vmax.f32 %v390_v37, 0.0 }
  0xeb   :  { %v430_v34 = vmax.f32 %v318_v27, 0.0  ;;  %1240 = vmatprep.subr.bf16.mxu0 %v4400_v18  ;;  %v446_v48 = vmax.f32 %v382_v42, 0.0 }
  0xec   :  { %v5113_v40 = vpack.c.bf16 %v432_v30, %v431_v20  ;;  %1048 = vmatpush1.bf16.msra.mxu1 %v4397_v24  ;;  %v5125_v51 = vpack.c.bf16 %v448_v45, %v447_v35 }
  0xed   :  { %v5116_v43 = vpack.c.bf16 %v430_v34, %v429_v26  ;;  %v4666_v44 = vpop.f32.mrb[8].mxu0  ;;  %4762 = vmatprep.subr.msk.bf16.mxu1 %vm1568_vm1, %v1431_v6  ;;  %v5130_v55 = vpack.c.bf16 %v446_v48, %v445_v41  ;;  %v4682_v56 = vpop.f32.mrb[8].mxu1 }
  0xee   :  { %v339_v46 = vadd.f32 %v4666_v44, %v5050_v39  ;;  %v330_v47 = vpop.f32.mrb[9].mxu0  ;;  %1241 = vmatpush1.bf16.msra.mxu0 %v4399_v33  ;;  %v403_v59 = vadd.f32 %v4682_v56, %v5050_v39  ;;  %v394_v60 = vpop.f32.mrb[9].mxu1 }
  0xef   :  { %4402 = vmatmul.mubr.msk.bf16.gmra.mrb[20].mxu1 %vm215_vm0, %v5077_v1  ;;  %4418 = vmatmul.mubr.msk.bf16.gmra.mrb[20].mxu0 %vm215_vm0, %v5077_v1  ;;  %v331_v49 = vadd.f32 %v5050_v39, %v330_v47  ;;  %v4667_v50 = vpop.f32.mrb[10].mxu0  ;;  %v395_v62 = vadd.f32 %v5050_v39, %v394_v60  ;;  %v4683_v63 = vpop.f32.mrb[10].mxu1 }
  0xf0   :  { %711 = vmatprep.mubr.bf16.mxu1 %v9018_v36  ;;  %904 = vmatprep.mubr.bf16.mxu0 %v9018_v36  ;;  %v435_v52 = vmax.f32 %v339_v46, 0.0  ;;  %v342_v53 = vadd.f32 %v4667_v50, %v5050_v39  ;;  %v333_v54 = vpop.f32.mrb[11].mxu0  ;;  %v451_v2 = vmax.f32 %v403_v59, 0.0  ;;  %v406_v3 = vadd.f32 %v4683_v63, %v5050_v39  ;;  %v397_v4 = vpop.f32.mrb[11].mxu1 }
  0xf1   :  { %v433_v57 = vmax.f32 %v331_v49, 0.0  ;;  %v334_v58 = vadd.f32 %v5050_v39, %v333_v54  ;;  %v449_v6 = vmax.f32 %v395_v62, 0.0  ;;  %v398_v8 = vadd.f32 %v5050_v39, %v397_v4 }
  0xf2   :  { %v436_v61 = vmax.f32 %v342_v53, 0.0  ;;  %v452_v11 = vmax.f32 %v406_v3, 0.0 }
  0xf3   :  { %v434_v0 = vmax.f32 %v334_v58, 0.0  ;;  %v450_v14 = vmax.f32 %v398_v8, 0.0  ;;  %v1785_v58 = vld [vmem:[%s9009_s8 + $0x20] sm:$0xff] }
  0xf4   :  { %v5136_v5 = vpack.c.bf16 %v436_v61, %v435_v52  ;;  %v5147_v18 = vpack.c.bf16 %v452_v11, %v451_v2 }
  0xf5   :  { %v5139_v9 = vpack.c.bf16 %v434_v0, %v433_v57  ;;  %v4670_v10 = vpop.f32.mrb[12].mxu0  ;;  %v5152_v24 = vpack.c.bf16 %v450_v14, %v449_v6  ;;  %v4686_v25 = vpop.f32.mrb[12].mxu1 }
  0xf6   :  { %v355_v12 = vadd.f32 %v4670_v10, %v5050_v39  ;;  %v346_v13 = vpop.f32.mrb[13].mxu0  ;;  %v419_v28 = vadd.f32 %v4686_v25, %v5050_v39  ;;  %v410_v29 = vpop.f32.mrb[13].mxu1 }
  0xf7   :  { %4403 = vmatmul.mubr.msk.bf16.gmra.mrb[24].mxu1 %vm215_vm0, %v5116_v43  ;;  %4419 = vmatmul.mubr.msk.bf16.gmra.mrb[24].mxu0 %vm215_vm0, %v5116_v43  ;;  %v347_v15 = vadd.f32 %v5050_v39, %v346_v13  ;;  %v4671_v16 = vpop.f32.mrb[14].mxu0  ;;  %v411_v31 = vadd.f32 %v5050_v39, %v410_v29  ;;  %v4687_v32 = vpop.f32.mrb[14].mxu1 }
  0xf8   :  { %721 = vmatprep.mubr.bf16.mxu1 %v9018_v36  ;;  %914 = vmatprep.mubr.bf16.mxu0 %v9018_v36  ;;  %v439_v20 = vmax.f32 %v355_v12, 0.0  ;;  %v358_v21 = vadd.f32 %v4671_v16, %v5050_v39  ;;  %v349_v22 = vpop.f32.mrb[15].mxu0  ;;  %v455_v34 = vmax.f32 %v419_v28, 0.0  ;;  %v422_v35 = vadd.f32 %v4687_v32, %v5050_v39  ;;  %v413_v37 = vpop.f32.mrb[15].mxu1 }
  0xf9   :  { %v437_v26 = vmax.f32 %v347_v15, 0.0  ;;  %v350_v27 = vadd.f32 %v5050_v39, %v349_v22  ;;  %v453_v41 = vmax.f32 %v411_v31, 0.0  ;;  %v414_v42 = vadd.f32 %v5050_v39, %v413_v37  ;;  %v4785_v31 = vld [vmem:[%s9008_s1 + $0x8] sm:$0xff]  }
  0xfa   :  { %v440_v30 = vmax.f32 %v358_v21, 0.0  ;;  %v456_v45 = vmax.f32 %v422_v35, 0.0 }
  0xfb   :  { %v438_v33 = vmax.f32 %v350_v27, 0.0  ;;  %v454_v46 = vmax.f32 %v414_v42, 0.0 }
  0xfc   :  { %v5158_v38 = vpack.c.bf16 %v440_v30, %v439_v20  ;;  %v5167_v47 = vpack.c.bf16 %v456_v45, %v455_v34  ;;  %v4786_v34 = vld [vmem:[%s9008_s1 + $0x10] sm:$0xff]   ;;  %v4787_v45 = vld [vmem:[%s9008_s1 + $0x18] sm:$0xff]  }
  0xfd   :  { %v5161_v44 = vpack.c.bf16 %v438_v33, %v437_v26  ;;  %v5171_v48 = vpack.c.bf16 %v454_v46, %v453_v41 }
  0xff   :  { %4404 = vmatmul.mubr.msk.bf16.gmra.mrb[28].mxu1 %vm215_vm0, %v5113_v40  ;;  %4420 = vmatmul.mubr.msk.bf16.gmra.mrb[28].mxu0 %vm215_vm0, %v5113_v40 }
 0x100   :  { %731 = vmatprep.mubr.bf16.mxu1 %v9018_v36  ;;  %924 = vmatprep.mubr.bf16.mxu0 %v9018_v36 }
 0x107   :  { %4405 = vmatmul.mubr.msk.bf16.gmra.mrb[32].mxu1 %vm215_vm0, %v5139_v9  ;;  %4421 = vmatmul.mubr.msk.bf16.gmra.mrb[32].mxu0 %vm215_vm0, %v5139_v9 }
 0x108   :  { %741 = vmatprep.mubr.bf16.mxu1 %v9018_v36  ;;  %934 = vmatprep.mubr.bf16.mxu0 %v9018_v36 }
 0x10f   :  { %4406 = vmatmul.mubr.msk.bf16.gmra.mrb[36].mxu1 %vm215_vm0, %v5136_v5  ;;  %4422 = vmatmul.mubr.msk.bf16.gmra.mrb[36].mxu0 %vm215_vm0, %v5136_v5 }
 0x110   :  { %751 = vmatprep.mubr.bf16.mxu1 %v9018_v36  ;;  %944 = vmatprep.mubr.bf16.mxu0 %v9018_v36 }
 0x117   :  { %4407 = vmatmul.mubr.msk.bf16.gmra.mrb[40].mxu1 %vm215_vm0, %v5161_v44  ;;  %4423 = vmatmul.mubr.msk.bf16.gmra.mrb[40].mxu0 %vm215_vm0, %v5161_v44 }
 0x118   :  { %761 = vmatprep.mubr.bf16.mxu1 %v9018_v36  ;;  %954 = vmatprep.mubr.bf16.mxu0 %v9018_v36 }
 0x11f   :  { %4408 = vmatmul.mubr.msk.bf16.gmra.mrb[44].mxu1 %vm215_vm0, %v5158_v38  ;;  %4424 = vmatmul.mubr.msk.bf16.gmra.mrb[44].mxu0 %vm215_vm0, %v5158_v38 }
 0x120   :  { %771 = vmatprep.mubr.bf16.mxu1 %v9018_v36  ;;  %964 = vmatprep.mubr.bf16.mxu0 %v9018_v36 }
 0x127   :  { %4409 = vmatmul.mubr.msk.bf16.gmra.mrb[48].mxu1 %vm215_vm0, %v5106_v23  ;;  %4425 = vmatmul.mubr.msk.bf16.gmra.mrb[48].mxu0 %vm215_vm0, %v5106_v23 }
 0x128   :  { %781 = vmatprep.mubr.bf16.mxu1 %v9018_v36  ;;  %974 = vmatprep.mubr.bf16.mxu0 %v9018_v36 }
 0x12f   :  { %4410 = vmatmul.mubr.msk.bf16.gmra.mrb[52].mxu1 %vm215_vm0, %v5099_v17  ;;  %4426 = vmatmul.mubr.msk.bf16.gmra.mrb[52].mxu0 %vm215_vm0, %v5099_v17 }
 0x130   :  { %791 = vmatprep.mubr.bf16.mxu1 %v9018_v36  ;;  %984 = vmatprep.mubr.bf16.mxu0 %v9018_v36 }
 0x137   :  { %4411 = vmatmul.mubr.msk.bf16.gmra.mrb[56].mxu1 %vm215_vm0, %v5130_v55  ;;  %4427 = vmatmul.mubr.msk.bf16.gmra.mrb[56].mxu0 %vm215_vm0, %v5130_v55 }
 0x138   :  { %801 = vmatprep.mubr.bf16.mxu1 %v9018_v36  ;;  %994 = vmatprep.mubr.bf16.mxu0 %v9018_v36 }
 0x13f   :  { %4412 = vmatmul.mubr.msk.bf16.gmra.mrb[60].mxu1 %vm215_vm0, %v5125_v51  ;;  %4428 = vmatmul.mubr.msk.bf16.gmra.mrb[60].mxu0 %vm215_vm0, %v5125_v51 }
 0x140   :  { %811 = vmatprep.mubr.bf16.mxu1 %v9018_v36  ;;  %1004 = vmatprep.mubr.bf16.mxu0 %v9018_v36 }
 0x147   :  { %4413 = vmatmul.mubr.msk.bf16.gmra.mrb[64].mxu1 %vm215_vm0, %v5152_v24  ;;  %4429 = vmatmul.mubr.msk.bf16.gmra.mrb[64].mxu0 %vm215_vm0, %v5152_v24 }
 0x148   :  { %821 = vmatprep.mubr.bf16.mxu1 %v9018_v36  ;;  %1014 = vmatprep.mubr.bf16.mxu0 %v9018_v36 }
 0x14f   :  { %4414 = vmatmul.mubr.msk.bf16.gmra.mrb[68].mxu1 %vm215_vm0, %v5147_v18  ;;  %4430 = vmatmul.mubr.msk.bf16.gmra.mrb[68].mxu0 %vm215_vm0, %v5147_v18 }
 0x150   :  { %831 = vmatprep.mubr.bf16.mxu1 %v9018_v36  ;;  %1024 = vmatprep.mubr.bf16.mxu0 %v9018_v36 }
 0x157   :  { %4415 = vmatmul.mubr.msk.bf16.gmra.mrb[72].mxu1 %vm215_vm0, %v5171_v48  ;;  %4431 = vmatmul.mubr.msk.bf16.gmra.mrb[72].mxu0 %vm215_vm0, %v5171_v48 }
 0x158   :  { %841 = vmatprep.mubr.bf16.mxu1 %v9018_v36  ;;  %1034 = vmatprep.mubr.bf16.mxu0 %v9018_v36 }
 0x15f   :  { %4416 = vmatmul.mubr.msk.bf16.gmra.mrb[76].mxu1 %vm215_vm0, %v5167_v47  ;;  %4432 = vmatmul.mubr.msk.bf16.gmra.mrb[76].mxu0 %vm215_vm0, %v5167_v47 }
 0x160   :  { %1077 = vmatprep.mubr.bf16.mxu1 %v9018_v36  ;;  %1270 = vmatprep.mubr.bf16.mxu0 %v9018_v36 }
 0x167   :  { %4433 = vmatmul.mubr.msk.bf16.vlgmr.msra.gmra.mrb[80].mxu1 %vm215_vm0, %v5089_v7  ;;  %4449 = vmatmul.mubr.msk.bf16.vlgmr.msra.gmra.mrb[80].mxu0 %vm215_vm0, %v5089_v7 }
 0x168   :  { %4689 = vmatpush3.bf16.msra.mxu1 %v5102_v19  ;;  %1087 = vmatprep.mubr.bf16.mxu1 %v9018_v36 }
 0x169   :  { %1280 = vmatprep.mubr.bf16.mxu0 %v9018_v36 }
 0x16f   :  { %4434 = vmatmul.mubr.msk.bf16.gmra.mrb[84].mxu1 %vm215_vm0, %v5077_v1  ;;  %4450 = vmatmul.mubr.msk.bf16.gmra.mrb[84].mxu0 %vm215_vm0, %v5077_v1 }
 0x170   :  { %1097 = vmatprep.mubr.bf16.mxu1 %v9018_v36  ;;  %1290 = vmatprep.mubr.bf16.mxu0 %v9018_v36 }
 0x177   :  { %4435 = vmatmul.mubr.msk.bf16.gmra.mrb[88].mxu1 %vm215_vm0, %v5116_v43  ;;  %4451 = vmatmul.mubr.msk.bf16.gmra.mrb[88].mxu0 %vm215_vm0, %v5116_v43 }
 0x178   :  { %1107 = vmatprep.mubr.bf16.mxu1 %v9018_v36  ;;  %1300 = vmatprep.mubr.bf16.mxu0 %v9018_v36 }
 0x17f   :  { %4436 = vmatmul.mubr.msk.bf16.gmra.mrb[92].mxu1 %vm215_vm0, %v5113_v40  ;;  %4452 = vmatmul.mubr.msk.bf16.gmra.mrb[92].mxu0 %vm215_vm0, %v5113_v40 }
 0x180   :  { %1117 = vmatprep.mubr.bf16.mxu1 %v9018_v36  ;;  %1310 = vmatprep.mubr.bf16.mxu0 %v9018_v36 }
 0x187   :  { %4437 = vmatmul.mubr.msk.bf16.gmra.mrb[96].mxu1 %vm215_vm0, %v5139_v9  ;;  %4453 = vmatmul.mubr.msk.bf16.gmra.mrb[96].mxu0 %vm215_vm0, %v5139_v9 }
 0x188   :  { %1127 = vmatprep.mubr.bf16.mxu1 %v9018_v36  ;;  %1320 = vmatprep.mubr.bf16.mxu0 %v9018_v36 }
 0x18f   :  { %4438 = vmatmul.mubr.msk.bf16.gmra.mrb[100].mxu1 %vm215_vm0, %v5136_v5  ;;  %4454 = vmatmul.mubr.msk.bf16.gmra.mrb[100].mxu0 %vm215_vm0, %v5136_v5 }
 0x190   :  { %1137 = vmatprep.mubr.bf16.mxu1 %v9018_v36  ;;  %1330 = vmatprep.mubr.bf16.mxu0 %v9018_v36 }
 0x197   :  { %4439 = vmatmul.mubr.msk.bf16.gmra.mrb[104].mxu1 %vm215_vm0, %v5161_v44  ;;  %4455 = vmatmul.mubr.msk.bf16.gmra.mrb[104].mxu0 %vm215_vm0, %v5161_v44 }
 0x198   :  { %1147 = vmatprep.mubr.bf16.mxu1 %v9018_v36  ;;  %1340 = vmatprep.mubr.bf16.mxu0 %v9018_v36 }
 0x19f   :  { %4440 = vmatmul.mubr.msk.bf16.gmra.mrb[108].mxu1 %vm215_vm0, %v5158_v38  ;;  %4456 = vmatmul.mubr.msk.bf16.gmra.mrb[108].mxu0 %vm215_vm0, %v5158_v38 }
 0x1a0   :  { %1157 = vmatprep.mubr.bf16.mxu1 %v9018_v36  ;;  %1350 = vmatprep.mubr.bf16.mxu0 %v9018_v36 }
 0x1a7   :  { %4441 = vmatmul.mubr.msk.bf16.gmra.mrb[112].mxu1 %vm215_vm0, %v5106_v23  ;;  %4457 = vmatmul.mubr.msk.bf16.gmra.mrb[112].mxu0 %vm215_vm0, %v5106_v23 }
 0x1a8   :  { %1167 = vmatprep.mubr.bf16.mxu1 %v9018_v36  ;;  %1360 = vmatprep.mubr.bf16.mxu0 %v9018_v36 }
 0x1af   :  { %4442 = vmatmul.mubr.msk.bf16.gmra.mrb[116].mxu1 %vm215_vm0, %v5099_v17  ;;  %4458 = vmatmul.mubr.msk.bf16.gmra.mrb[116].mxu0 %vm215_vm0, %v5099_v17 }
 0x1b0   :  { %1177 = vmatprep.mubr.bf16.mxu1 %v9018_v36  ;;  %1370 = vmatprep.mubr.bf16.mxu0 %v9018_v36 }
 0x1b7   :  { %4443 = vmatmul.mubr.msk.bf16.gmra.mrb[120].mxu1 %vm215_vm0, %v5130_v55  ;;  %4459 = vmatmul.mubr.msk.bf16.gmra.mrb[120].mxu0 %vm215_vm0, %v5130_v55 }
 0x1b8   :  { %1187 = vmatprep.mubr.bf16.mxu1 %v9018_v36  ;;  %1380 = vmatprep.mubr.bf16.mxu0 %v9018_v36 }
 0x1ba   :  { %v5312_v39 = vpop.f32.mrb[16].mxu1  ;;  %v5314_v1 = vpop.f32.mrb[16].mxu0 }
 0x1bb   :  { %v5316_v7 = vpop.f32.mrb[17].mxu1  ;;  %v5318_v17 = vpop.f32.mrb[17].mxu0 }
 0x1bc   :  { %v5320_v19 = vpop.f32.mrb[18].mxu1  ;;  %v5322_v23 = vpop.f32.mrb[18].mxu0 }
 0x1bd   :  { %v5324_v40 = vpop.f32.mrb[19].mxu1  ;;  %v5326_v43 = vpop.f32.mrb[19].mxu0 }
 0x1bf   :  { %4444 = vmatmul.mubr.msk.bf16.gmra.mrb[124].mxu1 %vm215_vm0, %v5125_v51  ;;  %4460 = vmatmul.mubr.msk.bf16.gmra.mrb[124].mxu0 %vm215_vm0, %v5125_v51  ;;  %v1781_v51 = vld [vmem:[%s9009_s8] sm:$0xff] }
 0x1c0   :  { %1197 = vmatprep.mubr.bf16.mxu1 %v9018_v36  ;;  %1390 = vmatprep.mubr.bf16.mxu0 %v9018_v36  ;;  %v4498_v59 = vcombine.low %v1781_v51, %v1785_v58  ;;  %v4499_v60 = vcombine.high %v1781_v51, %v1785_v58 }
 0x1c2   :  { %v5334_v49 = vpop.f32.mrb[20].mxu1  ;;  %v5336_v50 = vpop.f32.mrb[20].mxu0  ;;  %1967 = vmatprep.subr.bf16.mxu0 %v4499_v60 }
 0x1c3   :  { %v5338_v52 = vpop.f32.mrb[21].mxu1  ;;  %v5340_v53 = vpop.f32.mrb[21].mxu0  ;;  %1968 = vmatpush1.bf16.msra.mxu0 %v4498_v59 }
 0x1c4   :  { %v5342_v54 = vpop.f32.mrb[22].mxu1  ;;  %v5344_v55 = vpop.f32.mrb[22].mxu0 }
 0x1c5   :  { %v5346_v56 = vpop.f32.mrb[23].mxu1  ;;  %v5348_v57 = vpop.f32.mrb[23].mxu0 }
 0x1c7   :  { %4445 = vmatmul.mubr.msk.bf16.gmra.mrb[128].mxu1 %vm215_vm0, %v5152_v24  ;;  %4461 = vmatmul.mubr.msk.bf16.gmra.mrb[128].mxu0 %vm215_vm0, %v5152_v24  ;;  %v4784_v24 = vld [vmem:[%s9008_s1] sm:$0xff]  }
 0x1c8   :  { %1207 = vmatprep.mubr.bf16.mxu1 %v9018_v36  ;;  %1400 = vmatprep.mubr.bf16.mxu0 %v9018_v36 }
 0x1ca   :  { %v5362_v61 = vpop.f32.mrb[24].mxu1  ;;  %v5364_v62 = vpop.f32.mrb[24].mxu0 }
 0x1cb   :  { %v5366_v63 = vpop.f32.mrb[25].mxu1  ;;  %v5368_v0 = vpop.f32.mrb[25].mxu0 }
 0x1cc   :  { %v5370_v2 = vpop.f32.mrb[26].mxu1  ;;  %v5372_v3 = vpop.f32.mrb[26].mxu0 }
 0x1cd   :  { %v5374_v4 = vpop.f32.mrb[27].mxu1  ;;  %v5376_v5 = vpop.f32.mrb[27].mxu0 }
 0x1cf   :  { %4446 = vmatmul.mubr.msk.bf16.gmra.mrb[132].mxu1 %vm215_vm0, %v5147_v18  ;;  %4462 = vmatmul.mubr.msk.bf16.gmra.mrb[132].mxu0 %vm215_vm0, %v5147_v18 }
 0x1d0   :  { %1217 = vmatprep.mubr.bf16.mxu1 %v9018_v36  ;;  %1410 = vmatprep.mubr.bf16.mxu0 %v9018_v36 }
 0x1d2   :  { %v5384_v6 = vpop.f32.mrb[28].mxu1  ;;  %v5386_v8 = vpop.f32.mrb[28].mxu0 }
 0x1d3   :  { %v5388_v9 = vpop.f32.mrb[29].mxu1  ;;  %v5390_v10 = vpop.f32.mrb[29].mxu0 }
 0x1d4   :  { %v5392_v11 = vpop.f32.mrb[30].mxu1  ;;  %v5394_v12 = vpop.f32.mrb[30].mxu0 }
 0x1d5   :  { %v5396_v13 = vpop.f32.mrb[31].mxu1  ;;  %v5398_v14 = vpop.f32.mrb[31].mxu0 }
 0x1d7   :  { %4447 = vmatmul.mubr.msk.bf16.gmra.mrb[136].mxu1 %vm215_vm0, %v5171_v48  ;;  %4463 = vmatmul.mubr.msk.bf16.gmra.mrb[136].mxu0 %vm215_vm0, %v5171_v48  ;;  %v4788_v48 = vld [vmem:[%s9008_s1 + $0x20] sm:$0xff]  }
 0x1d8   :  { %1227 = vmatprep.mubr.bf16.mxu1 %v9018_v36  ;;  %1420 = vmatprep.mubr.bf16.mxu0 %v9018_v36 }
 0x1da   :  { %v5406_v15 = vpop.f32.mrb[32].mxu1  ;;  %v5408_v16 = vpop.f32.mrb[32].mxu0 }
 0x1db   :  { %9043 = vst [vmem:[#allocation2_spill] sm:$0xff] %v5406_v15  ;;  %9044 = vst [vmem:[#allocation3_spill] sm:$0xff] %v5408_v16  ;;  %v5410_v18 = vpop.f32.mrb[33].mxu1  ;;  %v5412_v20 = vpop.f32.mrb[33].mxu0 }
 0x1dc   :  { %9045 = vst [vmem:[#allocation4_spill] sm:$0xff] %v5410_v18  ;;  %9046 = vst [vmem:[#allocation5_spill] sm:$0xff] %v5412_v20  ;;  %v5414_v21 = vpop.f32.mrb[34].mxu1  ;;  %v5416_v22 = vpop.f32.mrb[34].mxu0 }
 0x1dd   :  { %9047 = vst [vmem:[#allocation6_spill] sm:$0xff] %v5414_v21  ;;  %9048 = vst [vmem:[#allocation7_spill] sm:$0xff] %v5416_v22  ;;  %v5421_v25 = vpop.f32.mrb[35].mxu1  ;;  %v5423_v26 = vpop.f32.mrb[35].mxu0 }
 0x1de   :  { %9049 = vst [vmem:[#allocation8_spill] sm:$0xff] %v5421_v25  ;;  %9050 = vst [vmem:[#allocation9_spill] sm:$0xff] %v5423_v26 }
 0x1df   :  { %4448 = vmatmul.mubr.msk.bf16.gmra.mrb[140].mxu1 %vm215_vm0, %v5167_v47  ;;  %4464 = vmatmul.mubr.msk.bf16.gmra.mrb[140].mxu0 %vm215_vm0, %v5167_v47 }
 0x1e0   :  { %4690 = vmatprep.mubr.msk.bf16.mxu1 %vm1519_vm2, %v4784_v24  ;;  %1999 = vmatprep.mubr.bf16.mxu0 %v9018_v36 }
 0x1e2   :  { %v5431_v27 = vpop.f32.mrb[36].mxu1  ;;  %v5433_v28 = vpop.f32.mrb[36].mxu0 }
 0x1e3   :  { %9051 = vst [vmem:[#allocation10_spill] sm:$0xff] %v5431_v27  ;;  %9052 = vst [vmem:[#allocation11_spill] sm:$0xff] %v5433_v28  ;;  %v5435_v29 = vpop.f32.mrb[37].mxu1  ;;  %v5437_v30 = vpop.f32.mrb[37].mxu0 }
 0x1e4   :  { %9053 = vst [vmem:[#allocation12_spill] sm:$0xff] %v5435_v29  ;;  %9054 = vst [vmem:[#allocation13_spill] sm:$0xff] %v5437_v30  ;;  %v5442_v32 = vpop.f32.mrb[38].mxu1  ;;  %v5444_v33 = vpop.f32.mrb[38].mxu0 }
 0x1e5   :  { %9055 = vst [vmem:[#allocation14_spill] sm:$0xff] %v5442_v32  ;;  %9056 = vst [vmem:[#allocation15_spill] sm:$0xff] %v5444_v33  ;;  %v5449_v35 = vpop.f32.mrb[39].mxu1  ;;  %v5451_v37 = vpop.f32.mrb[39].mxu0 }
 0x1e6   :  { %9057 = vst [vmem:[#allocation16_spill] sm:$0xff] %v5449_v35  ;;  %9058 = vst [vmem:[#allocation17_spill] sm:$0xff] %v5451_v37 }
 0x1e7   :  { %4691 = vmatmul.mubr.msk.bf16.vlgmr.msra.gmra.mrb[144].mxu1 %vm1519_vm2, %v4785_v31 }
 0x1e8   :  { %4694 = vmatprep.mubr.msk.bf16.mxu1 %vm1519_vm2, %v4786_v34  ;;  %v4789_v34 = vld [vmem:[%s9008_s1 + $0x28] sm:$0xff]  }
 0x1ea   :  { %v5455_v38 = vpop.f32.mrb[40].mxu1  ;;  %v5457_v41 = vpop.f32.mrb[40].mxu0 }
 0x1eb   :  { %9059 = vst [vmem:[#allocation18_spill] sm:$0xff] %v5455_v38  ;;  %9060 = vst [vmem:[#allocation19_spill] sm:$0xff] %v5457_v41  ;;  %v5459_v42 = vpop.f32.mrb[41].mxu1  ;;  %v5461_v44 = vpop.f32.mrb[41].mxu0 }
 0x1ec   :  { %9061 = vst [vmem:[#allocation20_spill] sm:$0xff] %v5459_v42  ;;  %9062 = vst [vmem:[#allocation21_spill] sm:$0xff] %v5461_v44  ;;  %v5466_v46 = vpop.f32.mrb[42].mxu1  ;;  %v5468_v47 = vpop.f32.mrb[42].mxu0 }
 0x1ed   :  { %9063 = vst [vmem:[#allocation22_spill] sm:$0xff] %v5466_v46  ;;  %9064 = vst [vmem:[#allocation23_spill] sm:$0xff] %v5468_v47  ;;  %v5473_v51 = vpop.f32.mrb[43].mxu1  ;;  %v5475_v58 = vpop.f32.mrb[43].mxu0 }
 0x1ee   :  { %9065 = vst [vmem:[#allocation24_spill] sm:$0xff] %v5473_v51  ;;  %9066 = vst [vmem:[#allocation25_spill] sm:$0xff] %v5475_v58 }
 0x1ef   :  { %4695 = vmatmul.mubr.msk.bf16.gmra.mrb[148].mxu1 %vm1519_vm2, %v4787_v45  ;;  %v4790_v45 = vld [vmem:[%s9008_s1 + $0x30] sm:$0xff]  }
 0x1f0   :  { %4698 = vmatprep.mubr.msk.bf16.mxu1 %vm1519_vm2, %v4788_v48 }
 0x1f2   :  { %v5479_v59 = vpop.f32.mrb[44].mxu1  ;;  %v5481_v60 = vpop.f32.mrb[44].mxu0 }
 0x1f3   :  { %9067 = vst [vmem:[#allocation26_spill] sm:$0xff] %v5479_v59  ;;  %9068 = vst [vmem:[#allocation27_spill] sm:$0xff] %v5481_v60  ;;  %v5483_v24 = vpop.f32.mrb[45].mxu1  ;;  %v5485_v31 = vpop.f32.mrb[45].mxu0 }
 0x1f4   :  { %9069 = vst [vmem:[#allocation28_spill] sm:$0xff] %v5483_v24  ;;  %9070 = vst [vmem:[#allocation29_spill] sm:$0xff] %v5485_v31  ;;  %v5490_v36 = vpop.f32.mrb[46].mxu1  ;;  %v5492_v51 = vpop.f32.mrb[46].mxu0 }
 0x1f5   :  { %9071 = vst [vmem:[#allocation30_spill] sm:$0xff] %v5490_v36  ;;  %9072 = vst [vmem:[#allocation31_spill] sm:$0xff] %v5492_v51  ;;  %v5497_v48 = vpop.f32.mrb[47].mxu1  ;;  %v5499_v59 = vpop.f32.mrb[47].mxu0  ;;  %v4791_v51 = vld [vmem:[%s9008_s1 + $0x38] sm:$0xff]  }
 0x1f6   :  { %9073 = vst [vmem:[#allocation32_spill] sm:$0xff] %v5497_v48  ;;  %9074 = vst [vmem:[#allocation33_spill] sm:$0xff] %v5499_v59 }
 0x1f7   :  { %4699 = vmatmul.mubr.msk.bf16.gmra.mrb[152].mxu1 %vm1519_vm2, %v4789_v34  ;;  %v4792_v34 = vld [vmem:[%s9008_s1 + $0x40] sm:$0xff]  }
 0x1f8   :  { %4702 = vmatprep.mubr.msk.bf16.mxu1 %vm1519_vm2, %v4790_v45 }
 0x1fa   :  { %v5503_v31 = vpop.f32.mrb[48].mxu1  ;;  %v5505_v24 = vpop.f32.mrb[48].mxu0 }
 0x1fb   :  { %9075 = vst [vmem:[#allocation34_spill] sm:$0xff] %v5503_v31  ;;  %9076 = vst [vmem:[#allocation35_spill] sm:$0xff] %v5505_v24  ;;  %v5507_v60 = vpop.f32.mrb[49].mxu1  ;;  %v5509_v36 = vpop.f32.mrb[49].mxu0 }
 0x1fc   :  { %9077 = vst [vmem:[#allocation36_spill] sm:$0xff] %v5507_v60  ;;  %9078 = vst [vmem:[#allocation37_spill] sm:$0xff] %v5509_v36  ;;  %v5514_v58 = vpop.f32.mrb[50].mxu1  ;;  %v5516_v48 = vpop.f32.mrb[50].mxu0 }
 0x1fd   :  { %9079 = vst [vmem:[#allocation38_spill] sm:$0xff] %v5514_v58  ;;  %9080 = vst [vmem:[#allocation39_spill] sm:$0xff] %v5516_v48  ;;  %v5521_v45 = vpop.f32.mrb[51].mxu1  ;;  %v5523_v31 = vpop.f32.mrb[51].mxu0  ;;  %v4793_v48 = vld [vmem:[%s9008_s1 + $0x48] sm:$0xff]  }
 0x1fe   :  { %9081 = vst [vmem:[#allocation40_spill] sm:$0xff] %v5521_v45  ;;  %9082 = vst [vmem:[#allocation41_spill] sm:$0xff] %v5523_v31  ;;  %v4794_v31 = vld [vmem:[%s9008_s1 + $0x50] sm:$0xff]  }
 0x1ff   :  { %4703 = vmatmul.mubr.msk.bf16.gmra.mrb[156].mxu1 %vm1519_vm2, %v4791_v51 }
 0x200   :  { %4706 = vmatprep.mubr.msk.bf16.mxu1 %vm1519_vm2, %v4792_v34  ;;  %v1789_v34 = vld [vmem:[%s9009_s8 + $0x40] sm:$0xff] }
 0x202   :  { %v5527_v36 = vpop.f32.mrb[52].mxu1  ;;  %v5529_v60 = vpop.f32.mrb[52].mxu0 }
 0x203   :  { %9083 = vst [vmem:[#allocation42_spill] sm:$0xff] %v5527_v36  ;;  %9084 = vst [vmem:[#allocation43_spill] sm:$0xff] %v5529_v60  ;;  %v5531_v24 = vpop.f32.mrb[53].mxu1  ;;  %v5533_v58 = vpop.f32.mrb[53].mxu0 }
 0x204   :  { %9085 = vst [vmem:[#allocation44_spill] sm:$0xff] %v5531_v24  ;;  %9086 = vst [vmem:[#allocation45_spill] sm:$0xff] %v5533_v58  ;;  %v5541_v45 = vpop.f32.mrb[54].mxu1  ;;  %v5543_v51 = vpop.f32.mrb[54].mxu0  ;;  %v1793_v58 = vld [vmem:[%s9009_s8 + $0x60] sm:$0xff]  ;;  %v1782_v24 = vld [vmem:[%s9009_s8 + $0x8] sm:$0xff] }
 0x205   :  { %9087 = vst [vmem:[#allocation46_spill] sm:$0xff] %v5541_v45  ;;  %9088 = vst [vmem:[#allocation47_spill] sm:$0xff] %v5543_v51  ;;  %v5554_v60 = vpop.f32.mrb[55].mxu1  ;;  %v5556_v36 = vpop.f32.mrb[55].mxu0  ;;  %v4506_v59 = vcombine.low %v1789_v34, %v1793_v58  ;;  %v4507_v45 = vcombine.high %v1789_v34, %v1793_v58  ;;  %v1786_v51 = vld [vmem:[%s9009_s8 + $0x28] sm:$0xff] }
 0x206   :  { %9089 = vst [vmem:[#allocation48_spill] sm:$0xff] %v5554_v60  ;;  %9090 = vst [vmem:[#allocation49_spill] sm:$0xff] %v5556_v36  ;;  %v4500_v47 = vcombine.low %v1782_v24, %v1786_v51  ;;  %v4501_v46 = vcombine.high %v1782_v24, %v1786_v51  ;;  %v4795_v24 = vld [vmem:[%s9008_s1 + $0x58] sm:$0xff]  }
 0x207   :  { %4707 = vmatmul.mubr.msk.bf16.gmra.mrb[160].mxu1 %vm1519_vm2, %v4793_v48  ;;  %1969 = vmatprep.subr.bf16.mxu0 %v4507_v45 }
 0x208   :  { %4710 = vmatprep.mubr.msk.bf16.mxu1 %vm1519_vm2, %v4794_v31  ;;  %2160 = vmatprep.subr.bf16.mxu1 %v4501_v46  ;;  %v4796_v46 = vld [vmem:[%s9008_s1 + $0x60] sm:$0xff]  }
 0x209   :  { %1970 = vmatpush1.bf16.msra.mxu0 %v4506_v59  ;;  %2161 = vmatpush1.bf16.msra.mxu1 %v4500_v47 }
 0x20a   :  { %v5563_v44 = vpop.f32.mrb[56].mxu1  ;;  %v5565_v60 = vpop.f32.mrb[56].mxu0 }
 0x20b   :  { %9091 = vst [vmem:[#allocation50_spill] sm:$0xff] %v5563_v44  ;;  %9092 = vst [vmem:[#allocation51_spill] sm:$0xff] %v5565_v60  ;;  %v5567_v36 = vpop.f32.mrb[57].mxu1  ;;  %v5569_v58 = vpop.f32.mrb[57].mxu0 }
 0x20c   :  { %9093 = vst [vmem:[#allocation52_spill] sm:$0xff] %v5567_v36  ;;  %9094 = vst [vmem:[#allocation53_spill] sm:$0xff] %v5569_v58  ;;  %v5574_v51 = vpop.f32.mrb[58].mxu1  ;;  %v5576_v48 = vpop.f32.mrb[58].mxu0 }
 0x20d   :  { %9095 = vst [vmem:[#allocation54_spill] sm:$0xff] %v5574_v51  ;;  %9096 = vst [vmem:[#allocation55_spill] sm:$0xff] %v5576_v48  ;;  %v5581_v47 = vpop.f32.mrb[59].mxu1  ;;  %v5583_v59 = vpop.f32.mrb[59].mxu0  ;;  %v4797_v48 = vld [vmem:[%s9008_s1 + $0x68] sm:$0xff]  }
 0x20e   :  { %9097 = vst [vmem:[#allocation56_spill] sm:$0xff] %v5581_v47  ;;  %9098 = vst [vmem:[#allocation57_spill] sm:$0xff] %v5583_v59 }
 0x20f   :  { %4711 = vmatmul.mubr.msk.bf16.gmra.mrb[164].mxu1 %vm1519_vm2, %v4795_v24  ;;  %v4798_v24 = vld [vmem:[%s9008_s1 + $0x70] sm:$0xff]  }
 0x210   :  { %4714 = vmatprep.mubr.msk.bf16.mxu1 %vm1519_vm2, %v4796_v46 }
 0x212   :  { %v5587_v31 = vpop.f32.mrb[60].mxu1  ;;  %v5589_v45 = vpop.f32.mrb[60].mxu0 }
 0x213   :  { %9099 = vst [vmem:[#allocation58_spill] sm:$0xff] %v5587_v31  ;;  %9100 = vst [vmem:[#allocation59_spill] sm:$0xff] %v5589_v45  ;;  %v5591_v34 = vpop.f32.mrb[61].mxu1  ;;  %v5593_v51 = vpop.f32.mrb[61].mxu0 }
 0x214   :  { %9101 = vst [vmem:[#allocation60_spill] sm:$0xff] %v5591_v34  ;;  %9102 = vst [vmem:[#allocation61_spill] sm:$0xff] %v5593_v51  ;;  %v5598_v58 = vpop.f32.mrb[62].mxu1  ;;  %v5600_v47 = vpop.f32.mrb[62].mxu0 }
 0x215   :  { %9103 = vst [vmem:[#allocation62_spill] sm:$0xff] %v5598_v58  ;;  %9104 = vst [vmem:[#allocation63_spill] sm:$0xff] %v5600_v47  ;;  %v5605_v46 = vpop.f32.mrb[63].mxu1  ;;  %v5607_v31 = vpop.f32.mrb[63].mxu0  ;;  %v4799_v47 = vld [vmem:[%s9008_s1 + $0x78] sm:$0xff]  }
 0x216   :  { %9105 = vst [vmem:[#allocation64_spill] sm:$0xff] %v5605_v46  ;;  %9106 = vst [vmem:[#allocation65_spill] sm:$0xff] %v5607_v31 }
 0x217   :  { %4715 = vmatmul.mubr.msk.bf16.gmra.mrb[168].mxu1 %vm1519_vm2, %v4797_v48 }
 0x218   :  { %4718 = vmatprep.mubr.msk.bf16.mxu1 %vm1519_vm2, %v4798_v24  ;;  %v9115_v24 = vmov 0  }
 0x21a   :  { %v5611_v51 = vpop.f32.mrb[64].mxu1  ;;  %v5613_v34 = vpop.f32.mrb[64].mxu0 }
 0x21b   :  { %9107 = vst [vmem:[#allocation66_spill] sm:$0xff] %v5611_v51  ;;  %9108 = vst [vmem:[#allocation67_spill] sm:$0xff] %v5613_v34  ;;  %v5615_v45 = vpop.f32.mrb[65].mxu1  ;;  %v5617_v58 = vpop.f32.mrb[65].mxu0 }
 0x21c   :  { %9109 = vst [vmem:[#allocation68_spill] sm:$0xff] %v5615_v45  ;;  %9110 = vst [vmem:[#allocation69_spill] sm:$0xff] %v5617_v58  ;;  %v5622_v59 = vpop.f32.mrb[66].mxu1  ;;  %v5624_v46 = vpop.f32.mrb[66].mxu0 }
 0x21d   :  { %9111 = vst [vmem:[#allocation70_spill] sm:$0xff] %v5622_v59  ;;  %9112 = vst [vmem:[#allocation71_spill] sm:$0xff] %v5624_v46  ;;  %v5626_v31 = vpop.f32.mrb[67].mxu1  ;;  %v5628_v48 = vpop.f32.mrb[67].mxu0 }
 0x21e   :  { %9113 = vst [vmem:[#allocation72_spill] sm:$0xff] %v5626_v31  ;;  %9114 = vst [vmem:[#allocation73_spill] sm:$0xff] %v5628_v48  ;;  %v1790_v48 = vld [vmem:[%s9009_s8 + $0x48] sm:$0xff] }
 0x21f   :  { %4719 = vmatmul.mubr.msk.bf16.gmra.mrb[172].mxu1 %vm1519_vm2, %v4799_v47  ;;  %v1794_v47 = vld [vmem:[%s9009_s8 + $0x68] sm:$0xff] }
 0x220   :  { %2192 = vmatprep.mubr.bf16.mxu1 %v9115_v24 }
 0x222   :  { %v5632_v34 = vpop.f32.mrb[68].mxu1  ;;  %v5634_v45 = vpop.f32.mrb[68].mxu0 }
 0x223   :  { %9116 = vst [vmem:[#allocation74_spill] sm:$0xff] %v5632_v34  ;;  %9117 = vst [vmem:[#allocation75_spill] sm:$0xff] %v5634_v45  ;;  %v5636_v58 = vpop.f32.mrb[69].mxu1  ;;  %v5638_v51 = vpop.f32.mrb[69].mxu0  ;;  %v4508_v45 = vcombine.low %v1790_v48, %v1794_v47 }
 0x224   :  { %9118 = vst [vmem:[#allocation76_spill] sm:$0xff] %v5636_v58  ;;  %9119 = vst [vmem:[#allocation77_spill] sm:$0xff] %v5638_v51  ;;  %v5640_v36 = vpop.f32.mrb[70].mxu1  ;;  %v5642_v59 = vpop.f32.mrb[70].mxu0  ;;  %v4509_v58 = vcombine.high %v1790_v48, %v1794_v47 }
 0x225   :  { %9120 = vst [vmem:[#allocation78_spill] sm:$0xff] %v5640_v36  ;;  %9121 = vst [vmem:[#allocation79_spill] sm:$0xff] %v5642_v59  ;;  %v5650_v31 = vpop.f32.mrb[71].mxu1  ;;  %v5652_v34 = vpop.f32.mrb[71].mxu0 }
 0x226   :  { %9122 = vst [vmem:[#allocation80_spill] sm:$0xff] %v5650_v31  ;;  %9123 = vst [vmem:[#allocation81_spill] sm:$0xff] %v5652_v34  ;;  %2162 = vmatprep.subr.bf16.mxu1 %v4509_v58 }
 0x227   :  { %2163 = vmatpush1.bf16.msra.mxu1 %v4508_v45 }
 0x22a   :  { %v5654_v51 = vpop.f32.mrb[72].mxu1  ;;  %v5656_v36 = vpop.f32.mrb[72].mxu0 }
 0x22b   :  { %9124 = vst [vmem:[#allocation82_spill] sm:$0xff] %v5654_v51  ;;  %9125 = vst [vmem:[#allocation83_spill] sm:$0xff] %v5656_v36  ;;  %v5658_v59 = vpop.f32.mrb[73].mxu1  ;;  %v5660_v46 = vpop.f32.mrb[73].mxu0 }
 0x22c   :  { %9126 = vst [vmem:[#allocation84_spill] sm:$0xff] %v5658_v59  ;;  %9127 = vst [vmem:[#allocation85_spill] sm:$0xff] %v5660_v46  ;;  %v5662_v60 = vpop.f32.mrb[74].mxu1  ;;  %v5664_v44 = vpop.f32.mrb[74].mxu0 }
 0x22d   :  { %9128 = vst [vmem:[#allocation86_spill] sm:$0xff] %v5662_v60  ;;  %9129 = vst [vmem:[#allocation87_spill] sm:$0xff] %v5664_v44  ;;  %v5666_v42 = vpop.f32.mrb[75].mxu1  ;;  %v5668_v31 = vpop.f32.mrb[75].mxu0 }
 0x22e   :  { %9130 = vst [vmem:[#allocation88_spill] sm:$0xff] %v5666_v42  ;;  %9131 = vst [vmem:[#allocation89_spill] sm:$0xff] %v5668_v31 }
 0x232   :  { %v5670_v34 = vpop.f32.mrb[76].mxu1  ;;  %v5672_v58 = vpop.f32.mrb[76].mxu0 }
 0x233   :  { %9132 = vst [vmem:[#allocation90_spill] sm:$0xff] %v5670_v34  ;;  %9133 = vst [vmem:[#allocation91_spill] sm:$0xff] %v5672_v58  ;;  %v5674_v45 = vpop.f32.mrb[77].mxu1  ;;  %v5676_v48 = vpop.f32.mrb[77].mxu0 }
 0x234   :  { %9134 = vst [vmem:[#allocation92_spill] sm:$0xff] %v5674_v45  ;;  %9135 = vst [vmem:[#allocation93_spill] sm:$0xff] %v5676_v48  ;;  %v5678_v47 = vpop.f32.mrb[78].mxu1  ;;  %v5680_v59 = vpop.f32.mrb[78].mxu0 }
 0x235   :  { %9136 = vst [vmem:[#allocation94_spill] sm:$0xff] %v5678_v47  ;;  %9137 = vst [vmem:[#allocation95_spill] sm:$0xff] %v5680_v59  ;;  %v5682_v46 = vpop.f32.mrb[79].mxu1  ;;  %v5684_v60 = vpop.f32.mrb[79].mxu0 }
 0x236   :  { %9138 = vst [vmem:[#allocation96_spill] sm:$0xff] %v5682_v46  ;;  %9139 = vst [vmem:[#allocation97_spill] sm:$0xff] %v5684_v60 }
 0x23a   :  { %v5686_v44 = vpop.f32.mrb[80].mxu1  ;;  %v5688_v42 = vpop.f32.mrb[80].mxu0 }
 0x23b   :  { %9140 = vst [vmem:[#allocation98_spill] sm:$0xff] %v5686_v44  ;;  %9141 = vst [vmem:[#allocation99_spill] sm:$0xff] %v5688_v42  ;;  %v5690_v31 = vpop.f32.mrb[81].mxu1  ;;  %v5692_v34 = vpop.f32.mrb[81].mxu0  ;;  %v5709_v42 = vld [vmem:[%s9009_s8 + $0x10] sm:$0xff] }
 0x23c   :  { %9142 = vst [vmem:[#allocation100_spill] sm:$0xff] %v5690_v31  ;;  %9143 = vst [vmem:[#allocation101_spill] sm:$0xff] %v5692_v34  ;;  %v5694_v58 = vpop.f32.mrb[82].mxu1  ;;  %v5696_v45 = vpop.f32.mrb[82].mxu0  ;;  %v5714_v34 = vld [vmem:[%s9009_s8 + $0x30] sm:$0xff] }
 0x23d   :  { %9144 = vst [vmem:[#allocation102_spill] sm:$0xff] %v5694_v58  ;;  %9145 = vst [vmem:[#allocation103_spill] sm:$0xff] %v5696_v45  ;;  %v5698_v48 = vpop.f32.mrb[83].mxu1  ;;  %v5700_v47 = vpop.f32.mrb[83].mxu0  ;;  %v4503_v45 = vcombine.high %v5709_v42, %v5714_v34  ;;  %v5732_v58 = vld [vmem:[%s9009_s8 + $0x38] sm:$0xff] }
 0x23e   :  { %9146 = vst [vmem:[#allocation104_spill] sm:$0xff] %v5698_v48  ;;  %9147 = vst [vmem:[#allocation105_spill] sm:$0xff] %v5700_v47  ;;  %v5719_v48 = vld [vmem:[%s9009_s8 + $0x18] sm:$0xff] }
 0x23f   :  { %2353 = vmatprep.subr.bf16.mxu0 %v4503_v45 }
 0x242   :  { %v5702_v59 = vpop.f32.mrb[84].mxu1  ;;  %v5704_v46 = vpop.f32.mrb[84].mxu0 }
 0x243   :  { %9148 = vst [vmem:[#allocation106_spill] sm:$0xff] %v5702_v59  ;;  %9149 = vst [vmem:[#allocation107_spill] sm:$0xff] %v5704_v46  ;;  %v5721_v47 = vpop.f32.mrb[85].mxu1  ;;  %v5723_v59 = vpop.f32.mrb[85].mxu0 }
 0x244   :  { %9150 = vst [vmem:[#allocation108_spill] sm:$0xff] %v5721_v47  ;;  %9151 = vst [vmem:[#allocation109_spill] sm:$0xff] %v5723_v59  ;;  %v5734_v31 = vpop.f32.mrb[86].mxu1  ;;  %v5736_v44 = vpop.f32.mrb[86].mxu0  ;;  %v4505_v59 = vcombine.high %v5719_v48, %v5732_v58 }
 0x245   :  { %9152 = vst [vmem:[#allocation110_spill] sm:$0xff] %v5734_v31  ;;  %9153 = vst [vmem:[#allocation111_spill] sm:$0xff] %v5736_v44  ;;  %v5742_v60 = vpop.f32.mrb[87].mxu1  ;;  %v5744_v46 = vpop.f32.mrb[87].mxu0 }
 0x246   :  { %9154 = vst [vmem:[#allocation112_spill] sm:$0xff] %v5742_v60  ;;  %9155 = vst [vmem:[#allocation113_spill] sm:$0xff] %v5744_v46  ;;  %2546 = vmatprep.subr.bf16.mxu1 %v4505_v59 }
 0x24a   :  { %v5746_v36 = vpop.f32.mrb[88].mxu1  ;;  %v5748_v51 = vpop.f32.mrb[88].mxu0 }
 0x24b   :  { %9156 = vst [vmem:[#allocation114_spill] sm:$0xff] %v5746_v36  ;;  %9157 = vst [vmem:[#allocation115_spill] sm:$0xff] %v5748_v51  ;;  %v5750_v41 = vpop.f32.mrb[89].mxu1  ;;  %v5752_v31 = vpop.f32.mrb[89].mxu0 }
 0x24c   :  { %9158 = vst [vmem:[#allocation116_spill] sm:$0xff] %v5750_v41  ;;  %9159 = vst [vmem:[#allocation117_spill] sm:$0xff] %v5752_v31  ;;  %v5754_v44 = vpop.f32.mrb[90].mxu1  ;;  %v5756_v47 = vpop.f32.mrb[90].mxu0 }
 0x24d   :  { %9160 = vst [vmem:[#allocation118_spill] sm:$0xff] %v5754_v44  ;;  %9161 = vst [vmem:[#allocation119_spill] sm:$0xff] %v5756_v47  ;;  %v5758_v38 = vpop.f32.mrb[91].mxu1  ;;  %v5760_v37 = vpop.f32.mrb[91].mxu0 }
 0x24e   :  { %9162 = vst [vmem:[#allocation120_spill] sm:$0xff] %v5758_v38  ;;  %9163 = vst [vmem:[#allocation121_spill] sm:$0xff] %v5760_v37 }
 0x252   :  { %v5762_v60 = vpop.f32.mrb[92].mxu1  ;;  %v5764_v45 = vpop.f32.mrb[92].mxu0 }
 0x253   :  { %9164 = vst [vmem:[#allocation122_spill] sm:$0xff] %v5762_v60  ;;  %9165 = vst [vmem:[#allocation123_spill] sm:$0xff] %v5764_v45  ;;  %v5766_v59 = vpop.f32.mrb[93].mxu1  ;;  %v5768_v36 = vpop.f32.mrb[93].mxu0 }
 0x254   :  { %9166 = vst [vmem:[#allocation124_spill] sm:$0xff] %v5766_v59  ;;  %9167 = vst [vmem:[#allocation125_spill] sm:$0xff] %v5768_v36  ;;  %v5770_v51 = vpop.f32.mrb[94].mxu1  ;;  %v5772_v41 = vpop.f32.mrb[94].mxu0 }
 0x255   :  { %9168 = vst [vmem:[#allocation126_spill] sm:$0xff] %v5770_v51  ;;  %9169 = vst [vmem:[#allocation127_spill] sm:$0xff] %v5772_v41  ;;  %v5774_v31 = vpop.f32.mrb[95].mxu1  ;;  %v5776_v44 = vpop.f32.mrb[95].mxu0 }
 0x256   :  { %9170 = vst [vmem:[#allocation128_spill] sm:$0xff] %v5774_v31  ;;  %9171 = vst [vmem:[#allocation129_spill] sm:$0xff] %v5776_v44 }
 0x25a   :  { %v5778_v47 = vpop.f32.mrb[96].mxu1  ;;  %v5780_v38 = vpop.f32.mrb[96].mxu0 }
 0x25b   :  { %9172 = vst [vmem:[#allocation130_spill] sm:$0xff] %v5778_v47  ;;  %9173 = vst [vmem:[#allocation131_spill] sm:$0xff] %v5780_v38  ;;  %v5782_v37 = vpop.f32.mrb[97].mxu1  ;;  %v5784_v60 = vpop.f32.mrb[97].mxu0 }
 0x25c   :  { %9174 = vst [vmem:[#allocation132_spill] sm:$0xff] %v5782_v37  ;;  %9175 = vst [vmem:[#allocation133_spill] sm:$0xff] %v5784_v60  ;;  %v5786_v45 = vpop.f32.mrb[98].mxu1  ;;  %v5788_v59 = vpop.f32.mrb[98].mxu0 }
 0x25d   :  { %9176 = vst [vmem:[#allocation134_spill] sm:$0xff] %v5786_v45  ;;  %9177 = vst [vmem:[#allocation135_spill] sm:$0xff] %v5788_v59  ;;  %v5790_v36 = vpop.f32.mrb[99].mxu1  ;;  %v5792_v51 = vpop.f32.mrb[99].mxu0 }
 0x25e   :  { %9178 = vst [vmem:[#allocation136_spill] sm:$0xff] %v5790_v36  ;;  %9179 = vst [vmem:[#allocation137_spill] sm:$0xff] %v5792_v51 }
 0x262   :  { %v5794_v41 = vpop.f32.mrb[100].mxu1  ;;  %v5796_v31 = vpop.f32.mrb[100].mxu0 }
 0x263   :  { %9180 = vst [vmem:[#allocation138_spill] sm:$0xff] %v5794_v41  ;;  %9181 = vst [vmem:[#allocation139_spill] sm:$0xff] %v5796_v31  ;;  %v5798_v44 = vpop.f32.mrb[101].mxu1  ;;  %v5800_v47 = vpop.f32.mrb[101].mxu0 }
 0x264   :  { %9182 = vst [vmem:[#allocation140_spill] sm:$0xff] %v5798_v44  ;;  %9183 = vst [vmem:[#allocation141_spill] sm:$0xff] %v5800_v47  ;;  %v5802_v38 = vpop.f32.mrb[102].mxu1  ;;  %v5804_v37 = vpop.f32.mrb[102].mxu0 }
 0x265   :  { %9184 = vst [vmem:[#allocation142_spill] sm:$0xff] %v5802_v38  ;;  %9185 = vst [vmem:[#allocation143_spill] sm:$0xff] %v5804_v37  ;;  %v5806_v60 = vpop.f32.mrb[103].mxu1  ;;  %v5808_v45 = vpop.f32.mrb[103].mxu0 }
 0x266   :  { %9186 = vst [vmem:[#allocation144_spill] sm:$0xff] %v5806_v60  ;;  %9187 = vst [vmem:[#allocation145_spill] sm:$0xff] %v5808_v45 }
 0x26a   :  { %v5810_v59 = vpop.f32.mrb[104].mxu1  ;;  %v5812_v36 = vpop.f32.mrb[104].mxu0 }
 0x26b   :  { %9188 = vst [vmem:[#allocation146_spill] sm:$0xff] %v5810_v59  ;;  %9189 = vst [vmem:[#allocation147_spill] sm:$0xff] %v5812_v36  ;;  %v5814_v51 = vpop.f32.mrb[105].mxu1  ;;  %v5816_v41 = vpop.f32.mrb[105].mxu0 }
 0x26c   :  { %9190 = vst [vmem:[#allocation148_spill] sm:$0xff] %v5814_v51  ;;  %9191 = vst [vmem:[#allocation149_spill] sm:$0xff] %v5816_v41  ;;  %v5818_v31 = vpop.f32.mrb[106].mxu1  ;;  %v5820_v44 = vpop.f32.mrb[106].mxu0 }
 0x26d   :  { %9192 = vst [vmem:[#allocation150_spill] sm:$0xff] %v5818_v31  ;;  %9193 = vst [vmem:[#allocation151_spill] sm:$0xff] %v5820_v44  ;;  %v5822_v47 = vpop.f32.mrb[107].mxu1  ;;  %v5824_v38 = vpop.f32.mrb[107].mxu0 }
 0x26e   :  { %9194 = vst [vmem:[#allocation152_spill] sm:$0xff] %v5822_v47  ;;  %9195 = vst [vmem:[#allocation153_spill] sm:$0xff] %v5824_v38 }
 0x272   :  { %v5826_v37 = vpop.f32.mrb[108].mxu1  ;;  %v5828_v60 = vpop.f32.mrb[108].mxu0 }
 0x273   :  { %9196 = vst [vmem:[#allocation154_spill] sm:$0xff] %v5826_v37  ;;  %9197 = vst [vmem:[#allocation155_spill] sm:$0xff] %v5828_v60  ;;  %v5830_v45 = vpop.f32.mrb[109].mxu1  ;;  %v5832_v59 = vpop.f32.mrb[109].mxu0 }
 0x274   :  { %9198 = vst [vmem:[#allocation156_spill] sm:$0xff] %v5830_v45  ;;  %9199 = vst [vmem:[#allocation157_spill] sm:$0xff] %v5832_v59  ;;  %v5834_v36 = vpop.f32.mrb[110].mxu1  ;;  %v5836_v51 = vpop.f32.mrb[110].mxu0 }
 0x275   :  { %9200 = vst [vmem:[#allocation158_spill] sm:$0xff] %v5834_v36  ;;  %9201 = vst [vmem:[#allocation159_spill] sm:$0xff] %v5836_v51  ;;  %v5838_v41 = vpop.f32.mrb[111].mxu1  ;;  %v5840_v31 = vpop.f32.mrb[111].mxu0 }
 0x276   :  { %9202 = vst [vmem:[#allocation160_spill] sm:$0xff] %v5838_v41  ;;  %9203 = vst [vmem:[#allocation161_spill] sm:$0xff] %v5840_v31 }
 0x27a   :  { %v5842_v44 = vpop.f32.mrb[112].mxu1  ;;  %v5844_v47 = vpop.f32.mrb[112].mxu0 }
 0x27b   :  { %9204 = vst [vmem:[#allocation162_spill] sm:$0xff] %v5842_v44  ;;  %9205 = vst [vmem:[#allocation163_spill] sm:$0xff] %v5844_v47  ;;  %v5846_v38 = vpop.f32.mrb[113].mxu1  ;;  %v5848_v37 = vpop.f32.mrb[113].mxu0 }
 0x27c   :  { %9206 = vst [vmem:[#allocation164_spill] sm:$0xff] %v5846_v38  ;;  %9207 = vst [vmem:[#allocation165_spill] sm:$0xff] %v5848_v37  ;;  %v5850_v60 = vpop.f32.mrb[114].mxu1  ;;  %v5852_v45 = vpop.f32.mrb[114].mxu0 }
 0x27d   :  { %9208 = vst [vmem:[#allocation166_spill] sm:$0xff] %v5850_v60  ;;  %9209 = vst [vmem:[#allocation167_spill] sm:$0xff] %v5852_v45  ;;  %v5854_v59 = vpop.f32.mrb[115].mxu1  ;;  %v5856_v36 = vpop.f32.mrb[115].mxu0 }
 0x27e   :  { %9210 = vst [vmem:[#allocation168_spill] sm:$0xff] %v5854_v59  ;;  %9211 = vst [vmem:[#allocation169_spill] sm:$0xff] %v5856_v36 }
 0x282   :  { %v5858_v51 = vpop.f32.mrb[116].mxu1  ;;  %v5860_v41 = vpop.f32.mrb[116].mxu0 }
 0x283   :  { %9212 = vst [vmem:[#allocation170_spill] sm:$0xff] %v5858_v51  ;;  %9213 = vst [vmem:[#allocation171_spill] sm:$0xff] %v5860_v41  ;;  %v5862_v31 = vpop.f32.mrb[117].mxu1  ;;  %v5864_v44 = vpop.f32.mrb[117].mxu0 }
 0x284   :  { %9214 = vst [vmem:[#allocation172_spill] sm:$0xff] %v5862_v31  ;;  %9215 = vst [vmem:[#allocation173_spill] sm:$0xff] %v5864_v44  ;;  %v5866_v47 = vpop.f32.mrb[118].mxu1  ;;  %v5868_v38 = vpop.f32.mrb[118].mxu0 }
 0x285   :  { %9216 = vst [vmem:[#allocation174_spill] sm:$0xff] %v5866_v47  ;;  %9217 = vst [vmem:[#allocation175_spill] sm:$0xff] %v5868_v38  ;;  %v5870_v37 = vpop.f32.mrb[119].mxu1  ;;  %v5872_v60 = vpop.f32.mrb[119].mxu0 }
 0x286   :  { %9218 = vst [vmem:[#allocation176_spill] sm:$0xff] %v5870_v37  ;;  %9219 = vst [vmem:[#allocation177_spill] sm:$0xff] %v5872_v60 }
 0x28a   :  { %v5874_v45 = vpop.f32.mrb[120].mxu1  ;;  %v5876_v59 = vpop.f32.mrb[120].mxu0 }
 0x28b   :  { %9220 = vst [vmem:[#allocation178_spill] sm:$0xff] %v5874_v45  ;;  %9221 = vst [vmem:[#allocation179_spill] sm:$0xff] %v5876_v59  ;;  %v5878_v36 = vpop.f32.mrb[121].mxu1  ;;  %v5880_v51 = vpop.f32.mrb[121].mxu0 }
 0x28c   :  { %9222 = vst [vmem:[#allocation180_spill] sm:$0xff] %v5878_v36  ;;  %9223 = vst [vmem:[#allocation181_spill] sm:$0xff] %v5880_v51  ;;  %v5882_v41 = vpop.f32.mrb[122].mxu1  ;;  %v5884_v31 = vpop.f32.mrb[122].mxu0 }
 0x28d   :  { %9224 = vst [vmem:[#allocation182_spill] sm:$0xff] %v5882_v41  ;;  %9225 = vst [vmem:[#allocation183_spill] sm:$0xff] %v5884_v31  ;;  %v5886_v44 = vpop.f32.mrb[123].mxu1  ;;  %v5888_v47 = vpop.f32.mrb[123].mxu0 }
 0x28e   :  { %9226 = vst [vmem:[#allocation184_spill] sm:$0xff] %v5886_v44  ;;  %9227 = vst [vmem:[#allocation185_spill] sm:$0xff] %v5888_v47 }
 0x292   :  { %v5890_v38 = vpop.f32.mrb[124].mxu1  ;;  %v5892_v37 = vpop.f32.mrb[124].mxu0 }
 0x293   :  { %9228 = vst [vmem:[#allocation186_spill] sm:$0xff] %v5890_v38  ;;  %9229 = vst [vmem:[#allocation187_spill] sm:$0xff] %v5892_v37  ;;  %v5894_v60 = vpop.f32.mrb[125].mxu1  ;;  %v5896_v45 = vpop.f32.mrb[125].mxu0 }
 0x294   :  { %9230 = vst [vmem:[#allocation188_spill] sm:$0xff] %v5894_v60  ;;  %9231 = vst [vmem:[#allocation189_spill] sm:$0xff] %v5896_v45  ;;  %v5898_v59 = vpop.f32.mrb[126].mxu1  ;;  %v5900_v36 = vpop.f32.mrb[126].mxu0 }
 0x295   :  { %9232 = vst [vmem:[#allocation190_spill] sm:$0xff] %v5898_v59  ;;  %9233 = vst [vmem:[#allocation191_spill] sm:$0xff] %v5900_v36  ;;  %v5902_v51 = vpop.f32.mrb[127].mxu1  ;;  %v5904_v41 = vpop.f32.mrb[127].mxu0 }
 0x296   :  { %9234 = vst [vmem:[#allocation192_spill] sm:$0xff] %v5902_v51  ;;  %9235 = vst [vmem:[#allocation193_spill] sm:$0xff] %v5904_v41 }
 0x29a   :  { %v5906_v31 = vpop.f32.mrb[128].mxu1  ;;  %v5908_v44 = vpop.f32.mrb[128].mxu0 }
 0x29b   :  { %9236 = vst [vmem:[#allocation194_spill] sm:$0xff] %v5906_v31  ;;  %9237 = vst [vmem:[#allocation195_spill] sm:$0xff] %v5908_v44  ;;  %v5910_v47 = vpop.f32.mrb[129].mxu1  ;;  %v5912_v38 = vpop.f32.mrb[129].mxu0 }
 0x29c   :  { %9238 = vst [vmem:[#allocation196_spill] sm:$0xff] %v5910_v47  ;;  %9239 = vst [vmem:[#allocation197_spill] sm:$0xff] %v5912_v38  ;;  %v5914_v37 = vpop.f32.mrb[130].mxu1  ;;  %v5916_v60 = vpop.f32.mrb[130].mxu0 }
 0x29d   :  { %9240 = vst [vmem:[#allocation198_spill] sm:$0xff] %v5914_v37  ;;  %9241 = vst [vmem:[#allocation199_spill] sm:$0xff] %v5916_v60  ;;  %v5918_v45 = vpop.f32.mrb[131].mxu1  ;;  %v5920_v59 = vpop.f32.mrb[131].mxu0 }
 0x29e   :  { %9242 = vst [vmem:[#allocation200_spill] sm:$0xff] %v5918_v45  ;;  %9243 = vst [vmem:[#allocation201_spill] sm:$0xff] %v5920_v59 }
 0x2a2   :  { %v5922_v36 = vpop.f32.mrb[132].mxu1  ;;  %v5924_v51 = vpop.f32.mrb[132].mxu0 }
 0x2a3   :  { %9244 = vst [vmem:[#allocation202_spill] sm:$0xff] %v5922_v36  ;;  %9245 = vst [vmem:[#allocation203_spill] sm:$0xff] %v5924_v51  ;;  %v5926_v41 = vpop.f32.mrb[133].mxu1  ;;  %v5928_v31 = vpop.f32.mrb[133].mxu0 }
 0x2a4   :  { %9246 = vst [vmem:[#allocation204_spill] sm:$0xff] %v5926_v41  ;;  %9247 = vst [vmem:[#allocation205_spill] sm:$0xff] %v5928_v31  ;;  %v5930_v44 = vpop.f32.mrb[134].mxu1  ;;  %v5932_v47 = vpop.f32.mrb[134].mxu0 }
 0x2a5   :  { %9248 = vst [vmem:[#allocation206_spill] sm:$0xff] %v5930_v44  ;;  %9249 = vst [vmem:[#allocation207_spill] sm:$0xff] %v5932_v47  ;;  %v5934_v38 = vpop.f32.mrb[135].mxu1  ;;  %v5936_v37 = vpop.f32.mrb[135].mxu0 }
 0x2a6   :  { %9250 = vst [vmem:[#allocation208_spill] sm:$0xff] %v5934_v38  ;;  %9251 = vst [vmem:[#allocation209_spill] sm:$0xff] %v5936_v37 }
 0x2aa   :  { %v5938_v60 = vpop.f32.mrb[136].mxu1  ;;  %v5940_v45 = vpop.f32.mrb[136].mxu0 }
 0x2ab   :  { %9252 = vst [vmem:[#allocation210_spill] sm:$0xff] %v5938_v60  ;;  %9253 = vst [vmem:[#allocation211_spill] sm:$0xff] %v5940_v45  ;;  %v5942_v59 = vpop.f32.mrb[137].mxu1  ;;  %v5944_v36 = vpop.f32.mrb[137].mxu0 }
 0x2ac   :  { %9254 = vst [vmem:[#allocation212_spill] sm:$0xff] %v5942_v59  ;;  %9255 = vst [vmem:[#allocation213_spill] sm:$0xff] %v5944_v36  ;;  %v5946_v51 = vpop.f32.mrb[138].mxu1  ;;  %v5948_v41 = vpop.f32.mrb[138].mxu0 }
 0x2ad   :  { %9256 = vst [vmem:[#allocation214_spill] sm:$0xff] %v5946_v51  ;;  %9257 = vst [vmem:[#allocation215_spill] sm:$0xff] %v5948_v41  ;;  %v5950_v31 = vpop.f32.mrb[139].mxu1  ;;  %v5952_v44 = vpop.f32.mrb[139].mxu0 }
 0x2ae   :  { %9258 = vst [vmem:[#allocation216_spill] sm:$0xff] %v5950_v31  ;;  %9259 = vst [vmem:[#allocation217_spill] sm:$0xff] %v5952_v44  ;;  %v5973_v44 = vld [vmem:[%s9010_s7] ss:$0 sm:$0xff] }
 0x2b2   :  { %v5954_v47 = vpop.f32.mrb[140].mxu1  ;;  %v5956_v38 = vpop.f32.mrb[140].mxu0 }
 0x2b3   :  { %9260 = vst [vmem:[#allocation218_spill] sm:$0xff] %v5954_v47  ;;  %9261 = vst [vmem:[#allocation219_spill] sm:$0xff] %v5956_v38  ;;  %v5958_v37 = vpop.f32.mrb[141].mxu1  ;;  %v5960_v60 = vpop.f32.mrb[141].mxu0 }
 0x2b4   :  { %9262 = vst [vmem:[#allocation220_spill] sm:$0xff] %v5958_v37  ;;  %9263 = vst [vmem:[#allocation221_spill] sm:$0xff] %v5960_v60  ;;  %v5962_v45 = vpop.f32.mrb[142].mxu1  ;;  %v5964_v59 = vpop.f32.mrb[142].mxu0 }
 0x2b5   :  { %9264 = vst [vmem:[#allocation222_spill] sm:$0xff] %v5962_v45  ;;  %9265 = vst [vmem:[#allocation223_spill] sm:$0xff] %v5964_v59  ;;  %v5966_v36 = vpop.f32.mrb[143].mxu1  ;;  %v5968_v51 = vpop.f32.mrb[143].mxu0 }
 0x2b6   :  { %9266 = vst [vmem:[#allocation224_spill] sm:$0xff] %v5966_v36  ;;  %9267 = vst [vmem:[#allocation225_spill] sm:$0xff] %v5968_v51  ;;  %v1791_v51 = vld [vmem:[%s9009_s8 + $0x50] sm:$0xff] }
 0x2ba   :  { %v4692_v47 = vpop.f32.mrb[144].mxu1 }
 0x2bb   :  { %v1615_v38 = vadd.f32 %v4692_v47, %v5973_v44  ;;  %v1606_v31 = vpop.f32.mrb[145].mxu1  ;;  %v1795_v47 = vld [vmem:[%s9009_s8 + $0x70] sm:$0xff] }
 0x2bc   :  { %v1607_v37 = vadd.f32 %v5973_v44, %v1606_v31  ;;  %v4693_v60 = vpop.f32.mrb[146].mxu1  ;;  %v1792_v31 = vld [vmem:[%s9009_s8 + $0x58] sm:$0xff]  ;;  %v4511_v32 = vcombine.high %v1791_v51, %v1795_v47  ;;  %v4510_v27 = vcombine.low %v1791_v51, %v1795_v47 }
 0x2bd   :  { %v1618_v45 = vadd.f32 %v4693_v60, %v5973_v44  ;;  %v1609_v41 = vpop.f32.mrb[147].mxu1  ;;  %v1735_v36 = vmax.f32 %v1615_v38, 0.0 }
 0x2be   :  { %v1610_v59 = vadd.f32 %v5973_v44, %v1609_v41  ;;  %v1733_v35 = vmax.f32 %v1607_v37, 0.0  ;;  %v1796_v41 = vld [vmem:[%s9009_s8 + $0x78] sm:$0xff] }
 0x2bf   :  { %v1736_v46 = vmax.f32 %v1618_v45, 0.0  ;;  %v4513_v30 = vcombine.high %v1792_v31, %v1796_v41  ;;  %v4512_v26 = vcombine.low %v1792_v31, %v1796_v41 }
 0x2c0   :  { %v1734_v33 = vmax.f32 %v1610_v59, 0.0 }
 0x2c1   :  { %v5991_v38 = vpack.c.bf16 %v1736_v46, %v1735_v36  ;;  %v9268_v36 = vcombine.low %v5709_v42, %v5714_v34 }
 0x2c2   :  { %v5993_v60 = vpack.c.bf16 %v1734_v33, %v1733_v35  ;;  %v4696_v45 = vpop.f32.mrb[148].mxu1  ;;  %v9269_v33 = vcombine.low %v5719_v48, %v5732_v58 }
 0x2c3   :  { %v1631_v37 = vadd.f32 %v4696_v45, %v5973_v44  ;;  %v1622_v59 = vpop.f32.mrb[149].mxu1 }
 0x2c4   :  { %4514 = vmatmul.mubr.msk.bf16.vlgmr.msra.gmra.mrb[144].mxu0 %vm215_vm0, %v5993_v60  ;;  %4530 = vmatmul.mubr.msk.bf16.vlgmr.msra.gmra.mrb[176].mxu1 %vm215_vm0, %v5993_v60  ;;  %v1623_v29 = vadd.f32 %v5973_v44, %v1622_v59  ;;  %v4697_v28 = vpop.f32.mrb[150].mxu1 }
 0x2c5   :  { %2354 = vmatpush1.bf16.msra.mxu0 %v9268_v36  ;;  %2547 = vmatpush1.bf16.msra.mxu1 %v9269_v33  ;;  %v1739_v35 = vmax.f32 %v1631_v37, 0.0  ;;  %v1634_v46 = vadd.f32 %v4697_v28, %v5973_v44  ;;  %v1625_v45 = vpop.f32.mrb[151].mxu1 }
 0x2c6   :  { %v1737_v25 = vmax.f32 %v1623_v29, 0.0  ;;  %v1626_v22 = vadd.f32 %v5973_v44, %v1625_v45  ;;  %2009 = vmatprep.mubr.bf16.mxu0 %v9115_v24  ;;  %2202 = vmatprep.mubr.bf16.mxu1 %v9115_v24 }
 0x2c7   :  { %v1740_v59 = vmax.f32 %v1634_v46, 0.0  ;;  %2355 = vmatprep.subr.bf16.mxu0 %v4511_v32  ;;  %2548 = vmatprep.subr.bf16.mxu1 %v4513_v30 }
 0x2c8   :  { %v1738_v42 = vmax.f32 %v1626_v22, 0.0 }
 0x2c9   :  { %v6011_v34 = vpack.c.bf16 %v1740_v59, %v1739_v35  ;;  %2356 = vmatpush1.bf16.msra.mxu0 %v4510_v27  ;;  %2549 = vmatpush1.bf16.msra.mxu1 %v4512_v26 }
 0x2ca   :  { %v6013_v58 = vpack.c.bf16 %v1738_v42, %v1737_v25  ;;  %v4700_v28 = vpop.f32.mrb[152].mxu1 }
 0x2cb   :  { %v1647_v51 = vadd.f32 %v4700_v28, %v5973_v44  ;;  %v1638_v29 = vpop.f32.mrb[153].mxu1 }
 0x2cc   :  { %4515 = vmatmul.mubr.msk.bf16.gmra.mrb[148].mxu0 %vm215_vm0, %v5991_v38  ;;  %4531 = vmatmul.mubr.msk.bf16.gmra.mrb[180].mxu1 %vm215_vm0, %v5991_v38  ;;  %v1639_v32 = vadd.f32 %v5973_v44, %v1638_v29  ;;  %v4701_v30 = vpop.f32.mrb[154].mxu1 }
 0x2cd   :  { %2019 = vmatprep.mubr.bf16.mxu0 %v9115_v24  ;;  %2212 = vmatprep.mubr.bf16.mxu1 %v9115_v24  ;;  %v1743_v22 = vmax.f32 %v1647_v51, 0.0  ;;  %v1650_v25 = vadd.f32 %v4701_v30, %v5973_v44  ;;  %v1641_v26 = vpop.f32.mrb[155].mxu1 }
 0x2ce   :  { %v1741_v27 = vmax.f32 %v1639_v32, 0.0  ;;  %v1642_v48 = vadd.f32 %v5973_v44, %v1641_v26 }
 0x2cf   :  { %v1744_v47 = vmax.f32 %v1650_v25, 0.0 }
 0x2d0   :  { %v1742_v31 = vmax.f32 %v1642_v48, 0.0 }
 0x2d1   :  { %v6025_v41 = vpack.c.bf16 %v1744_v47, %v1743_v22 }
 0x2d2   :  { %v6027_v37 = vpack.c.bf16 %v1742_v31, %v1741_v27  ;;  %v4704_v36 = vpop.f32.mrb[156].mxu1 }
 0x2d3   :  { %v1663_v33 = vadd.f32 %v4704_v36, %v5973_v44  ;;  %v1654_v35 = vpop.f32.mrb[157].mxu1 }
 0x2d4   :  { %4516 = vmatmul.mubr.msk.bf16.gmra.mrb[152].mxu0 %vm215_vm0, %v6013_v58  ;;  %4532 = vmatmul.mubr.msk.bf16.gmra.mrb[184].mxu1 %vm215_vm0, %v6013_v58  ;;  %v1655_v46 = vadd.f32 %v5973_v44, %v1654_v35  ;;  %v4705_v45 = vpop.f32.mrb[158].mxu1 }
 0x2d5   :  { %2029 = vmatprep.mubr.bf16.mxu0 %v9115_v24  ;;  %2222 = vmatprep.mubr.bf16.mxu1 %v9115_v24  ;;  %v1747_v59 = vmax.f32 %v1663_v33, 0.0  ;;  %v1666_v42 = vadd.f32 %v4705_v45, %v5973_v44  ;;  %v1657_v28 = vpop.f32.mrb[159].mxu1 }
 0x2d6   :  { %v1745_v51 = vmax.f32 %v1655_v46, 0.0  ;;  %v1658_v29 = vadd.f32 %v5973_v44, %v1657_v28 }
 0x2d7   :  { %v1748_v32 = vmax.f32 %v1666_v42, 0.0 }
 0x2d8   :  { %v1746_v30 = vmax.f32 %v1658_v29, 0.0 }
 0x2d9   :  { %v6039_v22 = vpack.c.bf16 %v1748_v32, %v1747_v59 }
 0x2da   :  { %v6041_v25 = vpack.c.bf16 %v1746_v30, %v1745_v51  ;;  %v4708_v26 = vpop.f32.mrb[160].mxu1 }
 0x2db   :  { %v1679_v27 = vadd.f32 %v4708_v26, %v5973_v44  ;;  %v1670_v48 = vpop.f32.mrb[161].mxu1 }
 0x2dc   :  { %4517 = vmatmul.mubr.msk.bf16.gmra.mrb[156].mxu0 %vm215_vm0, %v6011_v34  ;;  %4533 = vmatmul.mubr.msk.bf16.gmra.mrb[188].mxu1 %vm215_vm0, %v6011_v34  ;;  %v1671_v47 = vadd.f32 %v5973_v44, %v1670_v48  ;;  %v4709_v31 = vpop.f32.mrb[162].mxu1 }
 0x2dd   :  { %2039 = vmatprep.mubr.bf16.mxu0 %v9115_v24  ;;  %2232 = vmatprep.mubr.bf16.mxu1 %v9115_v24  ;;  %v1751_v36 = vmax.f32 %v1679_v27, 0.0  ;;  %v1682_v33 = vadd.f32 %v4709_v31, %v5973_v44  ;;  %v1673_v35 = vpop.f32.mrb[163].mxu1 }
 0x2de   :  { %v1749_v46 = vmax.f32 %v1671_v47, 0.0  ;;  %v1674_v45 = vadd.f32 %v5973_v44, %v1673_v35 }
 0x2df   :  { %v1752_v59 = vmax.f32 %v1682_v33, 0.0 }
 0x2e0   :  { %v1750_v42 = vmax.f32 %v1674_v45, 0.0 }
 0x2e1   :  { %v6053_v28 = vpack.c.bf16 %v1752_v59, %v1751_v36 }
 0x2e2   :  { %v6055_v51 = vpack.c.bf16 %v1750_v42, %v1749_v46  ;;  %v4712_v29 = vpop.f32.mrb[164].mxu1 }
 0x2e3   :  { %v1695_v32 = vadd.f32 %v4712_v29, %v5973_v44  ;;  %v1686_v30 = vpop.f32.mrb[165].mxu1 }
 0x2e4   :  { %4518 = vmatmul.mubr.msk.bf16.gmra.mrb[160].mxu0 %vm215_vm0, %v6027_v37  ;;  %4534 = vmatmul.mubr.msk.bf16.gmra.mrb[192].mxu1 %vm215_vm0, %v6027_v37  ;;  %v1687_v26 = vadd.f32 %v5973_v44, %v1686_v30  ;;  %v4713_v27 = vpop.f32.mrb[166].mxu1 }
 0x2e5   :  { %2049 = vmatprep.mubr.bf16.mxu0 %v9115_v24  ;;  %2242 = vmatprep.mubr.bf16.mxu1 %v9115_v24  ;;  %v1755_v48 = vmax.f32 %v1695_v32, 0.0  ;;  %v1698_v47 = vadd.f32 %v4713_v27, %v5973_v44  ;;  %v1689_v31 = vpop.f32.mrb[167].mxu1 }
 0x2e6   :  { %v1753_v36 = vmax.f32 %v1687_v26, 0.0  ;;  %v1690_v33 = vadd.f32 %v5973_v44, %v1689_v31 }
 0x2e7   :  { %v1756_v35 = vmax.f32 %v1698_v47, 0.0 }
 0x2e8   :  { %v1754_v46 = vmax.f32 %v1690_v33, 0.0 }
 0x2e9   :  { %v6067_v45 = vpack.c.bf16 %v1756_v35, %v1755_v48 }
 0x2ea   :  { %v6069_v59 = vpack.c.bf16 %v1754_v46, %v1753_v36  ;;  %v4716_v42 = vpop.f32.mrb[168].mxu1 }
 0x2eb   :  { %v1711_v29 = vadd.f32 %v4716_v42, %v5973_v44  ;;  %v1702_v30 = vpop.f32.mrb[169].mxu1 }
 0x2ec   :  { %4519 = vmatmul.mubr.msk.bf16.gmra.mrb[164].mxu0 %vm215_vm0, %v6025_v41  ;;  %4535 = vmatmul.mubr.msk.bf16.gmra.mrb[196].mxu1 %vm215_vm0, %v6025_v41  ;;  %v1703_v32 = vadd.f32 %v5973_v44, %v1702_v30  ;;  %v4717_v26 = vpop.f32.mrb[170].mxu1 }
 0x2ed   :  { %2059 = vmatprep.mubr.bf16.mxu0 %v9115_v24  ;;  %2252 = vmatprep.mubr.bf16.mxu1 %v9115_v24  ;;  %v1759_v27 = vmax.f32 %v1711_v29, 0.0  ;;  %v1714_v48 = vadd.f32 %v4717_v26, %v5973_v44  ;;  %v1705_v47 = vpop.f32.mrb[171].mxu1 }
 0x2ee   :  { %v1757_v31 = vmax.f32 %v1703_v32, 0.0  ;;  %v1706_v36 = vadd.f32 %v5973_v44, %v1705_v47 }
 0x2ef   :  { %v1760_v33 = vmax.f32 %v1714_v48, 0.0 }
 0x2f0   :  { %v1758_v35 = vmax.f32 %v1706_v36, 0.0 }
 0x2f1   :  { %v6081_v46 = vpack.c.bf16 %v1760_v33, %v1759_v27 }
 0x2f2   :  { %v6083_v42 = vpack.c.bf16 %v1758_v35, %v1757_v31  ;;  %v4720_v21 = vpop.f32.mrb[172].mxu1 }
 0x2f3   :  { %v1727_v30 = vadd.f32 %v4720_v21, %v5973_v44  ;;  %v1718_v20 = vpop.f32.mrb[173].mxu1 }
 0x2f4   :  { %4520 = vmatmul.mubr.msk.bf16.gmra.mrb[168].mxu0 %vm215_vm0, %v6041_v25  ;;  %4536 = vmatmul.mubr.msk.bf16.gmra.mrb[200].mxu1 %vm215_vm0, %v6041_v25  ;;  %v1719_v29 = vadd.f32 %v5973_v44, %v1718_v20  ;;  %v4721_v32 = vpop.f32.mrb[174].mxu1  ;;  %v491_v20 = vlaneseq }
 0x2f5   :  { %2069 = vmatprep.mubr.bf16.mxu0 %v9115_v24  ;;  %2262 = vmatprep.mubr.bf16.mxu1 %v9115_v24  ;;  %v1763_v26 = vmax.f32 %v1727_v30, 0.0  ;;  %v1730_v27 = vadd.f32 %v4721_v32, %v5973_v44  ;;  %v1721_v48 = vpop.f32.mrb[175].mxu1 }
 0x2f6   :  { %v1761_v47 = vmax.f32 %v1719_v29, 0.0  ;;  %v1722_v21 = vadd.f32 %v5973_v44, %v1721_v48  ;;  %v6207_v44 = vshrl.u32 %v491_v20, 7 }
 0x2f7   :  { %v1764_v31 = vmax.f32 %v1730_v27, 0.0 }
 0x2f8   :  { %v1762_v36 = vmax.f32 %v1722_v21, 0.0  ;;  %9271 = vst [vmem:[#allocation227_spill] sm:$0xff] %v6207_v44 }
 0x2f9   :  { %v6095_v33 = vpack.c.bf16 %v1764_v31, %v1763_v26 }
 0x2fa   :  { %v6097_v35 = vpack.c.bf16 %v1762_v36, %v1761_v47 }
 0x2fb   :  { %9270 = vst [vmem:[#allocation226_spill] sm:$0xff] %v6095_v33 }
 0x2fc   :  { %4521 = vmatmul.mubr.msk.bf16.gmra.mrb[172].mxu0 %vm215_vm0, %v6039_v22  ;;  %4537 = vmatmul.mubr.msk.bf16.gmra.mrb[204].mxu1 %vm215_vm0, %v6039_v22 }
 0x2fd   :  { %2079 = vmatprep.mubr.bf16.mxu0 %v9115_v24  ;;  %2272 = vmatprep.mubr.bf16.mxu1 %v9115_v24 }
 0x304   :  { %4522 = vmatmul.mubr.msk.bf16.gmra.mrb[176].mxu0 %vm215_vm0, %v6055_v51  ;;  %4538 = vmatmul.mubr.msk.bf16.gmra.mrb[208].mxu1 %vm215_vm0, %v6055_v51 }
 0x305   :  { %2089 = vmatprep.mubr.bf16.mxu0 %v9115_v24  ;;  %2282 = vmatprep.mubr.bf16.mxu1 %v9115_v24 }
 0x30c   :  { %4523 = vmatmul.mubr.msk.bf16.gmra.mrb[180].mxu0 %vm215_vm0, %v6053_v28  ;;  %4539 = vmatmul.mubr.msk.bf16.gmra.mrb[212].mxu1 %vm215_vm0, %v6053_v28 }
 0x30d   :  { %2099 = vmatprep.mubr.bf16.mxu0 %v9115_v24  ;;  %2292 = vmatprep.mubr.bf16.mxu1 %v9115_v24 }
 0x314   :  { %4524 = vmatmul.mubr.msk.bf16.gmra.mrb[184].mxu0 %vm215_vm0, %v6069_v59  ;;  %4540 = vmatmul.mubr.msk.bf16.gmra.mrb[216].mxu1 %vm215_vm0, %v6069_v59 }
 0x315   :  { %2109 = vmatprep.mubr.bf16.mxu0 %v9115_v24  ;;  %2302 = vmatprep.mubr.bf16.mxu1 %v9115_v24 }
 0x31c   :  { %4525 = vmatmul.mubr.msk.bf16.gmra.mrb[188].mxu0 %vm215_vm0, %v6067_v45  ;;  %4541 = vmatmul.mubr.msk.bf16.gmra.mrb[220].mxu1 %vm215_vm0, %v6067_v45 }
 0x31d   :  { %2119 = vmatprep.mubr.bf16.mxu0 %v9115_v24  ;;  %2312 = vmatprep.mubr.bf16.mxu1 %v9115_v24 }
 0x324   :  { %4526 = vmatmul.mubr.msk.bf16.gmra.mrb[192].mxu0 %vm215_vm0, %v6083_v42  ;;  %4542 = vmatmul.mubr.msk.bf16.gmra.mrb[224].mxu1 %vm215_vm0, %v6083_v42 }
 0x325   :  { %2129 = vmatprep.mubr.bf16.mxu0 %v9115_v24  ;;  %2322 = vmatprep.mubr.bf16.mxu1 %v9115_v24 }
 0x32c   :  { %4527 = vmatmul.mubr.msk.bf16.gmra.mrb[196].mxu0 %vm215_vm0, %v6081_v46  ;;  %4543 = vmatmul.mubr.msk.bf16.gmra.mrb[228].mxu1 %vm215_vm0, %v6081_v46 }
 0x32d   :  { %2139 = vmatprep.mubr.bf16.mxu0 %v9115_v24  ;;  %2332 = vmatprep.mubr.bf16.mxu1 %v9115_v24 }
 0x334   :  { %4528 = vmatmul.mubr.msk.bf16.gmra.mrb[200].mxu0 %vm215_vm0, %v6097_v35  ;;  %4544 = vmatmul.mubr.msk.bf16.gmra.mrb[232].mxu1 %vm215_vm0, %v6097_v35 }
 0x335   :  { %2149 = vmatprep.mubr.bf16.mxu0 %v9115_v24  ;;  %2342 = vmatprep.mubr.bf16.mxu1 %v9115_v24 }
 0x33c   :  { %4529 = vmatmul.mubr.msk.bf16.gmra.mrb[204].mxu0 %vm215_vm0, %v6095_v33  ;;  %4545 = vmatmul.mubr.msk.bf16.gmra.mrb[236].mxu1 %vm215_vm0, %v6095_v33 }
 0x33d   :  { %2385 = vmatprep.mubr.bf16.mxu0 %v9115_v24  ;;  %2578 = vmatprep.mubr.bf16.mxu1 %v9115_v24 }
 0x344   :  { %4546 = vmatmul.mubr.msk.bf16.vlgmr.msra.gmra.mrb[208].mxu0 %vm215_vm0, %v5993_v60  ;;  %4562 = vmatmul.mubr.msk.bf16.vlgmr.msra.gmra.mrb[240].mxu1 %vm215_vm0, %v5993_v60  ;;  %v501_v60 = vsub.s32 2, %v6207_v44 }
 0x345   :  { %2395 = vmatprep.mubr.bf16.mxu0 %v9115_v24  ;;  %2588 = vmatprep.mubr.bf16.mxu1 %v9115_v24 }
 0x34c   :  { %4547 = vmatmul.mubr.msk.bf16.gmra.mrb[212].mxu0 %vm215_vm0, %v5991_v38  ;;  %4563 = vmatmul.mubr.msk.bf16.gmra.mrb[244].mxu1 %vm215_vm0, %v5991_v38  ;;  %v493_v38 = vsub.s32 0, %v6207_v44 }
 0x34d   :  { %2405 = vmatprep.mubr.bf16.mxu0 %v9115_v24  ;;  %2598 = vmatprep.mubr.bf16.mxu1 %v9115_v24 }
 0x354   :  { %4548 = vmatmul.mubr.msk.bf16.gmra.mrb[216].mxu0 %vm215_vm0, %v6013_v58  ;;  %4564 = vmatmul.mubr.msk.bf16.gmra.mrb[248].mxu1 %vm215_vm0, %v6013_v58  ;;  %v505_v58 = vsub.s32 3, %v6207_v44 }
 0x355   :  { %2415 = vmatprep.mubr.bf16.mxu0 %v9115_v24  ;;  %2608 = vmatprep.mubr.bf16.mxu1 %v9115_v24 }
 0x35c   :  { %4549 = vmatmul.mubr.msk.bf16.gmra.mrb[220].mxu0 %vm215_vm0, %v6011_v34  ;;  %4565 = vmatmul.mubr.msk.bf16.gmra.mrb[252].mxu1 %vm215_vm0, %v6011_v34  ;;  %v497_v34 = vsub.s32 1, %v6207_v44 }
 0x35d   :  { %2425 = vmatprep.mubr.bf16.mxu0 %v9115_v24  ;;  %2618 = vmatprep.mubr.bf16.mxu1 %v9115_v24 }
 0x364   :  { %4550 = vmatmul.mubr.msk.bf16.gmra.mrb[224].mxu0 %vm215_vm0, %v6027_v37  ;;  %4566 = vmatmul.mubr.msk.bf16.gmra.mrb[0].mxu1 %vm215_vm0, %v6027_v37  ;;  %v1797_v37 = vld [vmem:[%s9012_s9] sm:$0xff] }
 0x365   :  { %2435 = vmatprep.mubr.bf16.mxu0 %v9115_v24  ;;  %2628 = vmatprep.mubr.bf16.mxu1 %v9115_v24  ;;  %v6243_v30 = vrot.slane %v1797_v37, %v493_v38  ;;  %v6245_v29 = vrot.slane %v1797_v37, %v501_v60  ;;  %v6247_v32 = vrot.slane %v1797_v37, %v497_v34 }
 0x366   :  { %v6249_v26 = vrot.slane %v1797_v37, %v505_v58 }
 0x36c   :  { %4551 = vmatmul.mubr.msk.bf16.gmra.mrb[228].mxu0 %vm215_vm0, %v6025_v41  ;;  %4567 = vmatmul.mubr.msk.bf16.gmra.mrb[4].mxu1 %vm215_vm0, %v6025_v41  ;;  %v6222_v41 = vld [vmem:[%s9011_s5] sm:$0xff] }
 0x36d   :  { %2445 = vmatprep.mubr.bf16.mxu0 %v9115_v24  ;;  %2638 = vmatprep.mubr.bf16.mxu1 %v9115_v24 }
 0x374   :  { %4552 = vmatmul.mubr.msk.bf16.gmra.mrb[232].mxu0 %vm215_vm0, %v6041_v25  ;;  %4568 = vmatmul.mubr.msk.bf16.gmra.mrb[8].mxu1 %vm215_vm0, %v6041_v25  ;;  %v6231_v25 = vrot.slane %v6222_v41, %v501_v60 }
 0x375   :  { %2455 = vmatprep.mubr.bf16.mxu0 %v9115_v24  ;;  %2648 = vmatprep.mubr.bf16.mxu1 %v9115_v24 }
 0x376   :  { %v887_v48 = vadd.f32 %v5314_v1, %v6231_v25  ;;  %v891_v20 = vadd.f32 %v5322_v23, %v6231_v25 }
 0x37c   :  { %4553 = vmatmul.mubr.msk.bf16.gmra.mrb[236].mxu0 %vm215_vm0, %v6039_v22  ;;  %4569 = vmatmul.mubr.msk.bf16.gmra.mrb[12].mxu1 %vm215_vm0, %v6039_v22  ;;  %v6228_v22 = vrot.slane %v6222_v41, %v493_v38 }
 0x37d   :  { %2465 = vmatprep.mubr.bf16.mxu0 %v9115_v24  ;;  %2658 = vmatprep.mubr.bf16.mxu1 %v9115_v24 }
 0x37e   :  { %v694_v27 = vadd.f32 %v5312_v39, %v6228_v22  ;;  %v698_v36 = vadd.f32 %v5320_v19, %v6228_v22 }
 0x384   :  { %4554 = vmatmul.mubr.msk.bf16.gmra.mrb[240].mxu0 %vm215_vm0, %v6055_v51  ;;  %4570 = vmatmul.mubr.msk.bf16.gmra.mrb[16].mxu1 %vm215_vm0, %v6055_v51  ;;  %v6237_v51 = vrot.slane %v6222_v41, %v505_v58 }
 0x385   :  { %2475 = vmatprep.mubr.bf16.mxu0 %v9115_v24  ;;  %2668 = vmatprep.mubr.bf16.mxu1 %v9115_v24 }
 0x386   :  { %v889_v47 = vadd.f32 %v5318_v17, %v6237_v51  ;;  %v893_v17 = vadd.f32 %v5326_v43, %v6237_v51 }
 0x38c   :  { %4555 = vmatmul.mubr.msk.bf16.gmra.mrb[244].mxu0 %vm215_vm0, %v6053_v28  ;;  %4571 = vmatmul.mubr.msk.bf16.gmra.mrb[20].mxu1 %vm215_vm0, %v6053_v28  ;;  %v6234_v28 = vrot.slane %v6222_v41, %v497_v34 }
 0x38d   :  { %2485 = vmatprep.mubr.bf16.mxu0 %v9115_v24  ;;  %2678 = vmatprep.mubr.bf16.mxu1 %v9115_v24 }
 0x394   :  { %4556 = vmatmul.mubr.msk.bf16.gmra.mrb[248].mxu0 %vm215_vm0, %v6069_v59  ;;  %4572 = vmatmul.mubr.msk.bf16.gmra.mrb[24].mxu1 %vm215_vm0, %v6069_v59  ;;  %v696_v59 = vadd.f32 %v5316_v7, %v6234_v28  ;;  %v700_v7 = vadd.f32 %v5324_v40, %v6234_v28 }
 0x395   :  { %2495 = vmatprep.mubr.bf16.mxu0 %v9115_v24  ;;  %2688 = vmatprep.mubr.bf16.mxu1 %v9115_v24 }
 0x397   :  { %v2001_v21 = vpop.f32.mrb[144].mxu0  ;;  %v2194_v31 = vpop.f32.mrb[176].mxu1 }
 0x398   :  { %v2002_v38 = vadd.f32 %v2001_v21, %v6243_v30  ;;  %v2195_v39 = vadd.f32 %v2194_v31, %v6245_v29  ;;  %v2003_v60 = vpop.f32.mrb[145].mxu0  ;;  %v2196_v1 = vpop.f32.mrb[177].mxu1 }
 0x399   :  { %v2004_v34 = vadd.f32 %v2003_v60, %v6247_v32  ;;  %v2197_v58 = vadd.f32 %v2196_v1, %v6249_v26  ;;  %v2005_v19 = vpop.f32.mrb[146].mxu0  ;;  %v2198_v37 = vpop.f32.mrb[178].mxu1 }
 0x39a   :  { %v6273_v33 = vmul.f32 %v2002_v38, %v694_v27  ;;  %v6275_v23 = vmul.f32 %v2195_v39, %v887_v48  ;;  %v2006_v21 = vadd.f32 %v2005_v19, %v6243_v30  ;;  %v2199_v31 = vadd.f32 %v2198_v37, %v6245_v29  ;;  %v2007_v18 = vpop.f32.mrb[147].mxu0  ;;  %v2200_v16 = vpop.f32.mrb[179].mxu1 }
 0x39b   :  { %v6279_v40 = vmul.f32 %v2004_v34, %v696_v59  ;;  %v6281_v15 = vmul.f32 %v2197_v58, %v889_v47  ;;  %v2008_v43 = vadd.f32 %v2007_v18, %v6247_v32  ;;  %v2201_v60 = vadd.f32 %v2200_v16, %v6249_v26 }
 0x39c   :  { %9272 = vst [vmem:[#allocation228_spill] sm:$0xff] %v6273_v33  ;;  %9273 = vst [vmem:[#allocation229_spill] sm:$0xff] %v6275_v23  ;;  %v6285_v1 = vmul.f32 %v2006_v21, %v698_v36  ;;  %v6287_v27 = vmul.f32 %v2199_v31, %v891_v20  ;;  %4557 = vmatmul.mubr.msk.bf16.gmra.mrb[252].mxu0 %vm215_vm0, %v6067_v45  ;;  %4573 = vmatmul.mubr.msk.bf16.gmra.mrb[28].mxu1 %vm215_vm0, %v6067_v45 }
 0x39d   :  { %9274 = vst [vmem:[#allocation230_spill] sm:$0xff] %v6279_v40  ;;  %9275 = vst [vmem:[#allocation231_spill] sm:$0xff] %v6281_v15  ;;  %v6293_v48 = vmul.f32 %v2008_v43, %v700_v7  ;;  %v6295_v59 = vmul.f32 %v2201_v60, %v893_v17  ;;  %2505 = vmatprep.mubr.bf16.mxu0 %v9115_v24  ;;  %2698 = vmatprep.mubr.bf16.mxu1 %v9115_v24 }
 0x39e   :  { %9276 = vst [vmem:[#allocation232_spill] sm:$0xff] %v6285_v1  ;;  %9277 = vst [vmem:[#allocation233_spill] sm:$0xff] %v6287_v27  ;;  %v704_v16 = vadd.f32 %v5334_v49, %v6228_v22  ;;  %v897_v18 = vadd.f32 %v5336_v50, %v6231_v25  ;;  %v706_v47 = vadd.f32 %v5338_v52, %v6234_v28  ;;  %v9407_v27 = vld [vmem:[#allocation70_spill] sm:$0xff] }
 0x39f   :  { %9278 = vst [vmem:[#allocation234_spill] sm:$0xff] %v6293_v48  ;;  %9279 = vst [vmem:[#allocation235_spill] sm:$0xff] %v6295_v59  ;;  %v899_v45 = vadd.f32 %v5340_v53, %v6237_v51  ;;  %v2011_v36 = vpop.f32.mrb[148].mxu0  ;;  %v2204_v20 = vpop.f32.mrb[180].mxu1  ;;  %v708_v38 = vadd.f32 %v5342_v54, %v6228_v22  ;;  %v901_v39 = vadd.f32 %v5344_v55, %v6231_v25  ;;  %v9406_v48 = vld [vmem:[#allocation69_spill] sm:$0xff] }
 0x3a0   :  { %v2012_v7 = vadd.f32 %v2011_v36, %v6243_v30  ;;  %v2205_v49 = vadd.f32 %v2204_v20, %v6245_v29  ;;  %v2013_v17 = vpop.f32.mrb[149].mxu0  ;;  %v2206_v50 = vpop.f32.mrb[181].mxu1  ;;  %v710_v52 = vadd.f32 %v5346_v56, %v6234_v28  ;;  %v903_v53 = vadd.f32 %v5348_v57, %v6237_v51 }
 0x3a1   :  { %v2014_v34 = vadd.f32 %v2013_v17, %v6247_v32  ;;  %v2207_v58 = vadd.f32 %v2206_v50, %v6249_v26  ;;  %v2015_v54 = vpop.f32.mrb[150].mxu0  ;;  %v2208_v19 = vpop.f32.mrb[182].mxu1  ;;  %v718_v50 = vadd.f32 %v5370_v2, %v6228_v22  ;;  %v6797_v1 = vadd.f32 %v9407_v27, %v6228_v22 }
 0x3a2   :  { %v6319_v37 = vmul.f32 %v2012_v7, %v704_v16  ;;  %v6321_v55 = vmul.f32 %v2205_v49, %v897_v18  ;;  %v2016_v21 = vadd.f32 %v2015_v54, %v6243_v30  ;;  %v2209_v31 = vadd.f32 %v2208_v19, %v6245_v29  ;;  %v2017_v43 = vpop.f32.mrb[151].mxu0  ;;  %v2210_v60 = vpop.f32.mrb[183].mxu1 }
 0x3a3   :  { %v6325_v56 = vmul.f32 %v2014_v34, %v706_v47  ;;  %v6327_v36 = vmul.f32 %v2207_v58, %v899_v45  ;;  %v2018_v57 = vadd.f32 %v2017_v43, %v6247_v32  ;;  %v2211_v20 = vadd.f32 %v2210_v60, %v6249_v26 }
 0x3a4   :  { %9280 = vst [vmem:[#allocation236_spill] sm:$0xff] %v6319_v37  ;;  %9281 = vst [vmem:[#allocation237_spill] sm:$0xff] %v6321_v55  ;;  %v6331_v17 = vmul.f32 %v2016_v21, %v708_v38  ;;  %v6333_v16 = vmul.f32 %v2209_v31, %v901_v39  ;;  %4558 = vmatmul.mubr.msk.bf16.gmra.mrb[0].mxu0 %vm215_vm0, %v6083_v42  ;;  %4574 = vmatmul.mubr.msk.bf16.gmra.mrb[32].mxu1 %vm215_vm0, %v6083_v42 }
 0x3a5   :  { %9282 = vst [vmem:[#allocation238_spill] sm:$0xff] %v6325_v56  ;;  %9283 = vst [vmem:[#allocation239_spill] sm:$0xff] %v6327_v36  ;;  %v6339_v18 = vmul.f32 %v2018_v57, %v710_v52  ;;  %v6341_v47 = vmul.f32 %v2211_v20, %v903_v53  ;;  %2515 = vmatprep.mubr.bf16.mxu0 %v9115_v24  ;;  %2708 = vmatprep.mubr.bf16.mxu1 %v9115_v24 }
 0x3a6   :  { %9284 = vst [vmem:[#allocation240_spill] sm:$0xff] %v6331_v17  ;;  %9285 = vst [vmem:[#allocation241_spill] sm:$0xff] %v6333_v16  ;;  %v714_v45 = vadd.f32 %v5362_v61, %v6228_v22  ;;  %v907_v38 = vadd.f32 %v5364_v62, %v6231_v25  ;;  %v716_v39 = vadd.f32 %v5366_v63, %v6234_v28  ;;  %v9364_v16 = vld [vmem:[#allocation39_spill] sm:$0xff] }
 0x3a7   :  { %9286 = vst [vmem:[#allocation242_spill] sm:$0xff] %v6339_v18  ;;  %9287 = vst [vmem:[#allocation243_spill] sm:$0xff] %v6341_v47  ;;  %v909_v42 = vadd.f32 %v5368_v0, %v6237_v51  ;;  %v2021_v7 = vpop.f32.mrb[152].mxu0  ;;  %v2214_v49 = vpop.f32.mrb[184].mxu1  ;;  %v911_v52 = vadd.f32 %v5372_v3, %v6231_v25  ;;  %v720_v63 = vadd.f32 %v5374_v4, %v6234_v28 }
 0x3a8   :  { %v2022_v53 = vadd.f32 %v2021_v7, %v6243_v30  ;;  %v2215_v61 = vadd.f32 %v2214_v49, %v6245_v29  ;;  %v2023_v34 = vpop.f32.mrb[153].mxu0  ;;  %v2216_v62 = vpop.f32.mrb[185].mxu1  ;;  %v913_v0 = vadd.f32 %v5376_v5, %v6237_v51 }
 0x3a9   :  { %v2024_v58 = vadd.f32 %v2023_v34, %v6247_v32  ;;  %v2217_v54 = vadd.f32 %v2216_v62, %v6249_v26  ;;  %v2025_v2 = vpop.f32.mrb[154].mxu0  ;;  %v2218_v19 = vpop.f32.mrb[186].mxu1 }
 0x3aa   :  { %v6365_v21 = vmul.f32 %v2022_v53, %v714_v45  ;;  %v6367_v3 = vmul.f32 %v2215_v61, %v907_v38  ;;  %v2026_v31 = vadd.f32 %v2025_v2, %v6243_v30  ;;  %v2219_v43 = vadd.f32 %v2218_v19, %v6245_v29  ;;  %v2027_v60 = vpop.f32.mrb[155].mxu0  ;;  %v2220_v57 = vpop.f32.mrb[187].mxu1 }
 0x3ab   :  { %v6371_v4 = vmul.f32 %v2024_v58, %v716_v39  ;;  %v6373_v20 = vmul.f32 %v2217_v54, %v909_v42  ;;  %v2028_v5 = vadd.f32 %v2027_v60, %v6247_v32  ;;  %v2221_v7 = vadd.f32 %v2220_v57, %v6249_v26 }
 0x3ac   :  { %9288 = vst [vmem:[#allocation244_spill] sm:$0xff] %v6365_v21  ;;  %9289 = vst [vmem:[#allocation245_spill] sm:$0xff] %v6367_v3  ;;  %v6377_v49 = vmul.f32 %v2026_v31, %v718_v50  ;;  %v6379_v45 = vmul.f32 %v2219_v43, %v911_v52  ;;  %4559 = vmatmul.mubr.msk.bf16.gmra.mrb[4].mxu0 %vm215_vm0, %v6081_v46  ;;  %4575 = vmatmul.mubr.msk.bf16.gmra.mrb[36].mxu1 %vm215_vm0, %v6081_v46  ;;  %v9023_v42 = vsub.s32 4, %v6207_v44 }
 0x3ad   :  { %9290 = vst [vmem:[#allocation246_spill] sm:$0xff] %v6371_v4  ;;  %9291 = vst [vmem:[#allocation247_spill] sm:$0xff] %v6373_v20  ;;  %v6385_v38 = vmul.f32 %v2028_v5, %v720_v63  ;;  %v6387_v39 = vmul.f32 %v2221_v7, %v913_v0  ;;  %2525 = vmatprep.mubr.bf16.mxu0 %v9115_v24  ;;  %2718 = vmatprep.mubr.bf16.mxu1 %v9115_v24  ;;  %v9022_v50 = vsub.s32 6, %v6207_v44 }
 0x3ae   :  { %9292 = vst [vmem:[#allocation248_spill] sm:$0xff] %v6377_v49  ;;  %9293 = vst [vmem:[#allocation249_spill] sm:$0xff] %v6379_v45  ;;  %v724_v52 = vadd.f32 %v5384_v6, %v6228_v22  ;;  %v917_v53 = vadd.f32 %v5386_v8, %v6231_v25  ;;  %v726_v46 = vadd.f32 %v5388_v9, %v6234_v28 }
 0x3af   :  { %9294 = vst [vmem:[#allocation250_spill] sm:$0xff] %v6385_v38  ;;  %9295 = vst [vmem:[#allocation251_spill] sm:$0xff] %v6387_v39  ;;  %v919_v61 = vadd.f32 %v5390_v10, %v6237_v51  ;;  %v2031_v34 = vpop.f32.mrb[156].mxu0  ;;  %v2224_v62 = vpop.f32.mrb[188].mxu1  ;;  %v728_v63 = vadd.f32 %v5392_v11, %v6228_v22  ;;  %v921_v0 = vadd.f32 %v5394_v12, %v6231_v25 }
 0x3b0   :  { %v2032_v58 = vadd.f32 %v2031_v34, %v6243_v30  ;;  %v2225_v6 = vadd.f32 %v2224_v62, %v6245_v29  ;;  %v2033_v54 = vpop.f32.mrb[157].mxu0  ;;  %v2226_v8 = vpop.f32.mrb[189].mxu1  ;;  %v730_v9 = vadd.f32 %v5396_v13, %v6234_v28  ;;  %v923_v10 = vadd.f32 %v5398_v14, %v6237_v51 }
 0x3b1   :  { %v2034_v2 = vadd.f32 %v2033_v54, %v6247_v32  ;;  %v2227_v19 = vadd.f32 %v2226_v8, %v6249_v26  ;;  %v2035_v11 = vpop.f32.mrb[158].mxu0  ;;  %v2228_v31 = vpop.f32.mrb[190].mxu1  ;;  %v9305_v8 = vld [vmem:[#allocation3_spill] sm:$0xff] }
 0x3b2   :  { %v6413_v43 = vmul.f32 %v2032_v58, %v724_v52  ;;  %v6415_v12 = vmul.f32 %v2225_v6, %v917_v53  ;;  %v2036_v60 = vadd.f32 %v2035_v11, %v6243_v30  ;;  %v2229_v57 = vadd.f32 %v2228_v31, %v6245_v29  ;;  %v2037_v5 = vpop.f32.mrb[159].mxu0  ;;  %v2230_v7 = vpop.f32.mrb[191].mxu1  ;;  %v9304_v58 = vld [vmem:[#allocation2_spill] sm:$0xff] }
 0x3b3   :  { %v6419_v13 = vmul.f32 %v2034_v2, %v726_v46  ;;  %v6421_v34 = vmul.f32 %v2227_v19, %v919_v61  ;;  %v2038_v14 = vadd.f32 %v2037_v5, %v6247_v32  ;;  %v2231_v62 = vadd.f32 %v2230_v7, %v6249_v26  ;;  %v9307_v2 = vld [vmem:[#allocation5_spill] sm:$0xff]  ;;  %v9309_v5 = vld [vmem:[#allocation7_spill] sm:$0xff] }
 0x3b4   :  { %9296 = vst [vmem:[#allocation252_spill] sm:$0xff] %v6413_v43  ;;  %9297 = vst [vmem:[#allocation253_spill] sm:$0xff] %v6415_v12  ;;  %v6425_v54 = vmul.f32 %v2036_v60, %v728_v63  ;;  %v6427_v52 = vmul.f32 %v2229_v57, %v921_v0  ;;  %4560 = vmatmul.mubr.msk.bf16.gmra.mrb[8].mxu0 %vm215_vm0, %v6097_v35  ;;  %4576 = vmatmul.mubr.msk.bf16.gmra.mrb[40].mxu1 %vm215_vm0, %v6097_v35  ;;  %v9308_v60 = vld [vmem:[#allocation6_spill] sm:$0xff] }
 0x3b5   :  { %9298 = vst [vmem:[#allocation254_spill] sm:$0xff] %v6419_v13  ;;  %9299 = vst [vmem:[#allocation255_spill] sm:$0xff] %v6421_v34  ;;  %v6433_v53 = vmul.f32 %v2038_v14, %v730_v9  ;;  %v6435_v46 = vmul.f32 %v2231_v62, %v923_v10  ;;  %2535 = vmatprep.mubr.bf16.mxu0 %v9115_v24  ;;  %2728 = vmatprep.mubr.bf16.mxu1 %v9115_v24  ;;  %v9306_v9 = vld [vmem:[#allocation4_spill] sm:$0xff] }
 0x3b6   :  { %9300 = vst [vmem:[#allocation256_spill] sm:$0xff] %v6425_v54  ;;  %9301 = vst [vmem:[#allocation257_spill] sm:$0xff] %v6427_v52  ;;  %v6442_v61 = vrot.slane %v6222_v41, %v9023_v42  ;;  %v6447_v63 = vrot.slane %v6222_v41, %v9022_v50  ;;  %v734_v6 = vadd.f32 %v9304_v58, %v6228_v22  ;;  %v9310_v50 = vld [vmem:[#allocation8_spill] sm:$0xff]  ;;  %v9311_v42 = vld [vmem:[#allocation9_spill] sm:$0xff] }
 0x3b7   :  { %9302 = vst [vmem:[#allocation258_spill] sm:$0xff] %v6433_v53  ;;  %9303 = vst [vmem:[#allocation259_spill] sm:$0xff] %v6435_v46  ;;  %v927_v24 = vadd.f32 %v9305_v8, %v6231_v25  ;;  %v736_v10 = vadd.f32 %v9306_v9, %v6234_v28  ;;  %v929_v19 = vadd.f32 %v9307_v2, %v6237_v51  ;;  %v2041_v11 = vpop.f32.mrb[160].mxu0  ;;  %v2234_v31 = vpop.f32.mrb[192].mxu1 }
 0x3b8   :  { %v738_v57 = vadd.f32 %v9308_v60, %v6228_v22  ;;  %v931_v7 = vadd.f32 %v9309_v5, %v6231_v25  ;;  %v2042_v14 = vadd.f32 %v2041_v11, %v6243_v30  ;;  %v2235_v62 = vadd.f32 %v2234_v31, %v6245_v29  ;;  %v2043_v58 = vpop.f32.mrb[161].mxu0  ;;  %v2236_v8 = vpop.f32.mrb[193].mxu1 }
 0x3b9   :  { %v740_v9 = vadd.f32 %v9310_v50, %v6234_v28  ;;  %v933_v2 = vadd.f32 %v9311_v42, %v6237_v51  ;;  %v2044_v0 = vadd.f32 %v2043_v58, %v6247_v32  ;;  %v2237_v35 = vadd.f32 %v2236_v8, %v6249_v26  ;;  %v2045_v60 = vpop.f32.mrb[162].mxu0  ;;  %v2238_v46 = vpop.f32.mrb[194].mxu1 }
 0x3ba   :  { %v6471_v53 = vmul.f32 %v2042_v14, %v734_v6  ;;  %v6473_v5 = vmul.f32 %v2235_v62, %v927_v24  ;;  %v2046_v11 = vadd.f32 %v2045_v60, %v6243_v30  ;;  %v2239_v31 = vadd.f32 %v2238_v46, %v6245_v29  ;;  %v2047_v52 = vpop.f32.mrb[163].mxu0  ;;  %v2240_v54 = vpop.f32.mrb[195].mxu1  ;;  %v9319_v46 = vld [vmem:[#allocation226_spill] sm:$0xff]  ;;  %v9325_v62 = vld [vmem:[#allocation12_spill] sm:$0xff] }
 0x3bb   :  { %v6477_v50 = vmul.f32 %v2044_v0, %v736_v10  ;;  %v6479_v34 = vmul.f32 %v2237_v35, %v929_v19  ;;  %v2048_v42 = vadd.f32 %v2047_v52, %v6247_v32  ;;  %v2241_v58 = vadd.f32 %v2240_v54, %v6249_v26  ;;  %v9320_v35 = vld [vmem:[#allocation10_spill] sm:$0xff] }
 0x3bc   :  { %9312 = vst [vmem:[#allocation2_spill] sm:$0xff] %v6471_v53  ;;  %9313 = vst [vmem:[#allocation3_spill] sm:$0xff] %v6473_v5  ;;  %v9316_v8 = vsub.s32 5, %v6207_v44  ;;  %v6488_v24 = vmul.f32 %v2046_v11, %v738_v57  ;;  %v6490_v14 = vmul.f32 %v2239_v31, %v931_v7  ;;  %4561 = vmatmul.mubr.msk.bf16.gmra.mrb[12].mxu0 %vm215_vm0, %v9319_v46  ;;  %4577 = vmatmul.mubr.msk.bf16.gmra.mrb[44].mxu1 %vm215_vm0, %v9319_v46  ;;  %v9324_v57 = vld [vmem:[#allocation11_spill] sm:$0xff]  ;;  %v9326_v11 = vld [vmem:[#allocation13_spill] sm:$0xff] }
 0x3bd   :  { %9314 = vst [vmem:[#allocation4_spill] sm:$0xff] %v6477_v50  ;;  %9315 = vst [vmem:[#allocation5_spill] sm:$0xff] %v6479_v34  ;;  %v744_v52 = vadd.f32 %v9320_v35, %v6228_v22  ;;  %v9321_v54 = vsub.s32 7, %v6207_v44  ;;  %v6503_v10 = vmul.f32 %v2048_v42, %v740_v9  ;;  %v6505_v19 = vmul.f32 %v2241_v58, %v933_v2  ;;  %v9328_v35 = vld [vmem:[#allocation15_spill] sm:$0xff]  ;;  %v9329_v9 = vld [vmem:[#allocation16_spill] sm:$0xff] }
 0x3be   :  { %v6486_v6 = vrot.slane %v6222_v41, %v9316_v8  ;;  %9317 = vst [vmem:[#allocation6_spill] sm:$0xff] %v6488_v24  ;;  %9318 = vst [vmem:[#allocation7_spill] sm:$0xff] %v6490_v14  ;;  %v937_v7 = vadd.f32 %v9324_v57, %v6231_v25  ;;  %v746_v60 = vadd.f32 %v9325_v62, %v6234_v28  ;;  %v9327_v8 = vld [vmem:[#allocation14_spill] sm:$0xff]  ;;  %v9330_v2 = vld [vmem:[#allocation17_spill] sm:$0xff] }
 0x3bf   :  { %v6501_v0 = vrot.slane %v6222_v41, %v9321_v54  ;;  %9322 = vst [vmem:[#allocation8_spill] sm:$0xff] %v6503_v10  ;;  %9323 = vst [vmem:[#allocation9_spill] sm:$0xff] %v6505_v19  ;;  %v939_v31 = vadd.f32 %v9326_v11, %v6237_v51  ;;  %v748_v46 = vadd.f32 %v9327_v8, %v6228_v22  ;;  %v9331_v54 = vld [vmem:[#allocation18_spill] sm:$0xff]  ;;  %v2051_v19 = vpop.f32.mrb[164].mxu0  ;;  %v2244_v62 = vpop.f32.mrb[196].mxu1  ;;  %v9332_v10 = vld [vmem:[#allocation19_spill] sm:$0xff] }
 0x3c0   :  { %v941_v41 = vadd.f32 %v9328_v35, %v6231_v25  ;;  %v750_v42 = vadd.f32 %v9329_v9, %v6234_v28  ;;  %v943_v58 = vadd.f32 %v9330_v2, %v6237_v51  ;;  %v754_v57 = vadd.f32 %v9331_v54, %v6228_v22  ;;  %v9333_v14 = vld [vmem:[#allocation20_spill] sm:$0xff]  ;;  %v2053_v34 = vpop.f32.mrb[165].mxu0  ;;  %v2246_v9 = vpop.f32.mrb[197].mxu1  ;;  %v9334_v50 = vld [vmem:[#allocation21_spill] sm:$0xff]  ;;  %v9335_v5 = vld [vmem:[#allocation22_spill] sm:$0xff] }
 0x3c1   :  { %v947_v11 = vadd.f32 %v9332_v10, %v6231_v25  ;;  %v756_v8 = vadd.f32 %v9333_v14, %v6234_v28  ;;  %v2052_v24 = vadd.f32 %v2051_v19, %v6243_v30  ;;  %v2245_v35 = vadd.f32 %v2244_v62, %v6245_v29  ;;  %v2055_v10 = vpop.f32.mrb[166].mxu0  ;;  %v2248_v12 = vpop.f32.mrb[198].mxu1 }
 0x3c2   :  { %v949_v2 = vadd.f32 %v9334_v50, %v6237_v51  ;;  %v758_v54 = vadd.f32 %v9335_v5, %v6228_v22  ;;  %v2054_v53 = vadd.f32 %v2053_v34, %v6247_v32  ;;  %v2247_v13 = vadd.f32 %v2246_v9, %v6249_v26  ;;  %v2057_v39 = vpop.f32.mrb[167].mxu0  ;;  %v2250_v38 = vpop.f32.mrb[199].mxu1  ;;  %v9340_v9 = vld [vmem:[#allocation23_spill] sm:$0xff] }
 0x3c3   :  { %v6535_v43 = vmul.f32 %v2052_v24, %v744_v52  ;;  %v6537_v14 = vmul.f32 %v2245_v35, %v937_v7  ;;  %v2056_v19 = vadd.f32 %v2055_v10, %v6243_v30  ;;  %v2249_v62 = vadd.f32 %v2248_v12, %v6245_v29  ;;  %v9341_v52 = vld [vmem:[#allocation24_spill] sm:$0xff]  ;;  %v9344_v12 = vld [vmem:[#allocation25_spill] sm:$0xff] }
 0x3c4   :  { %v6541_v50 = vmul.f32 %v2054_v53, %v746_v60  ;;  %v6543_v45 = vmul.f32 %v2247_v13, %v939_v31  ;;  %v2058_v34 = vadd.f32 %v2057_v39, %v6247_v32  ;;  %v2251_v5 = vadd.f32 %v2250_v38, %v6249_v26  ;;  %v9345_v13 = vld [vmem:[#allocation26_spill] sm:$0xff]  ;;  %v9348_v31 = vld [vmem:[#allocation27_spill] sm:$0xff] }
 0x3c5   :  { %9336 = vst [vmem:[#allocation226_spill] sm:$0xff] %v6535_v43  ;;  %9337 = vst [vmem:[#allocation10_spill] sm:$0xff] %v6537_v14  ;;  %v951_v24 = vadd.f32 %v9340_v9, %v6231_v25  ;;  %v760_v7 = vadd.f32 %v9341_v52, %v6234_v28  ;;  %v6551_v35 = vmul.f32 %v2056_v19, %v748_v46  ;;  %v9349_v46 = vld [vmem:[#allocation28_spill] sm:$0xff]  ;;  %v9351_v52 = vld [vmem:[#allocation30_spill] sm:$0xff] }
 0x3c6   :  { %9338 = vst [vmem:[#allocation11_spill] sm:$0xff] %v6541_v50  ;;  %9339 = vst [vmem:[#allocation12_spill] sm:$0xff] %v6543_v45  ;;  %v6553_v10 = vmul.f32 %v2249_v62, %v941_v41  ;;  %v953_v53 = vadd.f32 %v9344_v12, %v6237_v51  ;;  %v6559_v60 = vadd.f32 %v9345_v13, %v6228_v22  ;;  %v9350_v41 = vld [vmem:[#allocation29_spill] sm:$0xff]  ;;  %v9359_v43 = vld [vmem:[#allocation38_spill] sm:$0xff] }
 0x3c7   :  { %9342 = vst [vmem:[#allocation13_spill] sm:$0xff] %v6551_v35  ;;  %v6561_v39 = vmul.f32 %v2058_v34, %v750_v42  ;;  %v6563_v38 = vmul.f32 %v2251_v5, %v943_v58  ;;  %v6567_v9 = vadd.f32 %v9348_v31, %v6231_v25  ;;  %v6571_v19 = vadd.f32 %v9349_v46, %v6234_v28  ;;  %v9352_v42 = vld [vmem:[#allocation31_spill] sm:$0xff]  ;;  %v9353_v34 = vld [vmem:[#allocation32_spill] sm:$0xff]  ;;  %v9354_v13 = vld [vmem:[#allocation33_spill] sm:$0xff] }
 0x3c8   :  { %9343 = vst [vmem:[#allocation14_spill] sm:$0xff] %v6553_v10  ;;  %v6575_v62 = vadd.f32 %v9350_v41, %v6237_v51  ;;  %v6579_v12 = vadd.f32 %v9351_v52, %v6228_v22  ;;  %v6583_v58 = vadd.f32 %v9352_v42, %v6231_v25  ;;  %v6587_v5 = vadd.f32 %v9353_v34, %v6234_v28  ;;  %v9355_v46 = vld [vmem:[#allocation34_spill] sm:$0xff]  ;;  %v9356_v52 = vld [vmem:[#allocation35_spill] sm:$0xff]  ;;  %v9357_v42 = vld [vmem:[#allocation36_spill] sm:$0xff] }
 0x3c9   :  { %9346 = vst [vmem:[#allocation15_spill] sm:$0xff] %v6561_v39  ;;  %9347 = vst [vmem:[#allocation16_spill] sm:$0xff] %v6563_v38  ;;  %v6591_v31 = vadd.f32 %v9354_v13, %v6237_v51  ;;  %v6595_v41 = vadd.f32 %v9355_v46, %v6228_v22  ;;  %v2061_v38 = vpop.f32.mrb[168].mxu0  ;;  %v2254_v39 = vpop.f32.mrb[200].mxu1  ;;  %v6599_v10 = vadd.f32 %v9356_v52, %v6231_v25  ;;  %v9358_v14 = vld [vmem:[#allocation37_spill] sm:$0xff] }
 0x3ca   :  { %v6603_v35 = vadd.f32 %v9357_v42, %v6234_v28  ;;  %v2062_v34 = vadd.f32 %v2061_v38, %v6243_v30  ;;  %v2255_v45 = vadd.f32 %v2254_v39, %v6245_v29  ;;  %v2063_v13 = vpop.f32.mrb[169].mxu0  ;;  %v2256_v50 = vpop.f32.mrb[201].mxu1  ;;  %v6609_v46 = vadd.f32 %v9358_v14, %v6237_v51 }
 0x3cb   :  { %v6613_v49 = vadd.f32 %v9359_v43, %v6228_v22  ;;  %v2064_v52 = vadd.f32 %v2063_v13, %v6247_v32  ;;  %v2257_v20 = vadd.f32 %v2256_v50, %v6249_v26  ;;  %v2065_v42 = vpop.f32.mrb[170].mxu0  ;;  %v2258_v4 = vpop.f32.mrb[202].mxu1 }
 0x3cc   :  { %v6617_v3 = vmul.f32 %v2062_v34, %v754_v57  ;;  %v6619_v38 = vmul.f32 %v2255_v45, %v947_v11  ;;  %v2066_v39 = vadd.f32 %v2065_v42, %v6243_v30  ;;  %v2259_v21 = vadd.f32 %v2258_v4, %v6245_v29  ;;  %v2067_v14 = vpop.f32.mrb[171].mxu0  ;;  %v2260_v47 = vpop.f32.mrb[203].mxu1  ;;  %v9365_v45 = vld [vmem:[#allocation40_spill] sm:$0xff]  ;;  %v9372_v42 = vld [vmem:[#allocation43_spill] sm:$0xff] }
 0x3cd   :  { %v6623_v18 = vmul.f32 %v2064_v52, %v756_v8  ;;  %v6625_v43 = vmul.f32 %v2257_v20, %v949_v2  ;;  %v2068_v13 = vadd.f32 %v2067_v14, %v6247_v32  ;;  %v2261_v50 = vadd.f32 %v2260_v47, %v6249_v26  ;;  %v9368_v8 = vld [vmem:[#allocation41_spill] sm:$0xff]  ;;  %v9369_v2 = vld [vmem:[#allocation42_spill] sm:$0xff] }
 0x3ce   :  { %9360 = vst [vmem:[#allocation17_spill] sm:$0xff] %v6617_v3  ;;  %9361 = vst [vmem:[#allocation18_spill] sm:$0xff] %v6619_v38  ;;  %v6631_v57 = vadd.f32 %v9364_v16, %v6231_v25  ;;  %v6635_v11 = vadd.f32 %v9365_v45, %v6234_v28  ;;  %v6637_v34 = vmul.f32 %v2066_v39, %v758_v54  ;;  %v9373_v54 = vld [vmem:[#allocation44_spill] sm:$0xff]  ;;  %v9375_v45 = vld [vmem:[#allocation46_spill] sm:$0xff] }
 0x3cf   :  { %9362 = vst [vmem:[#allocation19_spill] sm:$0xff] %v6623_v18  ;;  %9363 = vst [vmem:[#allocation20_spill] sm:$0xff] %v6625_v43  ;;  %v6639_v4 = vmul.f32 %v2259_v21, %v951_v24  ;;  %v6643_v20 = vadd.f32 %v9368_v8, %v6237_v51  ;;  %v6647_v52 = vadd.f32 %v9369_v2, %v6228_v22  ;;  %v9374_v24 = vld [vmem:[#allocation45_spill] sm:$0xff]  ;;  %v9383_v3 = vld [vmem:[#allocation54_spill] sm:$0xff] }
 0x3d0   :  { %9366 = vst [vmem:[#allocation21_spill] sm:$0xff] %v6637_v34  ;;  %v6649_v47 = vmul.f32 %v2068_v13, %v760_v7  ;;  %v6651_v16 = vmul.f32 %v2261_v50, %v953_v53  ;;  %v6655_v14 = vadd.f32 %v9372_v42, %v6231_v25  ;;  %v6659_v21 = vadd.f32 %v9373_v54, %v6234_v28  ;;  %v9376_v7 = vld [vmem:[#allocation47_spill] sm:$0xff]  ;;  %v9377_v13 = vld [vmem:[#allocation48_spill] sm:$0xff]  ;;  %v9378_v2 = vld [vmem:[#allocation49_spill] sm:$0xff] }
 0x3d1   :  { %9367 = vst [vmem:[#allocation22_spill] sm:$0xff] %v6639_v4  ;;  %v6663_v39 = vadd.f32 %v9374_v24, %v6237_v51  ;;  %v6667_v8 = vadd.f32 %v9375_v45, %v6228_v22  ;;  %v6671_v53 = vadd.f32 %v9376_v7, %v6231_v25  ;;  %v6675_v50 = vadd.f32 %v9377_v13, %v6234_v28  ;;  %v9379_v54 = vld [vmem:[#allocation50_spill] sm:$0xff]  ;;  %v9380_v45 = vld [vmem:[#allocation51_spill] sm:$0xff]  ;;  %v9381_v7 = vld [vmem:[#allocation52_spill] sm:$0xff] }
 0x3d2   :  { %9370 = vst [vmem:[#allocation23_spill] sm:$0xff] %v6649_v47  ;;  %9371 = vst [vmem:[#allocation24_spill] sm:$0xff] %v6651_v16  ;;  %v6679_v42 = vadd.f32 %v9378_v2, %v6237_v51  ;;  %v6683_v24 = vadd.f32 %v9379_v54, %v6228_v22  ;;  %v2071_v16 = vpop.f32.mrb[172].mxu0  ;;  %v2264_v47 = vpop.f32.mrb[204].mxu1  ;;  %v6687_v4 = vadd.f32 %v9380_v45, %v6231_v25  ;;  %v9382_v38 = vld [vmem:[#allocation53_spill] sm:$0xff] }
 0x3d3   :  { %v6691_v34 = vadd.f32 %v9381_v7, %v6234_v28  ;;  %v2072_v13 = vadd.f32 %v2071_v16, %v6243_v30  ;;  %v2265_v43 = vadd.f32 %v2264_v47, %v6245_v29  ;;  %v2073_v2 = vpop.f32.mrb[173].mxu0  ;;  %v2266_v18 = vpop.f32.mrb[205].mxu1  ;;  %v6697_v54 = vadd.f32 %v9382_v38, %v6237_v51 }
 0x3d4   :  { %v6701_v17 = vadd.f32 %v9383_v3, %v6228_v22  ;;  %v2074_v45 = vadd.f32 %v2073_v2, %v6247_v32  ;;  %v2267_v36 = vadd.f32 %v2266_v18, %v6249_v26  ;;  %v2075_v7 = vpop.f32.mrb[174].mxu0  ;;  %v2268_v56 = vpop.f32.mrb[206].mxu1 }
 0x3d5   :  { %v6706_v16 = vmul.f32 %v2072_v13, %v6559_v60  ;;  %v6709_v47 = vmul.f32 %v2265_v43, %v6567_v9  ;;  %v2076_v55 = vadd.f32 %v2075_v7, %v6243_v30  ;;  %v2269_v38 = vadd.f32 %v2268_v56, %v6245_v29  ;;  %v2077_v37 = vpop.f32.mrb[175].mxu0  ;;  %v2270_v59 = vpop.f32.mrb[207].mxu1  ;;  %v9388_v13 = vld [vmem:[#allocation55_spill] sm:$0xff]  ;;  %v9389_v43 = vld [vmem:[#allocation56_spill] sm:$0xff] }
 0x3d6   :  { %v6714_v3 = vmul.f32 %v2074_v45, %v6571_v19  ;;  %v6717_v2 = vmul.f32 %v2267_v36, %v6575_v62  ;;  %v2078_v18 = vadd.f32 %v2077_v37, %v6247_v32  ;;  %v2271_v60 = vadd.f32 %v2270_v59, %v6249_v26  ;;  %v9392_v36 = vld [vmem:[#allocation57_spill] sm:$0xff]  ;;  %v9393_v59 = vld [vmem:[#allocation58_spill] sm:$0xff] }
 0x3d7   :  { %9384 = vst [vmem:[#allocation25_spill] sm:$0xff] %v6706_v16  ;;  %9385 = vst [vmem:[#allocation26_spill] sm:$0xff] %v6709_v47  ;;  %v6723_v9 = vadd.f32 %v9388_v13, %v6231_v25  ;;  %v6727_v7 = vadd.f32 %v9389_v43, %v6234_v28  ;;  %v6730_v56 = vmul.f32 %v2076_v55, %v6579_v12  ;;  %v9396_v55 = vld [vmem:[#allocation59_spill] sm:$0xff]  ;;  %v9398_v43 = vld [vmem:[#allocation61_spill] sm:$0xff] }
 0x3d8   :  { %9386 = vst [vmem:[#allocation27_spill] sm:$0xff] %v6714_v3  ;;  %9387 = vst [vmem:[#allocation28_spill] sm:$0xff] %v6717_v2  ;;  %v6733_v19 = vmul.f32 %v2269_v38, %v6583_v58  ;;  %v6737_v62 = vadd.f32 %v9392_v36, %v6237_v51  ;;  %v6741_v37 = vadd.f32 %v9393_v59, %v6228_v22  ;;  %v9397_v58 = vld [vmem:[#allocation60_spill] sm:$0xff]  ;;  %v9399_v59 = vld [vmem:[#allocation62_spill] sm:$0xff] }
 0x3d9   :  { %9390 = vst [vmem:[#allocation29_spill] sm:$0xff] %v6730_v56  ;;  %v6744_v45 = vmul.f32 %v2078_v18, %v6587_v5  ;;  %v6747_v13 = vmul.f32 %v2271_v60, %v6591_v31  ;;  %v6751_v12 = vadd.f32 %v9396_v55, %v6231_v25  ;;  %v6755_v38 = vadd.f32 %v9397_v58, %v6234_v28  ;;  %v9400_v5 = vld [vmem:[#allocation63_spill] sm:$0xff]  ;;  %v9401_v18 = vld [vmem:[#allocation64_spill] sm:$0xff]  ;;  %v9402_v55 = vld [vmem:[#allocation65_spill] sm:$0xff]  ;;  %v2274_v56 = vpop.f32.mrb[208].mxu1 }
 0x3da   :  { %9391 = vst [vmem:[#allocation30_spill] sm:$0xff] %v6733_v19  ;;  %v6759_v36 = vadd.f32 %v9398_v43, %v6237_v51  ;;  %v6763_v19 = vadd.f32 %v9399_v59, %v6228_v22  ;;  %v6767_v31 = vadd.f32 %v9400_v5, %v6231_v25  ;;  %v6771_v60 = vadd.f32 %v9401_v18, %v6234_v28  ;;  %v9404_v59 = vld [vmem:[#allocation67_spill] sm:$0xff]  ;;  %v9405_v5 = vld [vmem:[#allocation68_spill] sm:$0xff]  ;;  %v2276_v16 = vpop.f32.mrb[209].mxu1 }
 0x3db   :  { %9394 = vst [vmem:[#allocation31_spill] sm:$0xff] %v6744_v45  ;;  %9395 = vst [vmem:[#allocation32_spill] sm:$0xff] %v6747_v13  ;;  %v6775_v58 = vadd.f32 %v9402_v55, %v6237_v51  ;;  %v9403_v13 = vld [vmem:[#allocation66_spill] sm:$0xff]  ;;  %v2081_v45 = vpop.f32.mrb[176].mxu0  ;;  %v6783_v2 = vadd.f32 %v9404_v59, %v6231_v25  ;;  %v6787_v3 = vadd.f32 %v9405_v5, %v6234_v28  ;;  %v2278_v40 = vpop.f32.mrb[210].mxu1 }
 0x3dc   :  { %v6779_v43 = vadd.f32 %v9403_v13, %v6228_v22  ;;  %v2082_v18 = vadd.f32 %v2081_v45, %v6243_v30  ;;  %v2275_v47 = vadd.f32 %v2274_v56, %v6245_v29  ;;  %v2083_v55 = vpop.f32.mrb[177].mxu0  ;;  %v6793_v13 = vadd.f32 %v9406_v48, %v6237_v51  ;;  %v2280_v44 = vpop.f32.mrb[211].mxu1 }
 0x3dd   :  { %v2084_v59 = vadd.f32 %v2083_v55, %v6247_v32  ;;  %v2277_v15 = vadd.f32 %v2276_v16, %v6249_v26  ;;  %v2085_v5 = vpop.f32.mrb[178].mxu0  ;;  %v2279_v48 = vadd.f32 %v2278_v40, %v6245_v29 }
 0x3de   :  { %v6802_v45 = vmul.f32 %v2082_v18, %v6595_v41  ;;  %v6805_v56 = vmul.f32 %v2275_v47, %v6599_v10  ;;  %v2086_v23 = vadd.f32 %v2085_v5, %v6243_v30  ;;  %v2087_v33 = vpop.f32.mrb[179].mxu0  ;;  %v2281_v41 = vadd.f32 %v2280_v44, %v6249_v26  ;;  %v9412_v18 = vld [vmem:[#allocation71_spill] sm:$0xff]  ;;  %v9413_v47 = vld [vmem:[#allocation72_spill] sm:$0xff] }
 0x3df   :  { %v6810_v27 = vmul.f32 %v2084_v59, %v6603_v35  ;;  %v6813_v55 = vmul.f32 %v2277_v15, %v6609_v46  ;;  %v2088_v16 = vadd.f32 %v2087_v33, %v6247_v32  ;;  %v6819_v10 = vadd.f32 %v9412_v18, %v6231_v25  ;;  %v9416_v15 = vld [vmem:[#allocation73_spill] sm:$0xff]  ;;  %v9417_v33 = vld [vmem:[#allocation74_spill] sm:$0xff] }
 0x3e0   :  { %9408 = vst [vmem:[#allocation33_spill] sm:$0xff] %v6802_v45  ;;  %9409 = vst [vmem:[#allocation34_spill] sm:$0xff] %v6805_v56  ;;  %v6823_v5 = vadd.f32 %v9413_v47, %v6234_v28  ;;  %v6826_v40 = vmul.f32 %v2086_v23, %v6613_v49  ;;  %v6829_v35 = vmul.f32 %v2279_v48, %v6631_v57  ;;  %v9420_v23 = vld [vmem:[#allocation75_spill] sm:$0xff]  ;;  %v9421_v57 = vld [vmem:[#allocation76_spill] sm:$0xff] }
 0x3e1   :  { %9410 = vst [vmem:[#allocation35_spill] sm:$0xff] %v6810_v27  ;;  %9411 = vst [vmem:[#allocation36_spill] sm:$0xff] %v6813_v55  ;;  %v6833_v46 = vadd.f32 %v9416_v15, %v6237_v51  ;;  %v6837_v44 = vadd.f32 %v9417_v33, %v6228_v22  ;;  %v6840_v59 = vmul.f32 %v2088_v16, %v6635_v11  ;;  %v9422_v47 = vld [vmem:[#allocation77_spill] sm:$0xff]  ;;  %v9423_v33 = vld [vmem:[#allocation78_spill] sm:$0xff] }
 0x3e2   :  { %9414 = vst [vmem:[#allocation37_spill] sm:$0xff] %v6826_v40  ;;  %9415 = vst [vmem:[#allocation38_spill] sm:$0xff] %v6829_v35  ;;  %v6843_v18 = vmul.f32 %v2281_v41, %v6643_v20  ;;  %v6847_v49 = vadd.f32 %v9420_v23, %v6231_v25  ;;  %v6851_v48 = vadd.f32 %v9421_v57, %v6234_v28  ;;  %v9425_v11 = vld [vmem:[#allocation79_spill] sm:$0xff]  ;;  %v9427_v16 = vld [vmem:[#allocation80_spill] sm:$0xff]  ;;  %v2284_v40 = vpop.f32.mrb[212].mxu1 }
 0x3e3   :  { %9418 = vst [vmem:[#allocation39_spill] sm:$0xff] %v6840_v59  ;;  %v6855_v15 = vadd.f32 %v9422_v47, %v6237_v51  ;;  %v6859_v35 = vadd.f32 %v9423_v33, %v6228_v22  ;;  %v6863_v20 = vadd.f32 %v9425_v11, %v6231_v25  ;;  %v6867_v41 = vadd.f32 %v9427_v16, %v6234_v28  ;;  %v9429_v23 = vld [vmem:[#allocation81_spill] sm:$0xff]  ;;  %v2091_v59 = vpop.f32.mrb[180].mxu0  ;;  %v9433_v33 = vld [vmem:[#allocation83_spill] sm:$0xff]  ;;  %v9435_v11 = vld [vmem:[#allocation84_spill] sm:$0xff]  ;;  %v2286_v45 = vpop.f32.mrb[213].mxu1 }
 0x3e4   :  { %9419 = vst [vmem:[#allocation40_spill] sm:$0xff] %v6843_v18  ;;  %v6871_v57 = vadd.f32 %v9429_v23, %v6237_v51  ;;  %v9431_v18 = vld [vmem:[#allocation82_spill] sm:$0xff]  ;;  %v6879_v55 = vadd.f32 %v9433_v33, %v6231_v25  ;;  %v6883_v27 = vadd.f32 %v9435_v11, %v6234_v28  ;;  %v2092_v16 = vadd.f32 %v2091_v59, %v6243_v30  ;;  %v2093_v23 = vpop.f32.mrb[181].mxu0 }
 0x3e5   :  { %9424 = vst [vmem:[#allocation41_spill] sm:$0xff] %v6859_v35  ;;  %9426 = vst [vmem:[#allocation42_spill] sm:$0xff] %v6863_v20  ;;  %v6875_v47 = vadd.f32 %v9431_v18, %v6228_v22  ;;  %v2285_v56 = vadd.f32 %v2284_v40, %v6245_v29  ;;  %v2094_v33 = vadd.f32 %v2093_v23, %v6247_v32  ;;  %v2095_v11 = vpop.f32.mrb[182].mxu0 }
 0x3e6   :  { %9428 = vst [vmem:[#allocation43_spill] sm:$0xff] %v6867_v41  ;;  %9430 = vst [vmem:[#allocation44_spill] sm:$0xff] %v6871_v57  ;;  %v9437_v57 = vld [vmem:[#allocation85_spill] sm:$0xff]  ;;  %v6898_v59 = vmul.f32 %v2092_v16, %v6647_v52  ;;  %v2096_v20 = vadd.f32 %v2095_v11, %v6243_v30  ;;  %v9444_v16 = vld [vmem:[#allocation87_spill] sm:$0xff] }
 0x3e7   :  { %9432 = vst [vmem:[#allocation45_spill] sm:$0xff] %v6875_v47  ;;  %9434 = vst [vmem:[#allocation46_spill] sm:$0xff] %v6879_v55  ;;  %v6889_v18 = vadd.f32 %v9437_v57, %v6237_v51  ;;  %v9439_v47 = vld [vmem:[#allocation86_spill] sm:$0xff]  ;;  %v2287_v55 = vadd.f32 %v2286_v45, %v6249_v26  ;;  %v6901_v40 = vmul.f32 %v2285_v56, %v6655_v14  ;;  %v9445_v56 = vld [vmem:[#allocation88_spill] sm:$0xff] }
 0x3e8   :  { %9436 = vst [vmem:[#allocation47_spill] sm:$0xff] %v6883_v27  ;;  %v6893_v41 = vadd.f32 %v9439_v47, %v6228_v22  ;;  %v2288_v27 = vpop.f32.mrb[214].mxu1  ;;  %9440 = vst [vmem:[#allocation49_spill] sm:$0xff] %v6898_v59  ;;  %v6906_v47 = vmul.f32 %v2094_v33, %v6659_v21  ;;  %v6915_v14 = vadd.f32 %v9444_v16, %v6231_v25 }
 0x3e9   :  { %9438 = vst [vmem:[#allocation48_spill] sm:$0xff] %v6889_v18  ;;  %9441 = vst [vmem:[#allocation50_spill] sm:$0xff] %v6901_v40  ;;  %v2289_v57 = vadd.f32 %v2288_v27, %v6245_v29  ;;  %v2097_v18 = vpop.f32.mrb[183].mxu0  ;;  %v2290_v35 = vpop.f32.mrb[215].mxu1  ;;  %v6909_v23 = vmul.f32 %v2287_v55, %v6663_v39  ;;  %v6919_v11 = vadd.f32 %v9445_v56, %v6234_v28  ;;  %v9448_v39 = vld [vmem:[#allocation89_spill] sm:$0xff] }
 0x3ea   :  { %9442 = vst [vmem:[#allocation51_spill] sm:$0xff] %v6906_v47  ;;  %v2098_v45 = vadd.f32 %v2097_v18, %v6247_v32  ;;  %v2291_v52 = vadd.f32 %v2290_v35, %v6249_v26  ;;  %v6922_v27 = vmul.f32 %v2096_v20, %v6667_v8  ;;  %v6929_v55 = vadd.f32 %v9448_v39, %v6237_v51  ;;  %v9449_v35 = vld [vmem:[#allocation90_spill] sm:$0xff]  ;;  %v9452_v8 = vld [vmem:[#allocation91_spill] sm:$0xff]  ;;  %v9454_v56 = vld [vmem:[#allocation93_spill] sm:$0xff] }
 0x3eb   :  { %9443 = vst [vmem:[#allocation52_spill] sm:$0xff] %v6909_v23  ;;  %v6925_v21 = vmul.f32 %v2289_v57, %v6671_v53  ;;  %v6933_v18 = vadd.f32 %v9449_v35, %v6228_v22  ;;  %v6943_v20 = vadd.f32 %v9452_v8, %v6231_v25  ;;  %v9453_v53 = vld [vmem:[#allocation92_spill] sm:$0xff]  ;;  %v6951_v39 = vadd.f32 %v9454_v56, %v6237_v51  ;;  %v9455_v35 = vld [vmem:[#allocation94_spill] sm:$0xff]  ;;  %v9458_v8 = vld [vmem:[#allocation97_spill] sm:$0xff] }
 0x3ec   :  { %9446 = vst [vmem:[#allocation53_spill] sm:$0xff] %v6922_v27  ;;  %v6936_v33 = vmul.f32 %v2098_v45, %v6675_v50  ;;  %v6939_v16 = vmul.f32 %v2291_v52, %v6679_v42  ;;  %v6947_v57 = vadd.f32 %v9453_v53, %v6234_v28  ;;  %v9456_v50 = vld [vmem:[#allocation95_spill] sm:$0xff]  ;;  %v9457_v45 = vld [vmem:[#allocation96_spill] sm:$0xff]  ;;  %v6967_v53 = vadd.f32 %v9458_v8, %v6237_v51  ;;  %v2294_v27 = vpop.f32.mrb[216].mxu1  ;;  %v9465_v23 = vld [vmem:[#allocation101_spill] sm:$0xff] }
 0x3ed   :  { %9447 = vst [vmem:[#allocation54_spill] sm:$0xff] %v6925_v21  ;;  %v6955_v21 = vadd.f32 %v9455_v35, %v6228_v22  ;;  %v6959_v42 = vadd.f32 %v9456_v50, %v6231_v25  ;;  %v6963_v52 = vadd.f32 %v9457_v45, %v6234_v28  ;;  %v9461_v22 = vld [vmem:[#allocation99_spill] sm:$0xff]  ;;  %v9463_v25 = vld [vmem:[#allocation100_spill] sm:$0xff]  ;;  %v2295_v45 = vadd.f32 %v2294_v27, %v6245_v29  ;;  %v2296_v8 = vpop.f32.mrb[217].mxu1  ;;  %v9467_v47 = vld [vmem:[#allocation102_spill] sm:$0xff] }
 0x3ee   :  { %9450 = vst [vmem:[#allocation55_spill] sm:$0xff] %v6936_v33  ;;  %9451 = vst [vmem:[#allocation56_spill] sm:$0xff] %v6939_v16  ;;  %v9459_v16 = vld [vmem:[#allocation98_spill] sm:$0xff]  ;;  %v2101_v33 = vpop.f32.mrb[184].mxu0  ;;  %v6975_v35 = vadd.f32 %v9461_v22, %v6447_v63  ;;  %v6979_v50 = vadd.f32 %v9463_v25, %v6486_v6  ;;  %v6989_v40 = vadd.f32 %v9467_v47, %v6442_v61 }
 0x3ef   :  { %v6971_v56 = vadd.f32 %v9459_v16, %v6442_v61  ;;  %v2102_v28 = vadd.f32 %v2101_v33, %v6243_v30  ;;  %v2103_v51 = vpop.f32.mrb[185].mxu0  ;;  %v6985_v16 = vadd.f32 %v9465_v23, %v6501_v0  ;;  %v2297_v59 = vadd.f32 %v2296_v8, %v6249_v26 }
 0x3f0   :  { %9462 = vst [vmem:[#allocation58_spill] sm:$0xff] %v6975_v35  ;;  %9464 = vst [vmem:[#allocation59_spill] sm:$0xff] %v6979_v50  ;;  %v2104_v22 = vadd.f32 %v2103_v51, %v6247_v32  ;;  %v2105_v25 = vpop.f32.mrb[186].mxu0  ;;  %v2298_v50 = vpop.f32.mrb[218].mxu1  ;;  %v6997_v27 = vmul.f32 %v2295_v45, %v6687_v4  ;;  %v9473_v45 = vld [vmem:[#allocation104_spill] sm:$0xff] }
 0x3f1   :  { %9460 = vst [vmem:[#allocation57_spill] sm:$0xff] %v6971_v56  ;;  %9466 = vst [vmem:[#allocation60_spill] sm:$0xff] %v6985_v16  ;;  %v6994_v33 = vmul.f32 %v2102_v28, %v6683_v24  ;;  %v2106_v35 = vadd.f32 %v2105_v25, %v6243_v30  ;;  %v2299_v23 = vadd.f32 %v2298_v50, %v6245_v29  ;;  %v2107_v16 = vpop.f32.mrb[187].mxu0  ;;  %v2300_v56 = vpop.f32.mrb[219].mxu1  ;;  %v9472_v28 = vld [vmem:[#allocation103_spill] sm:$0xff] }
 0x3f2   :  { %9469 = vst [vmem:[#allocation62_spill] sm:$0xff] %v6997_v27  ;;  %v7002_v47 = vmul.f32 %v2104_v22, %v6691_v34  ;;  %v7005_v51 = vmul.f32 %v2297_v59, %v6697_v54  ;;  %v2108_v8 = vadd.f32 %v2107_v16, %v6247_v32  ;;  %v2301_v24 = vadd.f32 %v2300_v56, %v6249_v26  ;;  %v9476_v54 = vld [vmem:[#allocation105_spill] sm:$0xff]  ;;  %v9477_v56 = vld [vmem:[#allocation106_spill] sm:$0xff] }
 0x3f3   :  { %9468 = vst [vmem:[#allocation61_spill] sm:$0xff] %v6994_v33  ;;  %v7011_v4 = vadd.f32 %v9472_v28, %v6447_v63  ;;  %v7015_v25 = vadd.f32 %v9473_v45, %v6486_v6  ;;  %v7018_v50 = vmul.f32 %v2106_v35, %v6701_v17  ;;  %v7021_v34 = vmul.f32 %v2299_v23, %v6723_v9  ;;  %v9480_v17 = vld [vmem:[#allocation107_spill] sm:$0xff]  ;;  %v9481_v9 = vld [vmem:[#allocation108_spill] sm:$0xff]  ;;  %v9482_v45 = vld [vmem:[#allocation109_spill] sm:$0xff] }
 0x3f4   :  { %9470 = vst [vmem:[#allocation63_spill] sm:$0xff] %v7002_v47  ;;  %9471 = vst [vmem:[#allocation64_spill] sm:$0xff] %v7005_v51  ;;  %v7025_v59 = vadd.f32 %v9476_v54, %v6501_v0  ;;  %v7029_v16 = vadd.f32 %v9477_v56, %v6442_v61  ;;  %v7032_v22 = vmul.f32 %v2108_v8, %v6727_v7  ;;  %v9483_v56 = vld [vmem:[#allocation110_spill] sm:$0xff]  ;;  %v9485_v7 = vld [vmem:[#allocation111_spill] sm:$0xff] }
 0x3f5   :  { %9474 = vst [vmem:[#allocation65_spill] sm:$0xff] %v7018_v50  ;;  %9475 = vst [vmem:[#allocation66_spill] sm:$0xff] %v7021_v34  ;;  %v7035_v28 = vmul.f32 %v2301_v24, %v6737_v62  ;;  %v7039_v35 = vadd.f32 %v9480_v17, %v6447_v63  ;;  %v7043_v23 = vadd.f32 %v9481_v9, %v6486_v6  ;;  %v9487_v8 = vld [vmem:[#allocation112_spill] sm:$0xff]  ;;  %v9489_v17 = vld [vmem:[#allocation113_spill] sm:$0xff]  ;;  %v2304_v50 = vpop.f32.mrb[220].mxu1 }
 0x3f6   :  { %9478 = vst [vmem:[#allocation67_spill] sm:$0xff] %v7032_v22  ;;  %v7047_v54 = vadd.f32 %v9482_v45, %v6501_v0  ;;  %v7051_v34 = vadd.f32 %v9483_v56, %v6442_v61  ;;  %v7055_v62 = vadd.f32 %v9485_v7, %v6447_v63  ;;  %v7059_v24 = vadd.f32 %v9487_v8, %v6486_v6  ;;  %v2111_v22 = vpop.f32.mrb[188].mxu0  ;;  %v9493_v56 = vld [vmem:[#allocation115_spill] sm:$0xff]  ;;  %v9495_v7 = vld [vmem:[#allocation116_spill] sm:$0xff]  ;;  %v2306_v33 = vpop.f32.mrb[221].mxu1 }
 0x3f7   :  { %9479 = vst [vmem:[#allocation68_spill] sm:$0xff] %v7035_v28  ;;  %v7063_v9 = vadd.f32 %v9489_v17, %v6501_v0  ;;  %v9491_v28 = vld [vmem:[#allocation114_spill] sm:$0xff]  ;;  %v7071_v51 = vadd.f32 %v9493_v56, %v6447_v63  ;;  %v7075_v47 = vadd.f32 %v9495_v7, %v6486_v6  ;;  %v2112_v8 = vadd.f32 %v2111_v22, %v6243_v30  ;;  %v2113_v17 = vpop.f32.mrb[189].mxu0 }
 0x3f8   :  { %9484 = vst [vmem:[#allocation69_spill] sm:$0xff] %v7051_v34  ;;  %9486 = vst [vmem:[#allocation70_spill] sm:$0xff] %v7055_v62  ;;  %v7067_v45 = vadd.f32 %v9491_v28, %v6442_v61  ;;  %v2305_v27 = vadd.f32 %v2304_v50, %v6245_v29  ;;  %v2114_v56 = vadd.f32 %v2113_v17, %v6247_v32  ;;  %v2115_v7 = vpop.f32.mrb[190].mxu0 }
 0x3f9   :  { %9488 = vst [vmem:[#allocation71_spill] sm:$0xff] %v7059_v24  ;;  %9490 = vst [vmem:[#allocation72_spill] sm:$0xff] %v7063_v9  ;;  %v9497_v9 = vld [vmem:[#allocation117_spill] sm:$0xff]  ;;  %v7090_v22 = vmul.f32 %v2112_v8, %v6741_v37  ;;  %v2116_v62 = vadd.f32 %v2115_v7, %v6243_v30  ;;  %v9504_v8 = vld [vmem:[#allocation119_spill] sm:$0xff] }
 0x3fa   :  { %9492 = vst [vmem:[#allocation73_spill] sm:$0xff] %v7067_v45  ;;  %9494 = vst [vmem:[#allocation74_spill] sm:$0xff] %v7071_v51  ;;  %v7081_v28 = vadd.f32 %v9497_v9, %v6501_v0  ;;  %v9499_v45 = vld [vmem:[#allocation118_spill] sm:$0xff]  ;;  %v2307_v51 = vadd.f32 %v2306_v33, %v6249_v26  ;;  %v7093_v50 = vmul.f32 %v2305_v27, %v6751_v12  ;;  %v9505_v27 = vld [vmem:[#allocation120_spill] sm:$0xff] }
 0x3fb   :  { %9496 = vst [vmem:[#allocation75_spill] sm:$0xff] %v7075_v47  ;;  %v7085_v24 = vadd.f32 %v9499_v45, %v6442_v61  ;;  %v2308_v47 = vpop.f32.mrb[222].mxu1  ;;  %9500 = vst [vmem:[#allocation77_spill] sm:$0xff] %v7090_v22  ;;  %v7098_v45 = vmul.f32 %v2114_v56, %v6755_v38  ;;  %v7107_v12 = vadd.f32 %v9504_v8, %v6447_v63 }
 0x3fc   :  { %9498 = vst [vmem:[#allocation76_spill] sm:$0xff] %v7081_v28  ;;  %9501 = vst [vmem:[#allocation78_spill] sm:$0xff] %v7093_v50  ;;  %v2309_v9 = vadd.f32 %v2308_v47, %v6245_v29  ;;  %v2117_v28 = vpop.f32.mrb[191].mxu0  ;;  %v2310_v34 = vpop.f32.mrb[223].mxu1  ;;  %v7101_v17 = vmul.f32 %v2307_v51, %v6759_v36  ;;  %v7111_v7 = vadd.f32 %v9505_v27, %v6486_v6  ;;  %v9508_v36 = vld [vmem:[#allocation121_spill] sm:$0xff] }
 0x3fd   :  { %9502 = vst [vmem:[#allocation79_spill] sm:$0xff] %v7098_v45  ;;  %v2118_v33 = vadd.f32 %v2117_v28, %v6247_v32  ;;  %v2311_v37 = vadd.f32 %v2310_v34, %v6249_v26  ;;  %v7114_v47 = vmul.f32 %v2116_v62, %v6763_v19  ;;  %v7121_v51 = vadd.f32 %v9508_v36, %v6501_v0  ;;  %v9509_v34 = vld [vmem:[#allocation122_spill] sm:$0xff]  ;;  %v9512_v19 = vld [vmem:[#allocation123_spill] sm:$0xff]  ;;  %v9514_v27 = vld [vmem:[#allocation125_spill] sm:$0xff] }
 0x3fe   :  { %9503 = vst [vmem:[#allocation80_spill] sm:$0xff] %v7101_v17  ;;  %v7117_v38 = vmul.f32 %v2309_v9, %v6767_v31  ;;  %v7125_v28 = vadd.f32 %v9509_v34, %v6442_v61  ;;  %v7135_v62 = vadd.f32 %v9512_v19, %v6447_v63  ;;  %v9513_v31 = vld [vmem:[#allocation124_spill] sm:$0xff]  ;;  %v7143_v36 = vadd.f32 %v9514_v27, %v6501_v0  ;;  %v9515_v34 = vld [vmem:[#allocation126_spill] sm:$0xff]  ;;  %v9521_v19 = vld [vmem:[#allocation129_spill] sm:$0xff] }
 0x3ff   :  { %9506 = vst [vmem:[#allocation81_spill] sm:$0xff] %v7114_v47  ;;  %v7128_v56 = vmul.f32 %v2118_v33, %v6771_v60  ;;  %v7131_v8 = vmul.f32 %v2311_v37, %v6775_v58  ;;  %v7139_v9 = vadd.f32 %v9513_v31, %v6486_v6  ;;  %v9517_v60 = vld [vmem:[#allocation127_spill] sm:$0xff]  ;;  %v9519_v33 = vld [vmem:[#allocation128_spill] sm:$0xff]  ;;  %v7159_v31 = vadd.f32 %v9521_v19, %v6501_v0  ;;  %v2314_v47 = vpop.f32.mrb[224].mxu1 }
 0x400   :  { %9507 = vst [vmem:[#allocation82_spill] sm:$0xff] %v7117_v38  ;;  %v7147_v38 = vadd.f32 %v9515_v34, %v6442_v61  ;;  %v7151_v58 = vadd.f32 %v9517_v60, %v6447_v63  ;;  %v7155_v37 = vadd.f32 %v9519_v33, %v6486_v6  ;;  %v9525_v34 = vld [vmem:[#allocation131_spill] sm:$0xff]  ;;  %v9527_v60 = vld [vmem:[#allocation132_spill] sm:$0xff]  ;;  %v2315_v50 = vadd.f32 %v2314_v47, %v6245_v29  ;;  %v2316_v22 = vpop.f32.mrb[225].mxu1 }
 0x401   :  { %9510 = vst [vmem:[#allocation83_spill] sm:$0xff] %v7128_v56  ;;  %9511 = vst [vmem:[#allocation84_spill] sm:$0xff] %v7131_v8  ;;  %v9523_v8 = vld [vmem:[#allocation130_spill] sm:$0xff]  ;;  %v2121_v56 = vpop.f32.mrb[192].mxu0  ;;  %v7167_v17 = vadd.f32 %v9525_v34, %v6447_v63  ;;  %v7171_v45 = vadd.f32 %v9527_v60, %v6486_v6 }
 0x402   :  { %9516 = vst [vmem:[#allocation85_spill] sm:$0xff] %v7147_v38  ;;  %9518 = vst [vmem:[#allocation86_spill] sm:$0xff] %v7151_v58  ;;  %v7163_v27 = vadd.f32 %v9523_v8, %v6442_v61  ;;  %v2122_v33 = vadd.f32 %v2121_v56, %v6243_v30  ;;  %v2123_v19 = vpop.f32.mrb[193].mxu0  ;;  %v7189_v47 = vmul.f32 %v2315_v50, %v6783_v2  ;;  %v9537_v50 = vld [vmem:[#allocation136_spill] sm:$0xff] }
 0x403   :  { %9520 = vst [vmem:[#allocation87_spill] sm:$0xff] %v7155_v37  ;;  %9522 = vst [vmem:[#allocation88_spill] sm:$0xff] %v7159_v31  ;;  %v9529_v31 = vld [vmem:[#allocation133_spill] sm:$0xff]  ;;  %v2124_v34 = vadd.f32 %v2123_v19, %v6247_v32  ;;  %v2125_v60 = vpop.f32.mrb[194].mxu0 }
 0x404   :  { %9524 = vst [vmem:[#allocation89_spill] sm:$0xff] %v7163_v27  ;;  %9526 = vst [vmem:[#allocation90_spill] sm:$0xff] %v7167_v17  ;;  %v7177_v8 = vadd.f32 %v9529_v31, %v6501_v0  ;;  %v9531_v27 = vld [vmem:[#allocation134_spill] sm:$0xff]  ;;  %v2317_v17 = vadd.f32 %v2316_v22, %v6249_v26  ;;  %v7186_v56 = vmul.f32 %v2122_v33, %v6779_v43  ;;  %v9536_v33 = vld [vmem:[#allocation135_spill] sm:$0xff] }
 0x405   :  { %9528 = vst [vmem:[#allocation91_spill] sm:$0xff] %v7171_v45  ;;  %v7181_v37 = vadd.f32 %v9531_v27, %v6442_v61  ;;  %v2318_v45 = vpop.f32.mrb[226].mxu1  ;;  %9533 = vst [vmem:[#allocation94_spill] sm:$0xff] %v7189_v47  ;;  %v2126_v58 = vadd.f32 %v2125_v60, %v6243_v30  ;;  %v7194_v27 = vmul.f32 %v2124_v34, %v6787_v3 }
 0x406   :  { %9530 = vst [vmem:[#allocation92_spill] sm:$0xff] %v7177_v8  ;;  %9532 = vst [vmem:[#allocation93_spill] sm:$0xff] %v7186_v56  ;;  %v2319_v31 = vadd.f32 %v2318_v45, %v6245_v29  ;;  %v2127_v8 = vpop.f32.mrb[195].mxu0  ;;  %v2320_v38 = vpop.f32.mrb[227].mxu1  ;;  %v7197_v19 = vmul.f32 %v2317_v17, %v6793_v13  ;;  %v7203_v2 = vadd.f32 %v9536_v33, %v6447_v63  ;;  %v9540_v13 = vld [vmem:[#allocation137_spill] sm:$0xff] }
 0x407   :  { %9534 = vst [vmem:[#allocation95_spill] sm:$0xff] %v7194_v27  ;;  %v2128_v22 = vadd.f32 %v2127_v8, %v6247_v32  ;;  %v2321_v43 = vadd.f32 %v2320_v38, %v6249_v26  ;;  %v7207_v60 = vadd.f32 %v9537_v50, %v6486_v6  ;;  %v7210_v45 = vmul.f32 %v2126_v58, %v6797_v1  ;;  %v9541_v38 = vld [vmem:[#allocation138_spill] sm:$0xff]  ;;  %v9544_v1 = vld [vmem:[#allocation139_spill] sm:$0xff]  ;;  %v9546_v50 = vld [vmem:[#allocation141_spill] sm:$0xff] }
 0x408   :  { %9535 = vst [vmem:[#allocation96_spill] sm:$0xff] %v7197_v19  ;;  %v7213_v3 = vmul.f32 %v2319_v31, %v6819_v10  ;;  %v7217_v17 = vadd.f32 %v9540_v13, %v6501_v0  ;;  %v7221_v8 = vadd.f32 %v9541_v38, %v6442_v61  ;;  %v7231_v58 = vadd.f32 %v9544_v1, %v6447_v63  ;;  %v9545_v10 = vld [vmem:[#allocation140_spill] sm:$0xff]  ;;  %v9547_v38 = vld [vmem:[#allocation142_spill] sm:$0xff]  ;;  %v9553_v1 = vld [vmem:[#allocation145_spill] sm:$0xff] }
 0x409   :  { %9538 = vst [vmem:[#allocation97_spill] sm:$0xff] %v7210_v45  ;;  %v7224_v34 = vmul.f32 %v2128_v22, %v6823_v5  ;;  %v7227_v33 = vmul.f32 %v2321_v43, %v6833_v46  ;;  %v7235_v31 = vadd.f32 %v9545_v10, %v6486_v6  ;;  %v7239_v13 = vadd.f32 %v9546_v50, %v6501_v0  ;;  %v9549_v5 = vld [vmem:[#allocation143_spill] sm:$0xff]  ;;  %v9551_v22 = vld [vmem:[#allocation144_spill] sm:$0xff]  ;;  %v2324_v45 = vpop.f32.mrb[228].mxu1 }
 0x40a   :  { %9539 = vst [vmem:[#allocation98_spill] sm:$0xff] %v7213_v3  ;;  %v7243_v3 = vadd.f32 %v9547_v38, %v6442_v61  ;;  %v7247_v46 = vadd.f32 %v9549_v5, %v6447_v63  ;;  %v7251_v43 = vadd.f32 %v9551_v22, %v6486_v6  ;;  %v7255_v10 = vadd.f32 %v9553_v1, %v6501_v0  ;;  %v9557_v38 = vld [vmem:[#allocation147_spill] sm:$0xff]  ;;  %v9559_v5 = vld [vmem:[#allocation148_spill] sm:$0xff]  ;;  %v2326_v56 = vpop.f32.mrb[229].mxu1 }
 0x40b   :  { %9542 = vst [vmem:[#allocation99_spill] sm:$0xff] %v7224_v34  ;;  %9543 = vst [vmem:[#allocation100_spill] sm:$0xff] %v7227_v33  ;;  %v9555_v33 = vld [vmem:[#allocation146_spill] sm:$0xff]  ;;  %v2131_v34 = vpop.f32.mrb[196].mxu0  ;;  %v7263_v19 = vadd.f32 %v9557_v38, %v6447_v63  ;;  %v7267_v27 = vadd.f32 %v9559_v5, %v6486_v6  ;;  %v2325_v47 = vadd.f32 %v2324_v45, %v6245_v29 }
 0x40c   :  { %9548 = vst [vmem:[#allocation101_spill] sm:$0xff] %v7243_v3  ;;  %9550 = vst [vmem:[#allocation102_spill] sm:$0xff] %v7247_v46  ;;  %v7259_v50 = vadd.f32 %v9555_v33, %v6442_v61  ;;  %v2132_v22 = vadd.f32 %v2131_v34, %v6243_v30  ;;  %v2133_v1 = vpop.f32.mrb[197].mxu0 }
 0x40d   :  { %9552 = vst [vmem:[#allocation103_spill] sm:$0xff] %v7251_v43  ;;  %9554 = vst [vmem:[#allocation104_spill] sm:$0xff] %v7255_v10  ;;  %v9561_v10 = vld [vmem:[#allocation149_spill] sm:$0xff]  ;;  %v2134_v38 = vadd.f32 %v2133_v1, %v6247_v32  ;;  %v2135_v5 = vpop.f32.mrb[198].mxu0  ;;  %v7285_v45 = vmul.f32 %v2325_v47, %v6847_v49  ;;  %v9570_v47 = vld [vmem:[#allocation152_spill] sm:$0xff] }
 0x40e   :  { %9556 = vst [vmem:[#allocation105_spill] sm:$0xff] %v7259_v50  ;;  %9558 = vst [vmem:[#allocation106_spill] sm:$0xff] %v7263_v19  ;;  %v7273_v33 = vadd.f32 %v9561_v10, %v6501_v0  ;;  %v9563_v50 = vld [vmem:[#allocation150_spill] sm:$0xff]  ;;  %v2327_v19 = vadd.f32 %v2326_v56, %v6249_v26  ;;  %v7282_v34 = vmul.f32 %v2132_v22, %v6837_v44  ;;  %v9568_v22 = vld [vmem:[#allocation151_spill] sm:$0xff] }
 0x40f   :  { %9560 = vst [vmem:[#allocation107_spill] sm:$0xff] %v7267_v27  ;;  %v7277_v43 = vadd.f32 %v9563_v50, %v6442_v61  ;;  %v2328_v27 = vpop.f32.mrb[230].mxu1  ;;  %9565 = vst [vmem:[#allocation110_spill] sm:$0xff] %v7285_v45  ;;  %v2136_v46 = vadd.f32 %v2135_v5, %v6243_v30  ;;  %v7290_v50 = vmul.f32 %v2134_v38, %v6851_v48  ;;  %v9574_v48 = vld [vmem:[#allocation42_spill] sm:$0xff] }
 0x410   :  { %9562 = vst [vmem:[#allocation108_spill] sm:$0xff] %v7273_v33  ;;  %9564 = vst [vmem:[#allocation109_spill] sm:$0xff] %v7282_v34  ;;  %v2329_v10 = vadd.f32 %v2328_v27, %v6245_v29  ;;  %v2137_v33 = vpop.f32.mrb[199].mxu0  ;;  %v2330_v3 = vpop.f32.mrb[231].mxu1  ;;  %v7293_v1 = vmul.f32 %v2327_v19, %v6855_v15  ;;  %v7299_v49 = vadd.f32 %v9568_v22, %v6447_v63  ;;  %v9572_v27 = vld [vmem:[#allocation41_spill] sm:$0xff]  ;;  %v9580_v22 = vld [vmem:[#allocation43_spill] sm:$0xff] }
 0x411   :  { %9566 = vst [vmem:[#allocation111_spill] sm:$0xff] %v7290_v50  ;;  %v2138_v56 = vadd.f32 %v2137_v33, %v6247_v32  ;;  %v2331_v44 = vadd.f32 %v2330_v3, %v6249_v26  ;;  %v7303_v5 = vadd.f32 %v9570_v47, %v6486_v6  ;;  %v7306_v45 = vmul.f32 %v2136_v46, %v9572_v27  ;;  %v9576_v15 = vld [vmem:[#allocation153_spill] sm:$0xff]  ;;  %v9578_v3 = vld [vmem:[#allocation154_spill] sm:$0xff]  ;;  %v9582_v50 = vld [vmem:[#allocation44_spill] sm:$0xff]  ;;  %v2334_v34 = vpop.f32.mrb[232].mxu1 }
 0x412   :  { %9567 = vst [vmem:[#allocation112_spill] sm:$0xff] %v7293_v1  ;;  %9569 = vst [vmem:[#allocation113_spill] sm:$0xff] %v7299_v49  ;;  %v7309_v38 = vmul.f32 %v2329_v10, %v9574_v48  ;;  %v7313_v19 = vadd.f32 %v9576_v15, %v6501_v0  ;;  %v7317_v33 = vadd.f32 %v9578_v3, %v6442_v61  ;;  %v9584_v46 = vld [vmem:[#allocation155_spill] sm:$0xff]  ;;  %v9586_v10 = vld [vmem:[#allocation156_spill] sm:$0xff] }
 0x413   :  { %9571 = vst [vmem:[#allocation114_spill] sm:$0xff] %v7303_v5  ;;  %9573 = vst [vmem:[#allocation115_spill] sm:$0xff] %v7306_v45  ;;  %v7320_v1 = vmul.f32 %v2138_v56, %v9580_v22  ;;  %v7323_v47 = vmul.f32 %v2331_v44, %v9582_v50  ;;  %v7327_v27 = vadd.f32 %v9584_v46, %v6447_v63  ;;  %v9588_v15 = vld [vmem:[#allocation157_spill] sm:$0xff]  ;;  %v9590_v3 = vld [vmem:[#allocation158_spill] sm:$0xff] }
 0x414   :  { %9575 = vst [vmem:[#allocation116_spill] sm:$0xff] %v7309_v38  ;;  %9577 = vst [vmem:[#allocation117_spill] sm:$0xff] %v7313_v19  ;;  %v7331_v48 = vadd.f32 %v9586_v10, %v6486_v6  ;;  %v7335_v38 = vadd.f32 %v9588_v15, %v6501_v0  ;;  %v7339_v45 = vadd.f32 %v9590_v3, %v6442_v61  ;;  %v9592_v56 = vld [vmem:[#allocation159_spill] sm:$0xff]  ;;  %v9594_v44 = vld [vmem:[#allocation160_spill] sm:$0xff] }
 0x415   :  { %9579 = vst [vmem:[#allocation118_spill] sm:$0xff] %v7317_v33  ;;  %9581 = vst [vmem:[#allocation119_spill] sm:$0xff] %v7320_v1  ;;  %v7343_v50 = vadd.f32 %v9592_v56, %v6447_v63  ;;  %v7347_v22 = vadd.f32 %v9594_v44, %v6486_v6  ;;  %v9596_v46 = vld [vmem:[#allocation161_spill] sm:$0xff]  ;;  %v2141_v1 = vpop.f32.mrb[200].mxu0  ;;  %v9600_v3 = vld [vmem:[#allocation163_spill] sm:$0xff] }
 0x416   :  { %9583 = vst [vmem:[#allocation120_spill] sm:$0xff] %v7323_v47  ;;  %9585 = vst [vmem:[#allocation121_spill] sm:$0xff] %v7327_v27  ;;  %v7351_v10 = vadd.f32 %v9596_v46, %v6501_v0  ;;  %v9598_v47 = vld [vmem:[#allocation162_spill] sm:$0xff]  ;;  %v9602_v56 = vld [vmem:[#allocation164_spill] sm:$0xff]  ;;  %v2142_v44 = vadd.f32 %v2141_v1, %v6243_v30  ;;  %v2143_v46 = vpop.f32.mrb[201].mxu0 }
 0x417   :  { %9587 = vst [vmem:[#allocation122_spill] sm:$0xff] %v7331_v48  ;;  %9589 = vst [vmem:[#allocation123_spill] sm:$0xff] %v7335_v38  ;;  %v7355_v15 = vadd.f32 %v9598_v47, %v6442_v61  ;;  %v9604_v38 = vld [vmem:[#allocation165_spill] sm:$0xff] }
 0x418   :  { %9591 = vst [vmem:[#allocation124_spill] sm:$0xff] %v7339_v45  ;;  %9593 = vst [vmem:[#allocation125_spill] sm:$0xff] %v7343_v50  ;;  %v7359_v45 = vadd.f32 %v9600_v3, %v6447_v63  ;;  %v7363_v50 = vadd.f32 %v9602_v56, %v6486_v6  ;;  %v7369_v47 = vadd.f32 %v9604_v38, %v6501_v0  ;;  %v2145_v56 = vpop.f32.mrb[202].mxu0  ;;  %v9608_v27 = vld [vmem:[#allocation45_spill] sm:$0xff] }
 0x419   :  { %9595 = vst [vmem:[#allocation126_spill] sm:$0xff] %v7347_v22  ;;  %9597 = vst [vmem:[#allocation127_spill] sm:$0xff] %v7351_v10  ;;  %v2335_v22 = vadd.f32 %v2334_v34, %v6245_v29  ;;  %v2336_v10 = vpop.f32.mrb[233].mxu1  ;;  %v2144_v3 = vadd.f32 %v2143_v46, %v6247_v32  ;;  %v7378_v1 = vmul.f32 %v2142_v44, %v9608_v27  ;;  %v9610_v34 = vld [vmem:[#allocation46_spill] sm:$0xff]  ;;  %v9614_v46 = vld [vmem:[#allocation48_spill] sm:$0xff] }
 0x41a   :  { %9599 = vst [vmem:[#allocation128_spill] sm:$0xff] %v7355_v15  ;;  %9601 = vst [vmem:[#allocation129_spill] sm:$0xff] %v7359_v45  ;;  %v9606_v15 = vld [vmem:[#allocation166_spill] sm:$0xff]  ;;  %v2337_v45 = vadd.f32 %v2336_v10, %v6249_v26  ;;  %v2146_v19 = vadd.f32 %v2145_v56, %v6243_v30  ;;  %v9616_v44 = vld [vmem:[#allocation167_spill] sm:$0xff] }
 0x41b   :  { %9603 = vst [vmem:[#allocation130_spill] sm:$0xff] %v7363_v50  ;;  %9605 = vst [vmem:[#allocation131_spill] sm:$0xff] %v7369_v47  ;;  %v7373_v48 = vadd.f32 %v9606_v15, %v6442_v61  ;;  %v2338_v50 = vpop.f32.mrb[234].mxu1  ;;  %v7381_v33 = vmul.f32 %v2335_v22, %v9610_v34  ;;  %v2147_v47 = vpop.f32.mrb[203].mxu0  ;;  %v9612_v15 = vld [vmem:[#allocation47_spill] sm:$0xff]  ;;  %v7395_v22 = vadd.f32 %v9616_v44, %v6447_v63  ;;  %v9617_v56 = vld [vmem:[#allocation168_spill] sm:$0xff] }
 0x41c   :  { %9609 = vst [vmem:[#allocation133_spill] sm:$0xff] %v7378_v1  ;;  %v2339_v38 = vadd.f32 %v2338_v50, %v6245_v29  ;;  %v2340_v5 = vpop.f32.mrb[235].mxu1  ;;  %v7389_v49 = vmul.f32 %v2337_v45, %v9614_v46  ;;  %v2148_v10 = vadd.f32 %v2147_v47, %v6247_v32  ;;  %v7399_v34 = vadd.f32 %v9617_v56, %v6486_v6  ;;  %v9620_v45 = vld [vmem:[#allocation169_spill] sm:$0xff] }
 0x41d   :  { %9607 = vst [vmem:[#allocation132_spill] sm:$0xff] %v7373_v48  ;;  %9611 = vst [vmem:[#allocation134_spill] sm:$0xff] %v7381_v33  ;;  %v7386_v48 = vmul.f32 %v2144_v3, %v9612_v15  ;;  %v2341_v27 = vadd.f32 %v2340_v5, %v6249_v26  ;;  %v7402_v50 = vmul.f32 %v2146_v19, %v6893_v41  ;;  %v9621_v5 = vld [vmem:[#allocation170_spill] sm:$0xff]  ;;  %v9624_v41 = vld [vmem:[#allocation171_spill] sm:$0xff] }
 0x41e   :  { %9615 = vst [vmem:[#allocation136_spill] sm:$0xff] %v7389_v49  ;;  %v7405_v3 = vmul.f32 %v2339_v38, %v6915_v14  ;;  %v7409_v15 = vadd.f32 %v9620_v45, %v6501_v0  ;;  %v7413_v47 = vadd.f32 %v9621_v5, %v6442_v61  ;;  %v7416_v46 = vmul.f32 %v2148_v10, %v6919_v11  ;;  %v9625_v14 = vld [vmem:[#allocation172_spill] sm:$0xff]  ;;  %v9626_v56 = vld [vmem:[#allocation173_spill] sm:$0xff]  ;;  %v9627_v5 = vld [vmem:[#allocation174_spill] sm:$0xff] }
 0x41f   :  { %9613 = vst [vmem:[#allocation135_spill] sm:$0xff] %v7386_v48  ;;  %9618 = vst [vmem:[#allocation137_spill] sm:$0xff] %v7402_v50  ;;  %v7419_v44 = vmul.f32 %v2341_v27, %v6929_v55  ;;  %v7423_v19 = vadd.f32 %v9624_v41, %v6447_v63  ;;  %v7427_v38 = vadd.f32 %v9625_v14, %v6486_v6  ;;  %v9629_v11 = vld [vmem:[#allocation175_spill] sm:$0xff]  ;;  %v9631_v10 = vld [vmem:[#allocation176_spill] sm:$0xff]  ;;  %v2344_v50 = vpop.f32.mrb[236].mxu1 }
 0x420   :  { %9619 = vst [vmem:[#allocation138_spill] sm:$0xff] %v7405_v3  ;;  %9622 = vst [vmem:[#allocation139_spill] sm:$0xff] %v7416_v46  ;;  %v7431_v45 = vadd.f32 %v9626_v56, %v6501_v0  ;;  %v7435_v3 = vadd.f32 %v9627_v5, %v6442_v61  ;;  %v7439_v55 = vadd.f32 %v9629_v11, %v6447_v63  ;;  %v9633_v41 = vld [vmem:[#allocation177_spill] sm:$0xff]  ;;  %v2151_v46 = vpop.f32.mrb[204].mxu0  ;;  %v9637_v5 = vld [vmem:[#allocation179_spill] sm:$0xff]  ;;  %v2346_v1 = vpop.f32.mrb[237].mxu1 }
 0x421   :  { %9623 = vst [vmem:[#allocation140_spill] sm:$0xff] %v7419_v44  ;;  %v7443_v27 = vadd.f32 %v9631_v10, %v6486_v6  ;;  %v7447_v14 = vadd.f32 %v9633_v41, %v6501_v0  ;;  %v9635_v44 = vld [vmem:[#allocation178_spill] sm:$0xff]  ;;  %v7455_v49 = vadd.f32 %v9637_v5, %v6447_v63  ;;  %v9639_v11 = vld [vmem:[#allocation180_spill] sm:$0xff]  ;;  %v2152_v10 = vadd.f32 %v2151_v46, %v6243_v30  ;;  %v2153_v41 = vpop.f32.mrb[205].mxu0 }
 0x422   :  { %9628 = vst [vmem:[#allocation141_spill] sm:$0xff] %v7435_v3  ;;  %9630 = vst [vmem:[#allocation142_spill] sm:$0xff] %v7439_v55  ;;  %v7451_v56 = vadd.f32 %v9635_v44, %v6442_v61  ;;  %v7459_v48 = vadd.f32 %v9639_v11, %v6486_v6  ;;  %v2345_v33 = vadd.f32 %v2344_v50, %v6245_v29  ;;  %v2155_v11 = vpop.f32.mrb[206].mxu0 }
 0x423   :  { %9632 = vst [vmem:[#allocation143_spill] sm:$0xff] %v7443_v27  ;;  %9634 = vst [vmem:[#allocation144_spill] sm:$0xff] %v7447_v14  ;;  %v9641_v14 = vld [vmem:[#allocation181_spill] sm:$0xff]  ;;  %v2154_v5 = vadd.f32 %v2153_v41, %v6247_v32  ;;  %v7474_v46 = vmul.f32 %v2152_v10, %v6933_v18  ;;  %v2156_v55 = vadd.f32 %v2155_v11, %v6243_v30  ;;  %v4866_v30 = vld [vmem:[%s9012_s9] sm:$0xff]  ;;  %s4868_s9 = smov 64  }
 0x424   :  { %9636 = vst [vmem:[#allocation145_spill] sm:$0xff] %v7451_v56  ;;  %9638 = vst [vmem:[#allocation146_spill] sm:$0xff] %v7455_v49  ;;  %v7465_v44 = vadd.f32 %v9641_v14, %v6501_v0  ;;  %v9643_v56 = vld [vmem:[#allocation182_spill] sm:$0xff]  ;;  %v2347_v49 = vadd.f32 %v2346_v1, %v6249_v26  ;;  %v7477_v50 = vmul.f32 %v2345_v33, %v6943_v20 }
 0x425   :  { %9640 = vst [vmem:[#allocation147_spill] sm:$0xff] %v7459_v48  ;;  %v7469_v27 = vadd.f32 %v9643_v56, %v6442_v61  ;;  %v2348_v48 = vpop.f32.mrb[238].mxu1  ;;  %9645 = vst [vmem:[#allocation150_spill] sm:$0xff] %v7474_v46  ;;  %v7482_v56 = vmul.f32 %v2154_v5, %v6947_v57  ;;  %v7490_v10 = vmul.f32 %v2156_v55, %v6955_v21  ;;  %v9658_v55 = vld [vmem:[#allocation183_spill] sm:$0xff]  ;;  %v9660_v5 = vld [vmem:[#allocation184_spill] sm:$0xff] }
 0x426   :  { %9642 = vst [vmem:[#allocation148_spill] sm:$0xff] %v7465_v44  ;;  %9646 = vst [vmem:[#allocation151_spill] sm:$0xff] %v7477_v50  ;;  %v2349_v14 = vadd.f32 %v2348_v48, %v6245_v29  ;;  %v2157_v44 = vpop.f32.mrb[207].mxu0  ;;  %v2350_v3 = vpop.f32.mrb[239].mxu1  ;;  %v7485_v41 = vmul.f32 %v2347_v49, %v6951_v39  ;;  %v9651_v29 = vld [vmem:[#allocation227_spill] sm:$0xff]  ;;  %v7526_v11 = vadd.f32 %v9660_v5, %v6486_v6 }
 0x427   :  { %9644 = vst [vmem:[#allocation149_spill] sm:$0xff] %v7469_v27  ;;  %9647 = vst [vmem:[#allocation152_spill] sm:$0xff] %v7482_v56  ;;  %v2158_v1 = vadd.f32 %v2157_v44, %v6247_v32  ;;  %v2351_v18 = vadd.f32 %v2350_v3, %v6249_v26  ;;  %v9652_v57 = vsub.s32 4, %v9651_v29  ;;  %v9653_v39 = vsub.s32 6, %v9651_v29  ;;  %v2387_v5 = vpop.f32.mrb[208].mxu0  ;;  %v9680_v56 = vld [vmem:[#allocation194_spill] sm:$0xff] }
 0x428   :  { %9648 = vst [vmem:[#allocation41_spill] sm:$0xff] %v7485_v41  ;;  %9649 = vst [vmem:[#allocation42_spill] sm:$0xff] %v7490_v10  ;;  %v7493_v20 = vmul.f32 %v2349_v14, %v6959_v42  ;;  %v9656_v21 = vsub.s32 5, %v9651_v29  ;;  %v9657_v48 = vsub.s32 7, %v9651_v29  ;;  %v7522_v44 = vadd.f32 %v9658_v55, %v6447_v63  ;;  %v9664_v14 = vld [vmem:[#allocation186_spill] sm:$0xff]  ;;  %v9668_v29 = vld [vmem:[#allocation188_spill] sm:$0xff] }
 0x429   :  { %v7500_v33 = vrot.slane %v4866_v30, %v9652_v57  ;;  %v7504_v49 = vrot.slane %v4866_v30, %v9653_v39  ;;  %v7507_v32 = vmul.f32 %v2158_v1, %v6963_v52  ;;  %v7510_v26 = vmul.f32 %v2351_v18, %v6967_v53  ;;  %9661 = vst [vmem:[#allocation155_spill] sm:$0xff] %v7526_v11  ;;  %v9662_v52 = vld [vmem:[#allocation185_spill] sm:$0xff]  ;;  %v9666_v18 = vld [vmem:[#allocation187_spill] sm:$0xff] }
 0x42a   :  { %9650 = vst [vmem:[#allocation153_spill] sm:$0xff] %v7493_v20  ;;  %v7514_v42 = vrot.slane %v4866_v30, %v9656_v21  ;;  %v7518_v3 = vrot.slane %v4866_v30, %v9657_v48  ;;  %9659 = vst [vmem:[#allocation44_spill] sm:$0xff] %v7522_v44  ;;  %v7530_v53 = vadd.f32 %v9662_v52, %v6501_v0  ;;  %v9670_v39 = vld [vmem:[#allocation189_spill] sm:$0xff]  ;;  %v9672_v48 = vld [vmem:[#allocation190_spill] sm:$0xff]  ;;  %v2580_v52 = vpop.f32.mrb[240].mxu1 }
 0x42b   :  { %9654 = vst [vmem:[#allocation154_spill] sm:$0xff] %v7507_v32  ;;  %9655 = vst [vmem:[#allocation43_spill] sm:$0xff] %v7510_v26  ;;  %v7534_v1 = vadd.f32 %v9664_v14, %v6442_v61  ;;  %v7538_v30 = vadd.f32 %v9666_v18, %v6447_v63  ;;  %v7542_v57 = vadd.f32 %v9668_v29, %v6486_v6  ;;  %v9674_v14 = vld [vmem:[#allocation191_spill] sm:$0xff]  ;;  %v9676_v18 = vld [vmem:[#allocation192_spill] sm:$0xff]  ;;  %v2582_v10 = vpop.f32.mrb[241].mxu1 }
 0x42c   :  { %9663 = vst [vmem:[#allocation156_spill] sm:$0xff] %v7530_v53  ;;  %v7546_v21 = vadd.f32 %v9670_v39, %v6501_v0  ;;  %v7550_v55 = vadd.f32 %v9672_v48, %v6442_v61  ;;  %v7554_v26 = vadd.f32 %v9674_v14, %v6447_v63  ;;  %v7558_v32 = vadd.f32 %v9676_v18, %v6486_v6  ;;  %v2389_v39 = vpop.f32.mrb[209].mxu0  ;;  %v9678_v41 = vld [vmem:[#allocation193_spill] sm:$0xff]  ;;  %v9686_v53 = vld [vmem:[#allocation228_spill] sm:$0xff] }
 0x42d   :  { %9665 = vst [vmem:[#allocation157_spill] sm:$0xff] %v7534_v1  ;;  %9667 = vst [vmem:[#allocation158_spill] sm:$0xff] %v7538_v30  ;;  %v2388_v29 = vadd.f32 %v2387_v5, %v7500_v33  ;;  %v2581_v20 = vadd.f32 %v2580_v52, %v7504_v49  ;;  %v7564_v48 = vadd.f32 %v9678_v41, %v6501_v0  ;;  %v2391_v18 = vpop.f32.mrb[210].mxu0  ;;  %v9684_v30 = vld [vmem:[#allocation59_spill] sm:$0xff]  ;;  %v9687_v44 = vld [vmem:[#allocation229_spill] sm:$0xff] }
 0x42e   :  { %9669 = vst [vmem:[#allocation159_spill] sm:$0xff] %v7542_v57  ;;  %9671 = vst [vmem:[#allocation160_spill] sm:$0xff] %v7546_v21  ;;  %v7568_v50 = vadd.f32 %v9680_v56, %v6442_v61  ;;  %v2390_v14 = vadd.f32 %v2389_v39, %v7514_v42  ;;  %v2583_v46 = vadd.f32 %v2582_v10, %v7518_v3  ;;  %v2393_v41 = vpop.f32.mrb[211].mxu0  ;;  %v9685_v56 = vld [vmem:[#allocation60_spill] sm:$0xff] }
 0x42f   :  { %9673 = vst [vmem:[#allocation161_spill] sm:$0xff] %v7550_v55  ;;  %9675 = vst [vmem:[#allocation162_spill] sm:$0xff] %v7554_v26  ;;  %v9682_v26 = vld [vmem:[#allocation57_spill] sm:$0xff]  ;;  %v9683_v55 = vld [vmem:[#allocation58_spill] sm:$0xff]  ;;  %v2392_v21 = vadd.f32 %v2391_v18, %v7500_v33  ;;  %v2394_v39 = vadd.f32 %v2393_v41, %v7514_v42 }
 0x430   :  { %9677 = vst [vmem:[#allocation163_spill] sm:$0xff] %v7558_v32  ;;  %9679 = vst [vmem:[#allocation164_spill] sm:$0xff] %v7564_v48  ;;  %v2584_v32 = vpop.f32.mrb[242].mxu1  ;;  %v2743_v5 = vmul.f32 %v2388_v29, %v9682_v26  ;;  %v2745_v52 = vmul.f32 %v2581_v20, %v9683_v55  ;;  %v2744_v1 = vmul.f32 %v2390_v14, %v9684_v30  ;;  %v9688_v29 = vld [vmem:[#allocation230_spill] sm:$0xff]  ;;  %v9689_v18 = vld [vmem:[#allocation231_spill] sm:$0xff] }
 0x431   :  { %9681 = vst [vmem:[#allocation165_spill] sm:$0xff] %v7568_v50  ;;  %v2585_v57 = vadd.f32 %v2584_v32, %v7504_v49  ;;  %v2586_v48 = vpop.f32.mrb[243].mxu1  ;;  %v2746_v50 = vmul.f32 %v2583_v46, %v9685_v56  ;;  %v2751_v20 = vmul.f32 %v2392_v21, %v6989_v40  ;;  %v2752_v30 = vmul.f32 %v2394_v39, %v7015_v25  ;;  %v9690_v14 = vld [vmem:[#allocation195_spill] sm:$0xff]  ;;  %v9693_v40 = vld [vmem:[#allocation196_spill] sm:$0xff]  ;;  %v2397_v25 = vpop.f32.mrb[212].mxu0  ;;  %v9697_v39 = vld [vmem:[#allocation197_spill] sm:$0xff] }
 0x432   :  { %v2587_v10 = vadd.f32 %v2586_v48, %v7518_v3  ;;  %v2995_v11 = vadd.f32 %v2743_v5, %v9686_v53  ;;  %v2997_v26 = vadd.f32 %v2745_v52, %v9687_v44  ;;  %v2996_v32 = vadd.f32 %v2744_v1, %v9688_v29  ;;  %v9691_v48 = vld [vmem:[#allocation232_spill] sm:$0xff]  ;;  %v9692_v5 = vld [vmem:[#allocation233_spill] sm:$0xff]  ;;  %v9695_v1 = vld [vmem:[#allocation234_spill] sm:$0xff]  ;;  %v2590_v56 = vpop.f32.mrb[244].mxu1 }
 0x433   :  { %v2753_v55 = vmul.f32 %v2585_v57, %v7011_v4  ;;  %v2998_v27 = vadd.f32 %v2746_v50, %v9689_v18  ;;  %v7590_v41 = vadd.f32 %v9690_v14, %v6447_v63  ;;  %v2999_v53 = vadd.f32 %v2751_v20, %v9691_v48  ;;  %v9696_v50 = vld [vmem:[#allocation235_spill] sm:$0xff] }
 0x434   :  { %v2754_v46 = vmul.f32 %v2587_v10, %v7025_v59  ;;  %v3123_v52 = vadd.f32 %v2997_v26, %v2995_v11  ;;  %v7596_v4 = vadd.f32 %v9693_v40, %v6486_v6  ;;  %v3000_v57 = vadd.f32 %v2752_v30, %v9695_v1  ;;  %v2399_v11 = vpop.f32.mrb[213].mxu0  ;;  %v2592_v26 = vpop.f32.mrb[245].mxu1 }
 0x435   :  { %v3001_v44 = vadd.f32 %v2753_v55, %v9692_v5  ;;  %v3124_v59 = vadd.f32 %v2998_v27, %v2996_v32  ;;  %v7602_v10 = vadd.f32 %v9697_v39, %v6501_v0  ;;  %v2398_v20 = vadd.f32 %v2397_v25, %v7500_v33  ;;  %v2401_v14 = vpop.f32.mrb[214].mxu0 }
 0x436   :  { %9694 = vst [vmem:[#allocation166_spill] sm:$0xff] %v7596_v4  ;;  %v3002_v21 = vadd.f32 %v2754_v46, %v9696_v50  ;;  %v2591_v55 = vadd.f32 %v2590_v56, %v7504_v49  ;;  %v2400_v18 = vadd.f32 %v2399_v11, %v7514_v42  ;;  %v2593_v30 = vadd.f32 %v2592_v26, %v7518_v3  ;;  %v2594_v46 = vpop.f32.mrb[246].mxu1  ;;  %v2403_v50 = vpop.f32.mrb[215].mxu0  ;;  %v9704_v11 = vld [vmem:[#allocation238_spill] sm:$0xff]  ;;  %v9705_v26 = vld [vmem:[#allocation239_spill] sm:$0xff] }
 0x437   :  { %9698 = vst [vmem:[#allocation45_spill] sm:$0xff] %v7602_v10  ;;  %v3125_v29 = vadd.f32 %v3001_v44, %v2999_v53  ;;  %v7608_v48 = vadd.f32 %v3124_v59, %v3123_v52  ;;  %v2759_v32 = vmul.f32 %v2398_v20, %v7029_v16  ;;  %v2402_v40 = vadd.f32 %v2401_v14, %v7500_v33  ;;  %v2596_v25 = vpop.f32.mrb[247].mxu1  ;;  %v9700_v16 = vld [vmem:[#allocation236_spill] sm:$0xff]  ;;  %v9702_v59 = vld [vmem:[#allocation69_spill] sm:$0xff]  ;;  %v9703_v20 = vld [vmem:[#allocation70_spill] sm:$0xff] }
 0x438   :  { %v3126_v27 = vadd.f32 %v3002_v21, %v3000_v57  ;;  %v2761_v5 = vmul.f32 %v2591_v55, %v7039_v35  ;;  %v2595_v1 = vadd.f32 %v2594_v46, %v7504_v49  ;;  %v2760_v53 = vmul.f32 %v2400_v18, %v7043_v23  ;;  %v9701_v57 = vld [vmem:[#allocation237_spill] sm:$0xff]  ;;  %v9706_v18 = vld [vmem:[#allocation71_spill] sm:$0xff]  ;;  %v9707_v14 = vld [vmem:[#allocation72_spill] sm:$0xff] }
 0x439   :  { %9699 = vst [vmem:[#allocation46_spill] sm:$0xff] %v7608_v48  ;;  %v2762_v44 = vmul.f32 %v2593_v30, %v7047_v54  ;;  %v2404_v56 = vadd.f32 %v2403_v50, %v7514_v42  ;;  %v2597_v52 = vadd.f32 %v2596_v25, %v7518_v3  ;;  %3251 = vrot.lane.b32.xlu0 %v7608_v48, %s4868_s9  ;;  %v9708_v50 = vld [vmem:[#allocation240_spill] sm:$0xff]  ;;  %v9709_v10 = vld [vmem:[#allocation241_spill] sm:$0xff] }
 0x43a   :  { %v3003_v35 = vadd.f32 %v2759_v32, %v9700_v16  ;;  %v3005_v21 = vadd.f32 %v2761_v5, %v9701_v57  ;;  %v2767_v39 = vmul.f32 %v2402_v40, %v9702_v59  ;;  %v2769_v55 = vmul.f32 %v2595_v1, %v9703_v20  ;;  %v9710_v5 = vld [vmem:[#allocation198_spill] sm:$0xff]  ;;  %v2600_v59 = vpop.f32.mrb[248].mxu1 }
 0x43b   :  { %v3004_v23 = vadd.f32 %v2760_v53, %v9704_v11  ;;  %v3006_v54 = vadd.f32 %v2762_v44, %v9705_v26  ;;  %v2768_v30 = vmul.f32 %v2404_v56, %v9706_v18  ;;  %v2770_v46 = vmul.f32 %v2597_v52, %v9707_v14  ;;  %v9711_v1 = vld [vmem:[#allocation242_spill] sm:$0xff]  ;;  %v9712_v53 = vld [vmem:[#allocation243_spill] sm:$0xff]  ;;  %v2407_v44 = vpop.f32.mrb[216].mxu0  ;;  %v9714_v18 = vld [vmem:[#allocation73_spill] sm:$0xff] }
 0x43c   :  { %v3007_v25 = vadd.f32 %v2767_v39, %v9708_v50  ;;  %v3009_v48 = vadd.f32 %v2769_v55, %v9709_v10  ;;  %v7630_v4 = vadd.f32 %v3126_v27, %v3125_v29  ;;  %v3127_v32 = vadd.f32 %v3005_v21, %v3003_v35  ;;  %v9713_v52 = vld [vmem:[#allocation199_spill] sm:$0xff]  ;;  %v2409_v27 = vpop.f32.mrb[217].mxu0  ;;  %v2602_v35 = vpop.f32.mrb[249].mxu1  ;;  %v9715_v14 = vld [vmem:[#allocation74_spill] sm:$0xff] }
 0x43d   :  { %v7634_v40 = vadd.f32 %v9710_v5, %v6442_v61  ;;  %v3008_v16 = vadd.f32 %v2768_v30, %v9711_v1  ;;  %v3010_v57 = vadd.f32 %v2770_v46, %v9712_v53  ;;  %v3128_v56 = vadd.f32 %v3006_v54, %v3004_v23  ;;  %v2411_v11 = vpop.f32.mrb[218].mxu0  ;;  %v2604_v23 = vpop.f32.mrb[250].mxu1 }
 0x43e   :  { %v7640_v20 = vadd.f32 %v9713_v52, %v6447_v63  ;;  %v2408_v10 = vadd.f32 %v2407_v44, %v7500_v33  ;;  %v2601_v29 = vadd.f32 %v2600_v59, %v7504_v49  ;;  %3253 = vrot.lane.b32.xlu0 %v7630_v4, %s4868_s9  ;;  %v3129_v21 = vadd.f32 %v3009_v48, %v3007_v25  ;;  %v2413_v1 = vpop.f32.mrb[219].mxu0  ;;  %v2606_v53 = vpop.f32.mrb[251].mxu1  ;;  %v9716_v48 = vld [vmem:[#allocation75_spill] sm:$0xff]  ;;  %v9717_v44 = vld [vmem:[#allocation76_spill] sm:$0xff] }
 0x43f   :  { %v2410_v39 = vadd.f32 %v2409_v27, %v7514_v42  ;;  %v2603_v55 = vadd.f32 %v2602_v35, %v7518_v3  ;;  %v7648_v26 = vadd.f32 %v3128_v56, %v3127_v32  ;;  %v3130_v54 = vadd.f32 %v3010_v57, %v3008_v16  ;;  %v9718_v16 = vld [vmem:[#allocation244_spill] sm:$0xff]  ;;  %v9719_v56 = vld [vmem:[#allocation245_spill] sm:$0xff]  ;;  %v9720_v35 = vld [vmem:[#allocation246_spill] sm:$0xff] }
 0x440   :  { %v2775_v30 = vmul.f32 %v2408_v10, %v9714_v18  ;;  %v2777_v46 = vmul.f32 %v2601_v29, %v9715_v14  ;;  %v2412_v50 = vadd.f32 %v2411_v11, %v7500_v33  ;;  %v2605_v5 = vadd.f32 %v2604_v23, %v7504_v49  ;;  %v9722_v14 = vld [vmem:[#allocation248_spill] sm:$0xff] }
 0x441   :  { %v2776_v25 = vmul.f32 %v2410_v39, %v9716_v48  ;;  %v2778_v59 = vmul.f32 %v2603_v55, %v9717_v44  ;;  %v2414_v52 = vadd.f32 %v2413_v1, %v7514_v42  ;;  %v2607_v32 = vadd.f32 %v2606_v53, %v7518_v3  ;;  %3255 = vrot.lane.b32.xlu1 %v7648_v26, %s4868_s9  ;;  %v9721_v39 = vld [vmem:[#allocation247_spill] sm:$0xff]  ;;  %v9723_v53 = vld [vmem:[#allocation249_spill] sm:$0xff] }
 0x442   :  { %v3011_v57 = vadd.f32 %v2775_v30, %v9718_v16  ;;  %v3013_v10 = vadd.f32 %v2777_v46, %v9719_v56  ;;  %v2783_v29 = vmul.f32 %v2412_v50, %v7085_v24  ;;  %v2785_v27 = vmul.f32 %v2605_v5, %v7107_v12  ;;  %v9724_v46 = vld [vmem:[#allocation200_spill] sm:$0xff]  ;;  %v9725_v12 = vld [vmem:[#allocation250_spill] sm:$0xff]  ;;  %v9726_v5 = vld [vmem:[#allocation251_spill] sm:$0xff]  ;;  %v2610_v16 = vpop.f32.mrb[252].mxu1 }
 0x443   :  { %v3012_v11 = vadd.f32 %v2776_v25, %v9720_v35  ;;  %v3014_v23 = vadd.f32 %v2778_v59, %v9721_v39  ;;  %v2784_v55 = vmul.f32 %v2414_v52, %v7111_v7  ;;  %v2786_v18 = vmul.f32 %v2607_v32, %v7121_v51  ;;  %v2417_v59 = vpop.f32.mrb[220].mxu0  ;;  %v9727_v51 = vld [vmem:[#allocation201_spill] sm:$0xff] }
 0x444   :  { %v3015_v1 = vadd.f32 %v2783_v29, %v9722_v14  ;;  %v3017_v48 = vadd.f32 %v2785_v27, %v9723_v53  ;;  %v7670_v44 = vadd.f32 %v3130_v54, %v3129_v21  ;;  %v3131_v30 = vadd.f32 %v3013_v10, %v3011_v57  ;;  %v2419_v54 = vpop.f32.mrb[221].mxu0  ;;  %v2612_v57 = vpop.f32.mrb[253].mxu1 }
 0x445   :  { %v7674_v24 = vadd.f32 %v9724_v46, %v6486_v6  ;;  %v3016_v50 = vadd.f32 %v2784_v55, %v9725_v12  ;;  %v3018_v25 = vadd.f32 %v2786_v18, %v9726_v5  ;;  %v3132_v7 = vadd.f32 %v3014_v23, %v3012_v11  ;;  %v2421_v27 = vpop.f32.mrb[222].mxu0  ;;  %v2614_v35 = vpop.f32.mrb[254].mxu1 }
 0x446   :  { %v7680_v52 = vadd.f32 %v9727_v51, %v6501_v0  ;;  %v2418_v32 = vadd.f32 %v2417_v59, %v7500_v33  ;;  %v2611_v21 = vadd.f32 %v2610_v16, %v7504_v49  ;;  %3257 = vrot.lane.b32.xlu1 %v7670_v44, %s4868_s9  ;;  %v3133_v56 = vadd.f32 %v3017_v48, %v3015_v1  ;;  %v2423_v53 = vpop.f32.mrb[223].mxu0  ;;  %v2616_v46 = vpop.f32.mrb[255].mxu1  ;;  %v9731_v16 = vld [vmem:[#allocation86_spill] sm:$0xff] }
 0x447   :  { %v2420_v10 = vadd.f32 %v2419_v54, %v7514_v42  ;;  %v2613_v29 = vadd.f32 %v2612_v57, %v7518_v3  ;;  %v7688_v11 = vadd.f32 %v3132_v7, %v3131_v30  ;;  %v3134_v39 = vadd.f32 %v3018_v25, %v3016_v50  ;;  %v9730_v25 = vld [vmem:[#allocation85_spill] sm:$0xff]  ;;  %v9732_v51 = vld [vmem:[#allocation254_spill] sm:$0xff]  ;;  %v9735_v57 = vld [vmem:[#allocation88_spill] sm:$0xff] }
 0x448   :  { %v2791_v23 = vmul.f32 %v2418_v32, %v7125_v28  ;;  %v2793_v55 = vmul.f32 %v2611_v21, %v7135_v62  ;;  %v2422_v18 = vadd.f32 %v2421_v27, %v7500_v33  ;;  %v2615_v14 = vadd.f32 %v2614_v35, %v7504_v49  ;;  %v9728_v28 = vld [vmem:[#allocation252_spill] sm:$0xff]  ;;  %v9729_v62 = vld [vmem:[#allocation253_spill] sm:$0xff] }
 0x449   :  { %v2792_v1 = vmul.f32 %v2420_v10, %v7139_v9  ;;  %v2794_v48 = vmul.f32 %v2613_v29, %v7143_v36  ;;  %v2424_v12 = vadd.f32 %v2423_v53, %v7514_v42  ;;  %v2617_v30 = vadd.f32 %v2616_v46, %v7518_v3  ;;  %3259 = vrot.lane.b32.xlu0 %v7688_v11, %s4868_s9  ;;  %v9733_v9 = vld [vmem:[#allocation255_spill] sm:$0xff]  ;;  %v9736_v29 = vld [vmem:[#allocation256_spill] sm:$0xff]  ;;  %v9737_v35 = vld [vmem:[#allocation257_spill] sm:$0xff] }
 0x44a   :  { %v3019_v50 = vadd.f32 %v2791_v23, %v9728_v28  ;;  %v3021_v5 = vadd.f32 %v2793_v55, %v9729_v62  ;;  %v2799_v59 = vmul.f32 %v2422_v18, %v9730_v25  ;;  %v2801_v7 = vmul.f32 %v2615_v14, %v9731_v16  ;;  %v9734_v36 = vld [vmem:[#allocation87_spill] sm:$0xff]  ;;  %v9739_v55 = vld [vmem:[#allocation202_spill] sm:$0xff]  ;;  %v2620_v25 = vpop.f32.mrb[0].mxu1 }
 0x44b   :  { %v3020_v32 = vadd.f32 %v2792_v1, %v9732_v51  ;;  %v3022_v21 = vadd.f32 %v2794_v48, %v9733_v9  ;;  %v2800_v54 = vmul.f32 %v2424_v12, %v9734_v36  ;;  %v2802_v10 = vmul.f32 %v2617_v30, %v9735_v57  ;;  %v9740_v14 = vld [vmem:[#allocation258_spill] sm:$0xff]  ;;  %v9741_v1 = vld [vmem:[#allocation259_spill] sm:$0xff]  ;;  %v2427_v48 = vpop.f32.mrb[224].mxu0 }
 0x44c   :  { %v3023_v27 = vadd.f32 %v2799_v59, %v9736_v29  ;;  %v3025_v53 = vadd.f32 %v2801_v7, %v9737_v35  ;;  %v7710_v46 = vadd.f32 %v3134_v39, %v3133_v56  ;;  %v3135_v23 = vadd.f32 %v3021_v5, %v3019_v50  ;;  %v9742_v30 = vld [vmem:[#allocation203_spill] sm:$0xff]  ;;  %v2429_v50 = vpop.f32.mrb[225].mxu0  ;;  %v2622_v5 = vpop.f32.mrb[1].mxu1 }
 0x44d   :  { %v7714_v18 = vadd.f32 %v9739_v55, %v6442_v61  ;;  %v3024_v28 = vadd.f32 %v2800_v54, %v9740_v14  ;;  %v3026_v62 = vadd.f32 %v2802_v10, %v9741_v1  ;;  %v3136_v12 = vadd.f32 %v3022_v21, %v3020_v32  ;;  %v2431_v9 = vpop.f32.mrb[226].mxu0  ;;  %v2624_v32 = vpop.f32.mrb[2].mxu1  ;;  %v9744_v54 = vld [vmem:[#allocation89_spill] sm:$0xff]  ;;  %v9745_v10 = vld [vmem:[#allocation90_spill] sm:$0xff] }
 0x44e   :  { %9738 = vst [vmem:[#allocation47_spill] sm:$0xff] %v7710_v46  ;;  %v7720_v16 = vadd.f32 %v9742_v30, %v6447_v63  ;;  %3261 = vrot.lane.b32.xlu1 %v7710_v46, %s4868_s9  ;;  %v2428_v56 = vadd.f32 %v2427_v48, %v7500_v33  ;;  %v2621_v39 = vadd.f32 %v2620_v25, %v7504_v49  ;;  %v2433_v14 = vpop.f32.mrb[227].mxu0  ;;  %v2626_v1 = vpop.f32.mrb[3].mxu1  ;;  %v9747_v48 = vld [vmem:[#allocation92_spill] sm:$0xff] }
 0x44f   :  { %v3137_v59 = vadd.f32 %v3025_v53, %v3023_v27  ;;  %v2430_v7 = vadd.f32 %v2429_v50, %v7514_v42  ;;  %v2623_v51 = vadd.f32 %v2622_v5, %v7518_v3  ;;  %v7728_v21 = vadd.f32 %v3136_v12, %v3135_v23  ;;  %v9746_v27 = vld [vmem:[#allocation91_spill] sm:$0xff]  ;;  %v9750_v5 = vld [vmem:[#allocation4_spill] sm:$0xff] }
 0x450   :  { %v3138_v36 = vadd.f32 %v3026_v62, %v3024_v28  ;;  %v2807_v57 = vmul.f32 %v2428_v56, %v9744_v54  ;;  %v2809_v29 = vmul.f32 %v2621_v39, %v9745_v10  ;;  %v2432_v35 = vadd.f32 %v2431_v9, %v7500_v33  ;;  %v9748_v28 = vld [vmem:[#allocation2_spill] sm:$0xff]  ;;  %v9749_v12 = vld [vmem:[#allocation3_spill] sm:$0xff] }
 0x451   :  { %9743 = vst [vmem:[#allocation48_spill] sm:$0xff] %v7728_v21  ;;  %v2625_v55 = vadd.f32 %v2624_v32, %v7504_v49  ;;  %v2808_v53 = vmul.f32 %v2430_v7, %v9746_v27  ;;  %v2810_v25 = vmul.f32 %v2623_v51, %v9747_v48  ;;  %v2434_v30 = vadd.f32 %v2433_v14, %v7514_v42  ;;  %v9751_v7 = vld [vmem:[#allocation5_spill] sm:$0xff]  ;;  %v9752_v10 = vld [vmem:[#allocation6_spill] sm:$0xff] }
 0x452   :  { %v2627_v23 = vadd.f32 %v2626_v1, %v7518_v3  ;;  %3263 = vrot.lane.b32.xlu0 %v7728_v21, %s4868_s9  ;;  %v3027_v62 = vadd.f32 %v2807_v57, %v9748_v28  ;;  %v3029_v56 = vadd.f32 %v2809_v29, %v9749_v12  ;;  %v2815_v39 = vmul.f32 %v2432_v35, %v7181_v37  ;;  %v9753_v1 = vld [vmem:[#allocation7_spill] sm:$0xff]  ;;  %v9755_v29 = vld [vmem:[#allocation204_spill] sm:$0xff]  ;;  %v2630_v28 = vpop.f32.mrb[4].mxu1 }
 0x453   :  { %v2817_v50 = vmul.f32 %v2625_v55, %v7203_v2  ;;  %v3028_v9 = vadd.f32 %v2808_v53, %v9750_v5  ;;  %v3030_v32 = vadd.f32 %v2810_v25, %v9751_v7  ;;  %v2816_v51 = vmul.f32 %v2434_v30, %v7207_v60  ;;  %v9756_v2 = vld [vmem:[#allocation8_spill] sm:$0xff]  ;;  %v9757_v55 = vld [vmem:[#allocation9_spill] sm:$0xff]  ;;  %v2437_v25 = vpop.f32.mrb[228].mxu0 }
 0x454   :  { %v2818_v54 = vmul.f32 %v2627_v23, %v7217_v17  ;;  %v3031_v14 = vadd.f32 %v2815_v39, %v9752_v10  ;;  %v7750_v48 = vadd.f32 %v3138_v36, %v3137_v59  ;;  %v3139_v57 = vadd.f32 %v3029_v56, %v3027_v62  ;;  %v9758_v17 = vld [vmem:[#allocation205_spill] sm:$0xff]  ;;  %v2439_v23 = vpop.f32.mrb[229].mxu0  ;;  %v2632_v62 = vpop.f32.mrb[5].mxu1 }
 0x455   :  { %v3033_v27 = vadd.f32 %v2817_v50, %v9753_v1  ;;  %v7754_v37 = vadd.f32 %v9755_v29, %v6486_v6  ;;  %v3032_v35 = vadd.f32 %v2816_v51, %v9756_v2  ;;  %v3140_v60 = vadd.f32 %v3030_v32, %v3028_v9  ;;  %v2441_v50 = vpop.f32.mrb[230].mxu0  ;;  %v2634_v5 = vpop.f32.mrb[6].mxu1 }
 0x456   :  { %9754 = vst [vmem:[#allocation167_spill] sm:$0xff] %v7750_v48  ;;  %v3034_v53 = vadd.f32 %v2818_v54, %v9757_v55  ;;  %v7760_v30 = vadd.f32 %v9758_v17, %v6501_v0  ;;  %3265 = vrot.lane.b32.xlu1 %v7750_v48, %s4868_s9  ;;  %v2438_v59 = vadd.f32 %v2437_v25, %v7500_v33  ;;  %v2443_v1 = vpop.f32.mrb[231].mxu0  ;;  %v2636_v29 = vpop.f32.mrb[7].mxu1  ;;  %v9764_v17 = vld [vmem:[#allocation11_spill] sm:$0xff]  ;;  %v9808_v48 = vld [vmem:[#allocation30_spill] sm:$0xff] }
 0x457   :  { %v2631_v36 = vadd.f32 %v2630_v28, %v7504_v49  ;;  %v3141_v12 = vadd.f32 %v3033_v27, %v3031_v14  ;;  %v2440_v56 = vadd.f32 %v2439_v23, %v7514_v42  ;;  %v2633_v39 = vadd.f32 %v2632_v62, %v7518_v3  ;;  %v9763_v28 = vld [vmem:[#allocation102_spill] sm:$0xff]  ;;  %v9767_v62 = vld [vmem:[#allocation104_spill] sm:$0xff] }
 0x458   :  { %v7768_v9 = vadd.f32 %v3140_v60, %v3139_v57  ;;  %v3142_v7 = vadd.f32 %v3034_v53, %v3032_v35  ;;  %v2823_v32 = vmul.f32 %v2438_v59, %v7221_v8  ;;  %v2442_v54 = vadd.f32 %v2441_v50, %v7500_v33  ;;  %v9760_v8 = vld [vmem:[#allocation226_spill] sm:$0xff]  ;;  %v9762_v53 = vld [vmem:[#allocation101_spill] sm:$0xff] }
 0x459   :  { %v2825_v51 = vmul.f32 %v2631_v36, %v7231_v58  ;;  %v2635_v10 = vadd.f32 %v2634_v5, %v7504_v49  ;;  %v2824_v14 = vmul.f32 %v2440_v56, %v7235_v31  ;;  %v2826_v27 = vmul.f32 %v2633_v39, %v7239_v13  ;;  %v9761_v58 = vld [vmem:[#allocation10_spill] sm:$0xff]  ;;  %v9765_v31 = vld [vmem:[#allocation12_spill] sm:$0xff]  ;;  %v9766_v13 = vld [vmem:[#allocation103_spill] sm:$0xff] }
 0x45a   :  { %9759 = vst [vmem:[#allocation168_spill] sm:$0xff] %v7768_v9  ;;  %v2444_v2 = vadd.f32 %v2443_v1, %v7514_v42  ;;  %v2637_v57 = vadd.f32 %v2636_v29, %v7518_v3  ;;  %3267 = vrot.lane.b32.xlu0 %v7768_v9, %s4868_s9  ;;  %v3035_v35 = vadd.f32 %v2823_v32, %v9760_v8  ;;  %v9768_v39 = vld [vmem:[#allocation13_spill] sm:$0xff]  ;;  %v9769_v5 = vld [vmem:[#allocation14_spill] sm:$0xff] }
 0x45b   :  { %v3037_v55 = vadd.f32 %v2825_v51, %v9761_v58  ;;  %v2831_v25 = vmul.f32 %v2442_v54, %v9762_v53  ;;  %v2833_v60 = vmul.f32 %v2635_v10, %v9763_v28  ;;  %v3036_v59 = vadd.f32 %v2824_v14, %v9764_v17  ;;  %v9771_v51 = vld [vmem:[#allocation206_spill] sm:$0xff]  ;;  %v9772_v10 = vld [vmem:[#allocation15_spill] sm:$0xff]  ;;  %v9773_v14 = vld [vmem:[#allocation16_spill] sm:$0xff]  ;;  %v2640_v53 = vpop.f32.mrb[8].mxu1 }
 0x45c   :  { %v3038_v36 = vadd.f32 %v2826_v27, %v9765_v31  ;;  %v2832_v23 = vmul.f32 %v2444_v2, %v9766_v13  ;;  %v2834_v56 = vmul.f32 %v2637_v57, %v9767_v62  ;;  %v7790_v29 = vadd.f32 %v3142_v7, %v3141_v12  ;;  %v2447_v27 = vpop.f32.mrb[232].mxu0  ;;  %v9774_v57 = vld [vmem:[#allocation207_spill] sm:$0xff] }
 0x45d   :  { %v3039_v50 = vadd.f32 %v2831_v25, %v9768_v39  ;;  %v3041_v1 = vadd.f32 %v2833_v60, %v9769_v5  ;;  %v3143_v32 = vadd.f32 %v3037_v55, %v3035_v35  ;;  %v7794_v54 = vadd.f32 %v9771_v51, %v6442_v61  ;;  %v2449_v35 = vpop.f32.mrb[233].mxu0  ;;  %v2642_v55 = vpop.f32.mrb[9].mxu1 }
 0x45e   :  { %9770 = vst [vmem:[#allocation169_spill] sm:$0xff] %v7790_v29  ;;  %v3040_v8 = vadd.f32 %v2832_v23, %v9772_v10  ;;  %v3042_v58 = vadd.f32 %v2834_v56, %v9773_v14  ;;  %v3144_v2 = vadd.f32 %v3038_v36, %v3036_v59  ;;  %v7800_v28 = vadd.f32 %v9774_v57, %v6447_v63  ;;  %v2451_v31 = vpop.f32.mrb[234].mxu0  ;;  %v2644_v59 = vpop.f32.mrb[10].mxu1  ;;  %v9776_v23 = vld [vmem:[#allocation105_spill] sm:$0xff]  ;;  %v9777_v56 = vld [vmem:[#allocation106_spill] sm:$0xff] }
 0x45f   :  { %3269 = vrot.lane.b32.xlu1 %v7790_v29, %s4868_s9  ;;  %v2448_v12 = vadd.f32 %v2447_v27, %v7500_v33  ;;  %v2641_v7 = vadd.f32 %v2640_v53, %v7504_v49  ;;  %v3145_v25 = vadd.f32 %v3041_v1, %v3039_v50  ;;  %v2450_v60 = vadd.f32 %v2449_v35, %v7514_v42  ;;  %v2453_v10 = vpop.f32.mrb[235].mxu0  ;;  %v2646_v14 = vpop.f32.mrb[11].mxu1  ;;  %v9778_v50 = vld [vmem:[#allocation107_spill] sm:$0xff]  ;;  %v9779_v27 = vld [vmem:[#allocation108_spill] sm:$0xff]  ;;  %v9782_v35 = vld [vmem:[#allocation113_spill] sm:$0xff] }
 0x460   :  { %v2643_v17 = vadd.f32 %v2642_v55, %v7518_v3  ;;  %v7808_v36 = vadd.f32 %v3144_v2, %v3143_v32  ;;  %v3146_v13 = vadd.f32 %v3042_v58, %v3040_v8  ;;  %v2452_v5 = vadd.f32 %v2451_v31, %v7500_v33  ;;  %v9780_v8 = vld [vmem:[#allocation17_spill] sm:$0xff]  ;;  %v9781_v2 = vld [vmem:[#allocation18_spill] sm:$0xff]  ;;  %v9783_v31 = vld [vmem:[#allocation19_spill] sm:$0xff] }
 0x461   :  { %v2839_v62 = vmul.f32 %v2448_v12, %v9776_v23  ;;  %v2841_v39 = vmul.f32 %v2641_v7, %v9777_v56  ;;  %v2645_v51 = vadd.f32 %v2644_v59, %v7504_v49  ;;  %v2840_v1 = vmul.f32 %v2450_v60, %v9778_v50  ;;  %v9784_v60 = vld [vmem:[#allocation20_spill] sm:$0xff]  ;;  %v9788_v29 = vld [vmem:[#allocation22_spill] sm:$0xff] }
 0x462   :  { %9775 = vst [vmem:[#allocation170_spill] sm:$0xff] %v7808_v36  ;;  %v2842_v53 = vmul.f32 %v2643_v17, %v9779_v27  ;;  %v2454_v57 = vadd.f32 %v2453_v10, %v7514_v42  ;;  %v2647_v32 = vadd.f32 %v2646_v14, %v7518_v3  ;;  %3271 = vrot.lane.b32.xlu0 %v7808_v36, %s4868_s9  ;;  %v9785_v17 = vld [vmem:[#allocation114_spill] sm:$0xff]  ;;  %v9786_v10 = vld [vmem:[#allocation117_spill] sm:$0xff] }
 0x463   :  { %v3043_v58 = vadd.f32 %v2839_v62, %v9780_v8  ;;  %v3045_v12 = vadd.f32 %v2841_v39, %v9781_v2  ;;  %v2847_v7 = vmul.f32 %v2452_v5, %v7277_v43  ;;  %v2849_v55 = vmul.f32 %v2645_v51, %v9782_v35  ;;  %v9787_v14 = vld [vmem:[#allocation21_spill] sm:$0xff]  ;;  %v9790_v39 = vld [vmem:[#allocation208_spill] sm:$0xff]  ;;  %v9791_v5 = vld [vmem:[#allocation23_spill] sm:$0xff]  ;;  %v2650_v2 = vpop.f32.mrb[12].mxu1 }
 0x464   :  { %v3044_v59 = vadd.f32 %v2840_v1, %v9783_v31  ;;  %v3046_v23 = vadd.f32 %v2842_v53, %v9784_v60  ;;  %v2848_v56 = vmul.f32 %v2454_v57, %v9785_v17  ;;  %v2850_v50 = vmul.f32 %v2647_v32, %v9786_v10  ;;  %v9792_v1 = vld [vmem:[#allocation24_spill] sm:$0xff]  ;;  %v2457_v53 = vpop.f32.mrb[236].mxu0  ;;  %v9793_v32 = vld [vmem:[#allocation209_spill] sm:$0xff]  ;;  %v9795_v17 = vld [vmem:[#allocation118_spill] sm:$0xff] }
 0x465   :  { %v3047_v27 = vadd.f32 %v2847_v7, %v9787_v14  ;;  %v3049_v36 = vadd.f32 %v2849_v55, %v9788_v29  ;;  %v7830_v9 = vadd.f32 %v3146_v13, %v3145_v25  ;;  %v3147_v62 = vadd.f32 %v3045_v12, %v3043_v58  ;;  %v2459_v13 = vpop.f32.mrb[237].mxu0  ;;  %v2652_v58 = vpop.f32.mrb[13].mxu1  ;;  %v9796_v10 = vld [vmem:[#allocation121_spill] sm:$0xff] }
 0x466   :  { %v7834_v43 = vadd.f32 %v9790_v39, %v6486_v6  ;;  %v3048_v51 = vadd.f32 %v2848_v56, %v9791_v5  ;;  %v3050_v8 = vadd.f32 %v2850_v50, %v9792_v1  ;;  %v3148_v57 = vadd.f32 %v3046_v23, %v3044_v59  ;;  %v2461_v31 = vpop.f32.mrb[238].mxu0  ;;  %v2654_v59 = vpop.f32.mrb[14].mxu1 }
 0x467   :  { %9789 = vst [vmem:[#allocation171_spill] sm:$0xff] %v7830_v9  ;;  %v7840_v35 = vadd.f32 %v9793_v32, %v6501_v0  ;;  %3273 = vrot.lane.b32.xlu1 %v7830_v9, %s4868_s9  ;;  %v2458_v29 = vadd.f32 %v2457_v53, %v7500_v33  ;;  %v2651_v25 = vadd.f32 %v2650_v2, %v7504_v49  ;;  %v2463_v5 = vpop.f32.mrb[239].mxu0  ;;  %v2656_v1 = vpop.f32.mrb[15].mxu1  ;;  %v9798_v53 = vld [vmem:[#allocation123_spill] sm:$0xff] }
 0x468   :  { %v3149_v12 = vadd.f32 %v3049_v36, %v3047_v27  ;;  %v2460_v7 = vadd.f32 %v2459_v13, %v7514_v42  ;;  %v2653_v55 = vadd.f32 %v2652_v58, %v7518_v3  ;;  %v7848_v60 = vadd.f32 %v3148_v57, %v3147_v62  ;;  %v9797_v36 = vld [vmem:[#allocation122_spill] sm:$0xff]  ;;  %v9802_v58 = vld [vmem:[#allocation125_spill] sm:$0xff] }
 0x469   :  { %v3150_v23 = vadd.f32 %v3050_v8, %v3048_v51  ;;  %v2855_v56 = vmul.f32 %v2458_v29, %v9795_v17  ;;  %v2857_v50 = vmul.f32 %v2651_v25, %v9796_v10  ;;  %v2462_v14 = vadd.f32 %v2461_v31, %v7500_v33  ;;  %v9799_v51 = vld [vmem:[#allocation25_spill] sm:$0xff]  ;;  %v9800_v57 = vld [vmem:[#allocation26_spill] sm:$0xff]  ;;  %v9801_v25 = vld [vmem:[#allocation124_spill] sm:$0xff] }
 0x46a   :  { %9794 = vst [vmem:[#allocation172_spill] sm:$0xff] %v7848_v60  ;;  %v2655_v39 = vadd.f32 %v2654_v59, %v7504_v49  ;;  %v2856_v27 = vmul.f32 %v2460_v7, %v9797_v36  ;;  %v2858_v2 = vmul.f32 %v2653_v55, %v9798_v53  ;;  %v2464_v32 = vadd.f32 %v2463_v5, %v7514_v42  ;;  %v9803_v59 = vld [vmem:[#allocation27_spill] sm:$0xff]  ;;  %v9804_v7 = vld [vmem:[#allocation28_spill] sm:$0xff]  ;;  %v9805_v55 = vld [vmem:[#allocation126_spill] sm:$0xff] }
 0x46b   :  { %v2657_v62 = vadd.f32 %v2656_v1, %v7518_v3  ;;  %3275 = vrot.lane.b32.xlu0 %v7848_v60, %s4868_s9  ;;  %v3051_v8 = vadd.f32 %v2855_v56, %v9799_v51  ;;  %v3053_v29 = vadd.f32 %v2857_v50, %v9800_v57  ;;  %v2863_v13 = vmul.f32 %v2462_v14, %v9801_v25  ;;  %v9806_v5 = vld [vmem:[#allocation127_spill] sm:$0xff]  ;;  %v9807_v1 = vld [vmem:[#allocation29_spill] sm:$0xff]  ;;  %v9810_v50 = vld [vmem:[#allocation210_spill] sm:$0xff]  ;;  %v2660_v25 = vpop.f32.mrb[16].mxu1 }
 0x46c   :  { %v2865_v31 = vmul.f32 %v2655_v39, %v9802_v58  ;;  %v3052_v17 = vadd.f32 %v2856_v27, %v9803_v59  ;;  %v3054_v10 = vadd.f32 %v2858_v2, %v9804_v7  ;;  %v2864_v36 = vmul.f32 %v2464_v32, %v9805_v55  ;;  %v9811_v39 = vld [vmem:[#allocation31_spill] sm:$0xff]  ;;  %v9812_v27 = vld [vmem:[#allocation32_spill] sm:$0xff]  ;;  %v2467_v2 = vpop.f32.mrb[240].mxu0 }
 0x46d   :  { %v2866_v53 = vmul.f32 %v2657_v62, %v9806_v5  ;;  %v3055_v9 = vadd.f32 %v2863_v13, %v9807_v1  ;;  %v7870_v21 = vadd.f32 %v3150_v23, %v3149_v12  ;;  %v3151_v56 = vadd.f32 %v3053_v29, %v3051_v8  ;;  %v9813_v62 = vld [vmem:[#allocation211_spill] sm:$0xff]  ;;  %v2469_v23 = vpop.f32.mrb[241].mxu0  ;;  %v2662_v8 = vpop.f32.mrb[17].mxu1  ;;  %v9815_v55 = vld [vmem:[#allocation128_spill] sm:$0xff]  ;;  %v9816_v5 = vld [vmem:[#allocation129_spill] sm:$0xff] }
 0x46e   :  { %v3057_v60 = vadd.f32 %v2865_v31, %v9808_v48  ;;  %v7874_v14 = vadd.f32 %v9810_v50, %v6442_v61  ;;  %v3056_v51 = vadd.f32 %v2864_v36, %v9811_v39  ;;  %v3152_v32 = vadd.f32 %v3054_v10, %v3052_v17  ;;  %v2471_v59 = vpop.f32.mrb[242].mxu0  ;;  %v2664_v17 = vpop.f32.mrb[18].mxu1 }
 0x46f   :  { %9809 = vst [vmem:[#allocation173_spill] sm:$0xff] %v7870_v21  ;;  %v3058_v57 = vadd.f32 %v2866_v53, %v9812_v27  ;;  %v7880_v58 = vadd.f32 %v9813_v62, %v6447_v63  ;;  %3277 = vrot.lane.b32.xlu1 %v7870_v21, %s4868_s9  ;;  %v2468_v48 = vadd.f32 %v2467_v2, %v7500_v33  ;;  %v2473_v39 = vpop.f32.mrb[243].mxu0  ;;  %v2666_v27 = vpop.f32.mrb[19].mxu1  ;;  %v9818_v2 = vld [vmem:[#allocation131_spill] sm:$0xff]  ;;  %v9881_v21 = vld [vmem:[#allocation82_spill] sm:$0xff] }
 0x470   :  { %v2661_v12 = vadd.f32 %v2660_v25, %v7504_v49  ;;  %v3153_v29 = vadd.f32 %v3057_v60, %v3055_v9  ;;  %v2470_v13 = vadd.f32 %v2469_v23, %v7514_v42  ;;  %v2663_v31 = vadd.f32 %v2662_v8, %v7518_v3  ;;  %v9817_v9 = vld [vmem:[#allocation130_spill] sm:$0xff] }
 0x471   :  { %v7888_v7 = vadd.f32 %v3152_v32, %v3151_v56  ;;  %v3154_v10 = vadd.f32 %v3058_v57, %v3056_v51  ;;  %v2871_v36 = vmul.f32 %v2468_v48, %v9815_v55  ;;  %v2472_v1 = vadd.f32 %v2471_v59, %v7500_v33  ;;  %v9819_v51 = vld [vmem:[#allocation33_spill] sm:$0xff]  ;;  %v9820_v32 = vld [vmem:[#allocation34_spill] sm:$0xff]  ;;  %v9822_v59 = vld [vmem:[#allocation35_spill] sm:$0xff] }
 0x472   :  { %v2873_v53 = vmul.f32 %v2661_v12, %v9816_v5  ;;  %v2665_v50 = vadd.f32 %v2664_v17, %v7504_v49  ;;  %v2872_v60 = vmul.f32 %v2470_v13, %v9817_v9  ;;  %v2874_v25 = vmul.f32 %v2663_v31, %v9818_v2  ;;  %v9821_v12 = vld [vmem:[#allocation132_spill] sm:$0xff]  ;;  %v9825_v9 = vld [vmem:[#allocation38_spill] sm:$0xff] }
 0x473   :  { %9814 = vst [vmem:[#allocation174_spill] sm:$0xff] %v7888_v7  ;;  %v2474_v62 = vadd.f32 %v2473_v39, %v7514_v42  ;;  %v2667_v56 = vadd.f32 %v2666_v27, %v7518_v3  ;;  %3279 = vrot.lane.b32.xlu0 %v7888_v7, %s4868_s9  ;;  %v3059_v57 = vadd.f32 %v2871_v36, %v9819_v51  ;;  %v9823_v13 = vld [vmem:[#allocation36_spill] sm:$0xff]  ;;  %v9824_v39 = vld [vmem:[#allocation37_spill] sm:$0xff] }
 0x474   :  { %v3061_v48 = vadd.f32 %v2873_v53, %v9820_v32  ;;  %v2879_v23 = vmul.f32 %v2472_v1, %v9821_v12  ;;  %v2881_v8 = vmul.f32 %v2665_v50, %v7395_v22  ;;  %v3060_v17 = vadd.f32 %v2872_v60, %v9822_v59  ;;  %v9827_v53 = vld [vmem:[#allocation212_spill] sm:$0xff]  ;;  %v9828_v22 = vld [vmem:[#allocation39_spill] sm:$0xff]  ;;  %v2670_v32 = vpop.f32.mrb[20].mxu1 }
 0x475   :  { %v3062_v55 = vadd.f32 %v2874_v25, %v9823_v13  ;;  %v2880_v31 = vmul.f32 %v2474_v62, %v7399_v34  ;;  %v2882_v5 = vmul.f32 %v2667_v56, %v7409_v15  ;;  %v7910_v7 = vadd.f32 %v3154_v10, %v3153_v29  ;;  %v9829_v60 = vld [vmem:[#allocation40_spill] sm:$0xff]  ;;  %v2477_v25 = vpop.f32.mrb[244].mxu0  ;;  %v9830_v15 = vld [vmem:[#allocation213_spill] sm:$0xff] }
 0x476   :  { %v3063_v27 = vadd.f32 %v2879_v23, %v9824_v39  ;;  %v3065_v2 = vadd.f32 %v2881_v8, %v9825_v9  ;;  %v3155_v36 = vadd.f32 %v3061_v48, %v3059_v57  ;;  %v7914_v1 = vadd.f32 %v9827_v53, %v6486_v6  ;;  %v2479_v56 = vpop.f32.mrb[245].mxu0  ;;  %v2672_v57 = vpop.f32.mrb[21].mxu1 }
 0x477   :  { %9826 = vst [vmem:[#allocation175_spill] sm:$0xff] %v7910_v7  ;;  %v3064_v50 = vadd.f32 %v2880_v31, %v9828_v22  ;;  %v3066_v51 = vadd.f32 %v2882_v5, %v9829_v60  ;;  %v3156_v34 = vadd.f32 %v3062_v55, %v3060_v17  ;;  %v7920_v62 = vadd.f32 %v9830_v15, %v6501_v0  ;;  %v2481_v8 = vpop.f32.mrb[246].mxu0  ;;  %v2674_v59 = vpop.f32.mrb[22].mxu1  ;;  %v9836_v15 = vld [vmem:[#allocation51_spill] sm:$0xff] }
 0x478   :  { %3281 = vrot.lane.b32.xlu1 %v7910_v7, %s4868_s9  ;;  %v2478_v29 = vadd.f32 %v2477_v25, %v7500_v33  ;;  %v2671_v10 = vadd.f32 %v2670_v32, %v7504_v49  ;;  %v3157_v48 = vadd.f32 %v3065_v2, %v3063_v27  ;;  %v2480_v12 = vadd.f32 %v2479_v56, %v7514_v42  ;;  %v2483_v9 = vpop.f32.mrb[247].mxu0  ;;  %v2676_v53 = vpop.f32.mrb[23].mxu1  ;;  %v9835_v32 = vld [vmem:[#allocation142_spill] sm:$0xff] }
 0x479   :  { %v2673_v23 = vadd.f32 %v2672_v57, %v7518_v3  ;;  %v7928_v17 = vadd.f32 %v3156_v34, %v3155_v36  ;;  %v3158_v13 = vadd.f32 %v3066_v51, %v3064_v50  ;;  %v2482_v5 = vadd.f32 %v2481_v8, %v7500_v33  ;;  %v9834_v51 = vld [vmem:[#allocation141_spill] sm:$0xff]  ;;  %v9839_v57 = vld [vmem:[#allocation144_spill] sm:$0xff] }
 0x47a   :  { %v2887_v55 = vmul.f32 %v2478_v29, %v7413_v47  ;;  %v2889_v31 = vmul.f32 %v2671_v10, %v7423_v19  ;;  %v2675_v39 = vadd.f32 %v2674_v59, %v7504_v49  ;;  %v2888_v27 = vmul.f32 %v2480_v12, %v7427_v38  ;;  %v9832_v47 = vld [vmem:[#allocation49_spill] sm:$0xff]  ;;  %v9833_v19 = vld [vmem:[#allocation50_spill] sm:$0xff]  ;;  %v9837_v38 = vld [vmem:[#allocation52_spill] sm:$0xff] }
 0x47b   :  { %9831 = vst [vmem:[#allocation176_spill] sm:$0xff] %v7928_v17  ;;  %v2890_v2 = vmul.f32 %v2673_v23, %v7431_v45  ;;  %v2484_v22 = vadd.f32 %v2483_v9, %v7514_v42  ;;  %v2677_v36 = vadd.f32 %v2676_v53, %v7518_v3  ;;  %3283 = vrot.lane.b32.xlu0 %v7928_v17, %s4868_s9  ;;  %v9838_v45 = vld [vmem:[#allocation143_spill] sm:$0xff]  ;;  %v9840_v23 = vld [vmem:[#allocation53_spill] sm:$0xff]  ;;  %v9841_v59 = vld [vmem:[#allocation54_spill] sm:$0xff] }
 0x47c   :  { %v3067_v50 = vadd.f32 %v2887_v55, %v9832_v47  ;;  %v3069_v60 = vadd.f32 %v2889_v31, %v9833_v19  ;;  %v2895_v25 = vmul.f32 %v2482_v5, %v9834_v51  ;;  %v2897_v34 = vmul.f32 %v2675_v39, %v9835_v32  ;;  %v9843_v31 = vld [vmem:[#allocation214_spill] sm:$0xff]  ;;  %v9844_v39 = vld [vmem:[#allocation55_spill] sm:$0xff]  ;;  %v2680_v51 = vpop.f32.mrb[24].mxu1 }
 0x47d   :  { %v3068_v29 = vadd.f32 %v2888_v27, %v9836_v15  ;;  %v3070_v10 = vadd.f32 %v2890_v2, %v9837_v38  ;;  %v2896_v56 = vmul.f32 %v2484_v22, %v9838_v45  ;;  %v2898_v12 = vmul.f32 %v2677_v36, %v9839_v57  ;;  %v9845_v27 = vld [vmem:[#allocation56_spill] sm:$0xff]  ;;  %v2487_v2 = vpop.f32.mrb[248].mxu0  ;;  %v9846_v36 = vld [vmem:[#allocation215_spill] sm:$0xff]  ;;  %v9861_v17 = vld [vmem:[#allocation66_spill] sm:$0xff] }
 0x47e   :  { %v3071_v8 = vadd.f32 %v2895_v25, %v9840_v23  ;;  %v3073_v9 = vadd.f32 %v2897_v34, %v9841_v59  ;;  %v7950_v53 = vadd.f32 %v3158_v13, %v3157_v48  ;;  %v3159_v55 = vadd.f32 %v3069_v60, %v3067_v50  ;;  %v2489_v50 = vpop.f32.mrb[249].mxu0  ;;  %v2682_v60 = vpop.f32.mrb[25].mxu1 }
 0x47f   :  { %v7954_v5 = vadd.f32 %v9843_v31, %v6442_v61  ;;  %v3072_v47 = vadd.f32 %v2896_v56, %v9844_v39  ;;  %v3074_v19 = vadd.f32 %v2898_v12, %v9845_v27  ;;  %v3160_v22 = vadd.f32 %v3070_v10, %v3068_v29  ;;  %v2491_v38 = vpop.f32.mrb[250].mxu0  ;;  %v2684_v29 = vpop.f32.mrb[26].mxu1  ;;  %v9848_v56 = vld [vmem:[#allocation145_spill] sm:$0xff]  ;;  %v9849_v12 = vld [vmem:[#allocation146_spill] sm:$0xff] }
 0x480   :  { %9842 = vst [vmem:[#allocation177_spill] sm:$0xff] %v7950_v53  ;;  %v7960_v32 = vadd.f32 %v9846_v36, %v6447_v63  ;;  %3285 = vrot.lane.b32.xlu1 %v7950_v53, %s4868_s9  ;;  %v2488_v48 = vadd.f32 %v2487_v2, %v7500_v33  ;;  %v2681_v13 = vadd.f32 %v2680_v51, %v7504_v49  ;;  %v2493_v39 = vpop.f32.mrb[251].mxu0  ;;  %v2686_v27 = vpop.f32.mrb[27].mxu1  ;;  %v9851_v2 = vld [vmem:[#allocation148_spill] sm:$0xff] }
 0x481   :  { %v3161_v25 = vadd.f32 %v3073_v9, %v3071_v8  ;;  %v2490_v34 = vadd.f32 %v2489_v50, %v7514_v42  ;;  %v2683_v15 = vadd.f32 %v2682_v60, %v7518_v3  ;;  %v7968_v10 = vadd.f32 %v3160_v22, %v3159_v55  ;;  %v9850_v8 = vld [vmem:[#allocation147_spill] sm:$0xff]  ;;  %v9853_v22 = vld [vmem:[#allocation62_spill] sm:$0xff]  ;;  %v9855_v60 = vld [vmem:[#allocation44_spill] sm:$0xff] }
 0x482   :  { %v3162_v45 = vadd.f32 %v3074_v19, %v3072_v47  ;;  %v2903_v57 = vmul.f32 %v2488_v48, %v9848_v56  ;;  %v2905_v23 = vmul.f32 %v2681_v13, %v9849_v12  ;;  %v2492_v59 = vadd.f32 %v2491_v38, %v7500_v33  ;;  %v9852_v47 = vld [vmem:[#allocation61_spill] sm:$0xff] }
 0x483   :  { %9847 = vst [vmem:[#allocation178_spill] sm:$0xff] %v7968_v10  ;;  %v2685_v31 = vadd.f32 %v2684_v29, %v7504_v49  ;;  %v2904_v9 = vmul.f32 %v2490_v34, %v9850_v8  ;;  %v2906_v51 = vmul.f32 %v2683_v15, %v9851_v2  ;;  %v2494_v36 = vadd.f32 %v2493_v39, %v7514_v42  ;;  %v9854_v13 = vld [vmem:[#allocation149_spill] sm:$0xff]  ;;  %v9856_v29 = vld [vmem:[#allocation63_spill] sm:$0xff]  ;;  %v9857_v34 = vld [vmem:[#allocation64_spill] sm:$0xff] }
 0x484   :  { %v2687_v55 = vadd.f32 %v2686_v27, %v7518_v3  ;;  %3287 = vrot.lane.b32.xlu0 %v7968_v10, %s4868_s9  ;;  %v3075_v19 = vadd.f32 %v2903_v57, %v9852_v47  ;;  %v3077_v48 = vadd.f32 %v2905_v23, %v9853_v22  ;;  %v2911_v50 = vmul.f32 %v2492_v59, %v9854_v13  ;;  %v9858_v15 = vld [vmem:[#allocation155_spill] sm:$0xff]  ;;  %v9859_v39 = vld [vmem:[#allocation156_spill] sm:$0xff]  ;;  %v9860_v27 = vld [vmem:[#allocation65_spill] sm:$0xff]  ;;  %v2690_v13 = vpop.f32.mrb[28].mxu1 }
 0x485   :  { %v2913_v38 = vmul.f32 %v2685_v31, %v9855_v60  ;;  %v3076_v56 = vadd.f32 %v2904_v9, %v9856_v29  ;;  %v3078_v12 = vadd.f32 %v2906_v51, %v9857_v34  ;;  %v2912_v8 = vmul.f32 %v2494_v36, %v9858_v15  ;;  %v9863_v23 = vld [vmem:[#allocation216_spill] sm:$0xff]  ;;  %v9864_v31 = vld [vmem:[#allocation67_spill] sm:$0xff]  ;;  %v2497_v51 = vpop.f32.mrb[252].mxu0  ;;  %v9868_v15 = vld [vmem:[#allocation157_spill] sm:$0xff] }
 0x486   :  { %v2914_v2 = vmul.f32 %v2687_v55, %v9859_v39  ;;  %v3079_v53 = vadd.f32 %v2911_v50, %v9860_v27  ;;  %v7990_v7 = vadd.f32 %v3162_v45, %v3161_v25  ;;  %v3163_v57 = vadd.f32 %v3077_v48, %v3075_v19  ;;  %v9865_v9 = vld [vmem:[#allocation68_spill] sm:$0xff]  ;;  %v9866_v55 = vld [vmem:[#allocation217_spill] sm:$0xff]  ;;  %v2499_v45 = vpop.f32.mrb[253].mxu0  ;;  %v2692_v19 = vpop.f32.mrb[29].mxu1  ;;  %v9869_v39 = vld [vmem:[#allocation158_spill] sm:$0xff] }
 0x487   :  { %v3081_v10 = vadd.f32 %v2913_v38, %v9861_v17  ;;  %v7994_v59 = vadd.f32 %v9863_v23, %v6486_v6  ;;  %v3080_v47 = vadd.f32 %v2912_v8, %v9864_v31  ;;  %v3164_v36 = vadd.f32 %v3078_v12, %v3076_v56  ;;  %v2501_v29 = vpop.f32.mrb[254].mxu0  ;;  %v2694_v56 = vpop.f32.mrb[30].mxu1 }
 0x488   :  { %9862 = vst [vmem:[#allocation179_spill] sm:$0xff] %v7990_v7  ;;  %v3082_v22 = vadd.f32 %v2914_v2, %v9865_v9  ;;  %v8000_v60 = vadd.f32 %v9866_v55, %v6501_v0  ;;  %3289 = vrot.lane.b32.xlu1 %v7990_v7, %s4868_s9  ;;  %v2498_v17 = vadd.f32 %v2497_v51, %v7500_v33  ;;  %v2503_v31 = vpop.f32.mrb[255].mxu0  ;;  %v2696_v9 = vpop.f32.mrb[31].mxu1  ;;  %v9871_v51 = vld [vmem:[#allocation160_spill] sm:$0xff] }
 0x489   :  { %v2691_v25 = vadd.f32 %v2690_v13, %v7504_v49  ;;  %v3165_v48 = vadd.f32 %v3081_v10, %v3079_v53  ;;  %v2500_v50 = vadd.f32 %v2499_v45, %v7514_v42  ;;  %v2693_v38 = vadd.f32 %v2692_v19, %v7518_v3  ;;  %v9870_v53 = vld [vmem:[#allocation159_spill] sm:$0xff]  ;;  %v9875_v19 = vld [vmem:[#allocation162_spill] sm:$0xff] }
 0x48a   :  { %v8008_v34 = vadd.f32 %v3164_v36, %v3163_v57  ;;  %v3166_v12 = vadd.f32 %v3082_v22, %v3080_v47  ;;  %v2919_v8 = vmul.f32 %v2498_v17, %v9868_v15  ;;  %v2502_v27 = vadd.f32 %v2501_v29, %v7500_v33  ;;  %v9872_v47 = vld [vmem:[#allocation77_spill] sm:$0xff]  ;;  %v9873_v36 = vld [vmem:[#allocation78_spill] sm:$0xff] }
 0x48b   :  { %v2921_v2 = vmul.f32 %v2691_v25, %v9869_v39  ;;  %v2695_v23 = vadd.f32 %v2694_v56, %v7504_v49  ;;  %v2920_v10 = vmul.f32 %v2500_v50, %v9870_v53  ;;  %v2922_v13 = vmul.f32 %v2693_v38, %v9871_v51  ;;  %v9874_v25 = vld [vmem:[#allocation161_spill] sm:$0xff]  ;;  %v9876_v56 = vld [vmem:[#allocation79_spill] sm:$0xff]  ;;  %v9877_v50 = vld [vmem:[#allocation80_spill] sm:$0xff] }
 0x48c   :  { %9867 = vst [vmem:[#allocation180_spill] sm:$0xff] %v8008_v34  ;;  %v2504_v55 = vadd.f32 %v2503_v31, %v7514_v42  ;;  %v2697_v57 = vadd.f32 %v2696_v9, %v7518_v3  ;;  %3291 = vrot.lane.b32.xlu0 %v8008_v34, %s4868_s9  ;;  %v3083_v22 = vadd.f32 %v2919_v8, %v9872_v47  ;;  %v9878_v38 = vld [vmem:[#allocation163_spill] sm:$0xff]  ;;  %v9879_v31 = vld [vmem:[#allocation164_spill] sm:$0xff]  ;;  %v9880_v9 = vld [vmem:[#allocation81_spill] sm:$0xff] }
 0x48d   :  { %v3085_v17 = vadd.f32 %v2921_v2, %v9873_v36  ;;  %v2927_v45 = vmul.f32 %v2502_v27, %v9874_v25  ;;  %v2929_v29 = vmul.f32 %v2695_v23, %v9875_v19  ;;  %v3084_v15 = vadd.f32 %v2920_v10, %v9876_v56  ;;  %v9882_v2 = vld [vmem:[#allocation218_spill] sm:$0xff]  ;;  %v9883_v23 = vld [vmem:[#allocation83_spill] sm:$0xff]  ;;  %v9884_v10 = vld [vmem:[#allocation84_spill] sm:$0xff]  ;;  %v2700_v25 = vpop.f32.mrb[32].mxu1 }
 0x48e   :  { %v3086_v39 = vadd.f32 %v2922_v13, %v9877_v50  ;;  %v2928_v53 = vmul.f32 %v2504_v55, %v9878_v38  ;;  %v2930_v51 = vmul.f32 %v2697_v57, %v9879_v31  ;;  %v8030_v46 = vadd.f32 %v3166_v12, %v3165_v48  ;;  %v2507_v13 = vpop.f32.mrb[0].mxu0  ;;  %v9885_v57 = vld [vmem:[#allocation219_spill] sm:$0xff]  ;;  %v9886_v38 = vld [vmem:[#allocation165_spill] sm:$0xff] }
 0x48f   :  { %v3087_v7 = vadd.f32 %v2927_v45, %v9880_v9  ;;  %v3089_v34 = vadd.f32 %v2929_v29, %v9881_v21  ;;  %v3167_v8 = vadd.f32 %v3085_v17, %v3083_v22  ;;  %v8034_v27 = vadd.f32 %v9882_v2, %v6442_v61  ;;  %v2509_v12 = vpop.f32.mrb[1].mxu0  ;;  %v2702_v22 = vpop.f32.mrb[33].mxu1 }
 0x490   :  { %v3088_v47 = vadd.f32 %v2928_v53, %v9883_v23  ;;  %v3090_v36 = vadd.f32 %v2930_v51, %v9884_v10  ;;  %v3168_v55 = vadd.f32 %v3086_v39, %v3084_v15  ;;  %v8040_v19 = vadd.f32 %v9885_v57, %v6447_v63  ;;  %3293 = vrot.lane.b32.xlu1 %v8030_v46, %s4868_s9  ;;  %v2511_v56 = vpop.f32.mrb[2].mxu0  ;;  %v2704_v15 = vpop.f32.mrb[34].mxu1  ;;  %v9888_v10 = vld [vmem:[#allocation45_spill] sm:$0xff] }
 0x491   :  { %v2508_v21 = vadd.f32 %v2507_v13, %v7500_v33  ;;  %v2701_v48 = vadd.f32 %v2700_v25, %v7504_v49  ;;  %v3169_v17 = vadd.f32 %v3089_v34, %v3087_v7  ;;  %v2510_v45 = vadd.f32 %v2509_v12, %v7514_v42  ;;  %v2513_v2 = vpop.f32.mrb[3].mxu0  ;;  %v2706_v23 = vpop.f32.mrb[35].mxu1  ;;  %v9887_v7 = vld [vmem:[#allocation166_spill] sm:$0xff] }
 0x492   :  { %v2703_v29 = vadd.f32 %v2702_v22, %v7518_v3  ;;  %v8048_v50 = vadd.f32 %v3168_v55, %v3167_v8  ;;  %v3170_v39 = vadd.f32 %v3090_v36, %v3088_v47  ;;  %v2512_v51 = vadd.f32 %v2511_v56, %v7500_v33  ;;  %v9889_v47 = vld [vmem:[#allocation93_spill] sm:$0xff]  ;;  %v9892_v22 = vld [vmem:[#allocation96_spill] sm:$0xff] }
 0x493   :  { %v2935_v53 = vmul.f32 %v2508_v21, %v9886_v38  ;;  %v2937_v31 = vmul.f32 %v2701_v48, %v7590_v41  ;;  %v2705_v9 = vadd.f32 %v2704_v15, %v7504_v49  ;;  %v2936_v34 = vmul.f32 %v2510_v45, %v9887_v7  ;;  %v9890_v41 = vld [vmem:[#allocation94_spill] sm:$0xff]  ;;  %v9891_v48 = vld [vmem:[#allocation95_spill] sm:$0xff]  ;;  %v9893_v15 = vld [vmem:[#allocation97_spill] sm:$0xff] }
 0x494   :  { %v2938_v13 = vmul.f32 %v2703_v29, %v9888_v10  ;;  %v2514_v25 = vadd.f32 %v2513_v2, %v7514_v42  ;;  %v2707_v8 = vadd.f32 %v2706_v23, %v7518_v3  ;;  %3295 = vrot.lane.b32.xlu0 %v8048_v50, %s4868_s9  ;;  %v2943_v57 = vmul.f32 %v2512_v51, %v7634_v40  ;;  %v9894_v2 = vld [vmem:[#allocation98_spill] sm:$0xff]  ;;  %v2517_v10 = vpop.f32.mrb[4].mxu0 }
 0x495   :  { %v3091_v36 = vadd.f32 %v2935_v53, %v9889_v47  ;;  %v3093_v55 = vadd.f32 %v2937_v31, %v9890_v41  ;;  %v2945_v21 = vmul.f32 %v2705_v9, %v7640_v20  ;;  %v3092_v12 = vadd.f32 %v2936_v34, %v9891_v48  ;;  %v9895_v31 = vld [vmem:[#allocation220_spill] sm:$0xff]  ;;  %v9896_v20 = vld [vmem:[#allocation99_spill] sm:$0xff] }
 0x496   :  { %v3094_v45 = vadd.f32 %v2938_v13, %v9892_v22  ;;  %v2944_v29 = vmul.f32 %v2514_v25, %v7674_v24  ;;  %v2946_v56 = vmul.f32 %v2707_v8, %v7680_v52  ;;  %v3095_v38 = vadd.f32 %v2943_v57, %v9893_v15  ;;  %v9897_v9 = vld [vmem:[#allocation100_spill] sm:$0xff]  ;;  %v2710_v13 = vpop.f32.mrb[36].mxu1  ;;  %v9898_v52 = vld [vmem:[#allocation221_spill] sm:$0xff]  ;;  %v2519_v8 = vpop.f32.mrb[5].mxu0 }
 0x497   :  { %v3097_v23 = vadd.f32 %v2945_v21, %v9894_v2  ;;  %v8070_v7 = vadd.f32 %v3170_v39, %v3169_v17  ;;  %v3171_v53 = vadd.f32 %v3093_v55, %v3091_v36  ;;  %v8074_v40 = vadd.f32 %v9895_v31, %v6486_v6  ;;  %v2712_v47 = vpop.f32.mrb[37].mxu1  ;;  %v2521_v57 = vpop.f32.mrb[6].mxu0 }
 0x498   :  { %v3096_v51 = vadd.f32 %v2944_v29, %v9896_v20  ;;  %v3098_v34 = vadd.f32 %v2946_v56, %v9897_v9  ;;  %v3172_v24 = vadd.f32 %v3094_v45, %v3092_v12  ;;  %v8080_v25 = vadd.f32 %v9898_v52, %v6501_v0  ;;  %v2714_v21 = vpop.f32.mrb[38].mxu1  ;;  %v2523_v15 = vpop.f32.mrb[7].mxu0 }
 0x499   :  { %3297 = vrot.lane.b32.xlu1 %v8070_v7, %s4868_s9  ;;  %v2518_v17 = vadd.f32 %v2517_v10, %v7500_v33  ;;  %v2711_v39 = vadd.f32 %v2710_v13, %v7504_v49  ;;  %v3173_v36 = vadd.f32 %v3097_v23, %v3095_v38  ;;  %v2520_v41 = vadd.f32 %v2519_v8, %v7514_v42  ;;  %v2716_v2 = vpop.f32.mrb[39].mxu1  ;;  %v9901_v10 = vld [vmem:[#allocation111_spill] sm:$0xff]  ;;  %v9904_v8 = vld [vmem:[#allocation116_spill] sm:$0xff] }
 0x49a   :  { %v2713_v55 = vadd.f32 %v2712_v47, %v7518_v3  ;;  %v8088_v48 = vadd.f32 %v3172_v24, %v3171_v53  ;;  %v3174_v12 = vadd.f32 %v3098_v34, %v3096_v51  ;;  %v2522_v29 = vadd.f32 %v2521_v57, %v7500_v33  ;;  %v9905_v57 = vld [vmem:[#allocation222_spill] sm:$0xff] }
 0x49b   :  { %v2951_v22 = vmul.f32 %v2518_v17, %v7714_v18  ;;  %v2953_v45 = vmul.f32 %v2711_v39, %v7720_v16  ;;  %v2715_v56 = vadd.f32 %v2714_v21, %v7504_v49  ;;  %v2952_v38 = vmul.f32 %v2520_v41, %v7754_v37  ;;  %v9899_v18 = vld [vmem:[#allocation109_spill] sm:$0xff]  ;;  %v9900_v16 = vld [vmem:[#allocation110_spill] sm:$0xff]  ;;  %v9902_v37 = vld [vmem:[#allocation112_spill] sm:$0xff] }
 0x49c   :  { %v2954_v23 = vmul.f32 %v2713_v55, %v7760_v30  ;;  %v2524_v31 = vadd.f32 %v2523_v15, %v7514_v42  ;;  %v2717_v53 = vadd.f32 %v2716_v2, %v7518_v3  ;;  %3299 = vrot.lane.b32.xlu0 %v8088_v48, %s4868_s9  ;;  %v2959_v9 = vmul.f32 %v2522_v29, %v7794_v54  ;;  %v9903_v17 = vld [vmem:[#allocation115_spill] sm:$0xff]  ;;  %v2527_v29 = vpop.f32.mrb[8].mxu0 }
 0x49d   :  { %v3099_v20 = vadd.f32 %v2951_v22, %v9899_v18  ;;  %v3101_v51 = vadd.f32 %v2953_v45, %v9900_v16  ;;  %v2961_v34 = vmul.f32 %v2715_v56, %v7800_v28  ;;  %v3100_v13 = vadd.f32 %v2952_v38, %v9901_v10  ;;  %v9906_v28 = vld [vmem:[#allocation119_spill] sm:$0xff]  ;;  %v9907_v22 = vld [vmem:[#allocation120_spill] sm:$0xff]  ;;  %v2720_v56 = vpop.f32.mrb[40].mxu1 }
 0x49e   :  { %v3102_v24 = vadd.f32 %v2954_v23, %v9902_v37  ;;  %v2960_v30 = vmul.f32 %v2524_v31, %v7834_v43  ;;  %v2962_v52 = vmul.f32 %v2717_v53, %v7840_v35  ;;  %v3103_v39 = vadd.f32 %v2959_v9, %v9903_v17  ;;  %v9908_v35 = vld [vmem:[#allocation223_spill] sm:$0xff]  ;;  %v2722_v2 = vpop.f32.mrb[41].mxu1 }
 0x49f   :  { %v3105_v47 = vadd.f32 %v2961_v34, %v9904_v8  ;;  %v8110_v41 = vadd.f32 %v3174_v12, %v3173_v36  ;;  %v3175_v55 = vadd.f32 %v3101_v51, %v3099_v20  ;;  %v8114_v54 = vadd.f32 %v9905_v57, %v6442_v61  ;;  %v2529_v61 = vpop.f32.mrb[9].mxu0  ;;  %v2724_v18 = vpop.f32.mrb[42].mxu1 }
 0x4a0   :  { %v3104_v21 = vadd.f32 %v2960_v30, %v9906_v28  ;;  %v3106_v45 = vadd.f32 %v2962_v52, %v9907_v22  ;;  %v3176_v43 = vadd.f32 %v3102_v24, %v3100_v13  ;;  %v8120_v15 = vadd.f32 %v9908_v35, %v6447_v63  ;;  %v2531_v53 = vpop.f32.mrb[10].mxu0  ;;  %v2726_v13 = vpop.f32.mrb[43].mxu1  ;;  %v9913_v22 = vld [vmem:[#allocation137_spill] sm:$0xff] }
 0x4a1   :  { %3301 = vrot.lane.b32.xlu1 %v8110_v41, %s4868_s9  ;;  %v2528_v36 = vadd.f32 %v2527_v29, %v7500_v33  ;;  %v2721_v12 = vadd.f32 %v2720_v56, %v7504_v49  ;;  %v3177_v38 = vadd.f32 %v3105_v47, %v3103_v39  ;;  %v2530_v23 = vadd.f32 %v2529_v61, %v7514_v42  ;;  %v2533_v10 = vpop.f32.mrb[11].mxu0  ;;  %v9914_v29 = vld [vmem:[#allocation138_spill] sm:$0xff]  ;;  %v9917_v61 = vld [vmem:[#allocation140_spill] sm:$0xff] }
 0x4a2   :  { %v2723_v31 = vadd.f32 %v2722_v2, %v7518_v3  ;;  %v8128_v20 = vadd.f32 %v3176_v43, %v3175_v55  ;;  %v3178_v63 = vadd.f32 %v3106_v45, %v3104_v21  ;;  %v2532_v9 = vadd.f32 %v2531_v53, %v7500_v33  ;;  %v9911_v55 = vld [vmem:[#allocation135_spill] sm:$0xff] }
 0x4a3   :  { %v2967_v16 = vmul.f32 %v2528_v36, %v7874_v14  ;;  %v2969_v51 = vmul.f32 %v2721_v12, %v7880_v58  ;;  %v2725_v34 = vadd.f32 %v2724_v18, %v7504_v49  ;;  %v2968_v37 = vmul.f32 %v2530_v23, %v7914_v1  ;;  %v9909_v14 = vld [vmem:[#allocation133_spill] sm:$0xff]  ;;  %v9910_v58 = vld [vmem:[#allocation134_spill] sm:$0xff]  ;;  %v9912_v1 = vld [vmem:[#allocation136_spill] sm:$0xff]  ;;  %v2537_v23 = vpop.f32.mrb[12].mxu0 }
 0x4a4   :  { %v2970_v24 = vmul.f32 %v2723_v31, %v7920_v62  ;;  %v2534_v30 = vadd.f32 %v2533_v10, %v7514_v42  ;;  %v2727_v52 = vadd.f32 %v2726_v13, %v7518_v3  ;;  %3303 = vrot.lane.b32.xlu0 %v8128_v20, %s4868_s9  ;;  %v2975_v8 = vmul.f32 %v2532_v9, %v7954_v5  ;;  %v9915_v36 = vld [vmem:[#allocation224_spill] sm:$0xff]  ;;  %v9916_v12 = vld [vmem:[#allocation139_spill] sm:$0xff]  ;;  %v2730_v31 = vpop.f32.mrb[44].mxu1 }
 0x4a5   :  { %v3107_v17 = vadd.f32 %v2967_v16, %v9909_v14  ;;  %v3109_v39 = vadd.f32 %v2969_v51, %v9910_v58  ;;  %v2977_v47 = vmul.f32 %v2725_v34, %v7960_v32  ;;  %v3108_v57 = vadd.f32 %v2968_v37, %v9911_v55  ;;  %v2732_v16 = vpop.f32.mrb[45].mxu1 }
 0x4a6   :  { %v3110_v28 = vadd.f32 %v2970_v24, %v9912_v1  ;;  %v2976_v62 = vmul.f32 %v2534_v30, %v7994_v59  ;;  %v2978_v21 = vmul.f32 %v2727_v52, %v8000_v60  ;;  %v3111_v45 = vadd.f32 %v2975_v8, %v9913_v22  ;;  %v9918_v59 = vld [vmem:[#allocation225_spill] sm:$0xff]  ;;  %v2734_v10 = vpop.f32.mrb[46].mxu1  ;;  %v9921_v1 = vld [vmem:[#allocation152_spill] sm:$0xff]  ;;  %v9923_v22 = vld [vmem:[#allocation42_spill] sm:$0xff] }
 0x4a7   :  { %v3113_v56 = vadd.f32 %v2977_v47, %v9914_v29  ;;  %v8150_v43 = vadd.f32 %v3178_v63, %v3177_v38  ;;  %v3179_v35 = vadd.f32 %v3109_v39, %v3107_v17  ;;  %v1236_v5 = vadd.f32 %v9915_v36, %v6486_v6  ;;  %v2539_v63 = vpop.f32.mrb[13].mxu0  ;;  %v2736_v17 = vpop.f32.mrb[47].mxu1 }
 0x4a8   :  { %v3112_v32 = vadd.f32 %v2976_v62, %v9916_v12  ;;  %v3114_v2 = vadd.f32 %v2978_v21, %v9917_v61  ;;  %v3180_v53 = vadd.f32 %v3110_v28, %v3108_v57  ;;  %v1429_v60 = vadd.f32 %v9918_v59, %v6501_v0  ;;  %v2541_v34 = vpop.f32.mrb[14].mxu0  ;;  %v9926_v12 = vld [vmem:[#allocation154_spill] sm:$0xff] }
 0x4a9   :  { %3305 = vrot.lane.b32.xlu1 %v8150_v43, %s4868_s9  ;;  %v2538_v38 = vadd.f32 %v2537_v23, %v7500_v33  ;;  %v2731_v18 = vadd.f32 %v2730_v31, %v7504_v49  ;;  %v3181_v6 = vadd.f32 %v3113_v56, %v3111_v45  ;;  %v2540_v51 = vadd.f32 %v2539_v63, %v7514_v42  ;;  %v2543_v14 = vpop.f32.mrb[15].mxu0  ;;  %v9924_v45 = vld [vmem:[#allocation153_spill] sm:$0xff] }
 0x4aa   :  { %v2733_v9 = vadd.f32 %v2732_v16, %v7518_v3  ;;  %v8164_v13 = vadd.f32 %v3180_v53, %v3179_v35  ;;  %v3182_v37 = vadd.f32 %v3114_v2, %v3112_v32  ;;  %v2542_v30 = vadd.f32 %v2541_v34, %v7500_v33  ;;  %v9925_v35 = vld [vmem:[#allocation46_spill] sm:$0xff]  ;;  %v9927_v32 = vld [vmem:[#allocation43_spill] sm:$0xff] }
 0x4ab   :  { %v2983_v0 = vmul.f32 %v2538_v38, %v8034_v27  ;;  %v2985_v24 = vmul.f32 %v2731_v18, %v8040_v19  ;;  %v2735_v52 = vadd.f32 %v2734_v10, %v7504_v49  ;;  %v2984_v58 = vmul.f32 %v2540_v51, %v8074_v40  ;;  %v9919_v27 = vld [vmem:[#allocation150_spill] sm:$0xff]  ;;  %v9920_v19 = vld [vmem:[#allocation151_spill] sm:$0xff]  ;;  %v9922_v40 = vld [vmem:[#allocation41_spill] sm:$0xff] }
 0x4ac   :  { %v2986_v39 = vmul.f32 %v2733_v9, %v8080_v25  ;;  %v2544_v8 = vadd.f32 %v2543_v14, %v7514_v42  ;;  %v2737_v47 = vadd.f32 %v2736_v17, %v7518_v3  ;;  %3307 = vrot.lane.b32.xlu0 %v8164_v13, %s4868_s9  ;;  %v2991_v33 = vmul.f32 %v2542_v30, %v8114_v54  ;;  %v3252_v42 = vpop.permute.xlu0 %3251  ;;  %v9928_v51 = vld [vmem:[#allocation47_spill] sm:$0xff]  ;;  %v9931_v30 = vld [vmem:[#allocation168_spill] sm:$0xff]  ;;  %v9932_v17 = vld [vmem:[#allocation169_spill] sm:$0xff] }
 0x4ad   :  { %v3115_v55 = vadd.f32 %v2983_v0, %v9919_v27  ;;  %v3117_v57 = vadd.f32 %v2985_v24, %v9920_v19  ;;  %v2993_v49 = vmul.f32 %v2735_v52, %v8120_v15  ;;  %v3116_v28 = vadd.f32 %v2984_v58, %v9921_v1 }
 0x4ae   :  { %v3118_v62 = vadd.f32 %v2986_v39, %v9922_v40  ;;  %v2992_v25 = vmul.f32 %v2544_v8, %v1236_v5  ;;  %v2994_v21 = vmul.f32 %v2737_v47, %v1429_v60  ;;  %v3119_v3 = vadd.f32 %v2991_v33, %v9923_v22  ;;  %v9933_v8 = vld [vmem:[#allocation170_spill] sm:$0xff]  ;;  %v9935_v33 = vld [vmem:[#allocation172_spill] sm:$0xff]  ;;  %v9938_v22 = vld [vmem:[#allocation175_spill] sm:$0xff] }
 0x4af   :  { %v3121_v29 = vadd.f32 %v2993_v49, %v9924_v45  ;;  %v8184_v56 = vadd.f32 %v3182_v37, %v3181_v6  ;;  %v8187_v36 = vadd.f32 %v3252_v42, %v9925_v35  ;;  %v3183_v61 = vadd.f32 %v3117_v57, %v3115_v55  ;;  %v9934_v55 = vld [vmem:[#allocation171_spill] sm:$0xff] }
 0x4b0   :  { %v3120_v54 = vadd.f32 %v2992_v25, %v9926_v12  ;;  %v3122_v15 = vadd.f32 %v2994_v21, %v9927_v32  ;;  %v3184_v2 = vadd.f32 %v3118_v62, %v3116_v28  ;;  %v3254_v53 = vpop.permute.xlu0 %3253  ;;  %v9936_v28 = vld [vmem:[#allocation173_spill] sm:$0xff]  ;;  %v9937_v25 = vld [vmem:[#allocation174_spill] sm:$0xff] }
 0x4b1   :  { %3309 = vrot.lane.b32.xlu1 %v8184_v56, %s4868_s9  ;;  %3411 = vrot.lane.b32.xlu0 %v8187_v36, %s4869_s16  ;;  %v3185_v5 = vadd.f32 %v3121_v29, %v3119_v3  ;;  %v8198_v59 = vadd.f32 %v3254_v53, %v7630_v4  ;;  %v9939_v29 = vld [vmem:[#allocation176_spill] sm:$0xff] }
 0x4b2   :  { %v8195_v23 = vadd.f32 %v3184_v2, %v3183_v61  ;;  %v3186_v31 = vadd.f32 %v3122_v15, %v3120_v54  ;;  %v9940_v54 = vld [vmem:[#allocation177_spill] sm:$0xff]  ;;  %v9941_v61 = vld [vmem:[#allocation178_spill] sm:$0xff] }
 0x4b3   :  { %v3256_v38 = vpop.permute.xlu1 %3255 }
 0x4b4   :  { %v8200_v60 = vadd.f32 %v3186_v31, %v3185_v5  ;;  %v8207_v18 = vadd.f32 %v3256_v38, %v7648_v26  ;;  %v9942_v31 = vld [vmem:[#allocation179_spill] sm:$0xff] }
 0x4b5   :  { %3311 = vrot.lane.b32.xlu0 %v8195_v23, %s4868_s9  ;;  %3413 = vrot.lane.b32.xlu1 %v8198_v59, %s4869_s16 }
 0x4b8   :  { %v3258_v4 = vpop.permute.xlu1 %3257 }
 0x4b9   :  { %3415 = vrot.lane.b32.xlu0 %v8207_v18, %s4869_s16  ;;  %3313 = vrot.lane.b32.xlu1 %v8200_v60, %s4868_s9  ;;  %v8214_v63 = vadd.f32 %v3258_v4, %v7670_v44  ;;  %v9929_v44 = vld [vmem:[#allocation48_spill] sm:$0xff] }
 0x4ba   :  { %v9943_v4 = vld [vmem:[#allocation180_spill] sm:$0xff] }
 0x4bb   :  { %v3260_v16 = vpop.permute.xlu0 %3259 }
 0x4bc   :  { %v8219_v6 = vadd.f32 %v3260_v16, %v7688_v11  ;;  %v9930_v11 = vld [vmem:[#allocation167_spill] sm:$0xff] }
 0x4bd   :  { %3417 = vrot.lane.b32.xlu1 %v8214_v63, %s4869_s16 }
 0x4be   :  { %3419 = vrot.lane.b32.xlu0 %v8219_v6, %s4869_s16 }
 0x4c0   :  { %v3262_v26 = vpop.permute.xlu1 %3261 }
 0x4c1   :  { %v8224_v9 = vadd.f32 %v3262_v26, %v9928_v51 }
 0x4c3   :  { %3421 = vrot.lane.b32.xlu1 %v8224_v9, %s4869_s16 }
 0x4c4   :  { %v3264_v34 = vpop.permute.xlu0 %3263 }
 0x4c5   :  { %v8229_v10 = vadd.f32 %v3264_v34, %v9929_v44 }
 0x4c7   :  { %3423 = vrot.lane.b32.xlu0 %v8229_v10, %s4869_s16 }
 0x4c8   :  { %v3266_v37 = vpop.permute.xlu1 %3265 }
 0x4c9   :  { %v8234_v0 = vadd.f32 %v3266_v37, %v9930_v11 }
 0x4cb   :  { %3425 = vrot.lane.b32.xlu1 %v8234_v0, %s4869_s16 }
 0x4cc   :  { %v3268_v24 = vpop.permute.xlu0 %3267 }
 0x4cd   :  { %v8239_v52 = vadd.f32 %v3268_v24, %v9931_v30 }
 0x4cf   :  { %3427 = vrot.lane.b32.xlu0 %v8239_v52, %s4869_s16 }
 0x4d1   :  { %v3270_v14 = vpop.permute.xlu1 %3269 }
 0x4d2   :  { %v8244_v58 = vadd.f32 %v3270_v14, %v9932_v17 }
 0x4d4   :  { %3429 = vrot.lane.b32.xlu1 %v8244_v58, %s4869_s16  ;;  %v3272_v39 = vpop.permute.xlu0 %3271 }
 0x4d5   :  { %v8249_v47 = vadd.f32 %v3272_v39, %v9933_v8 }
 0x4d7   :  { %3431 = vrot.lane.b32.xlu0 %v8249_v47, %s4869_s16 }
 0x4d9   :  { %v3274_v27 = vpop.permute.xlu1 %3273 }
 0x4da   :  { %v8254_v19 = vadd.f32 %v3274_v27, %v9934_v55 }
 0x4dc   :  { %3433 = vrot.lane.b32.xlu1 %v8254_v19, %s4869_s16 }
 0x4dd   :  { %v3276_v57 = vpop.permute.xlu0 %3275 }
 0x4de   :  { %v8259_v49 = vadd.f32 %v3276_v57, %v9935_v33 }
 0x4e0   :  { %3435 = vrot.lane.b32.xlu0 %v8259_v49, %s4869_s16 }
 0x4e1   :  { %v3278_v1 = vpop.permute.xlu1 %3277 }
 0x4e2   :  { %v8264_v40 = vadd.f32 %v3278_v1, %v9936_v28 }
 0x4e4   :  { %3437 = vrot.lane.b32.xlu1 %v8264_v40, %s4869_s16 }
 0x4e5   :  { %v3280_v62 = vpop.permute.xlu0 %3279 }
 0x4e6   :  { %v8269_v21 = vadd.f32 %v3280_v62, %v9937_v25 }
 0x4e8   :  { %3439 = vrot.lane.b32.xlu0 %v8269_v21, %s4869_s16 }
 0x4ea   :  { %v3282_v42 = vpop.permute.xlu1 %3281 }
 0x4eb   :  { %v8274_v3 = vadd.f32 %v3282_v42, %v9938_v22 }
 0x4ed   :  { %3441 = vrot.lane.b32.xlu1 %v8274_v3, %s4869_s16  ;;  %v3284_v45 = vpop.permute.xlu0 %3283 }
 0x4ee   :  { %v8279_v35 = vadd.f32 %v3284_v45, %v9939_v29 }
 0x4f0   :  { %3443 = vrot.lane.b32.xlu0 %v8279_v35, %s4869_s16 }
 0x4f2   :  { %v3286_v12 = vpop.permute.xlu1 %3285 }
 0x4f3   :  { %v8284_v32 = vadd.f32 %v3286_v12, %v9940_v54 }
 0x4f5   :  { %3445 = vrot.lane.b32.xlu1 %v8284_v32, %s4869_s16 }
 0x4f6   :  { %v3288_v15 = vpop.permute.xlu0 %3287 }
 0x4f7   :  { %v8289_v2 = vadd.f32 %v3288_v15, %v9941_v61 }
 0x4f9   :  { %3447 = vrot.lane.b32.xlu0 %v8289_v2, %s4869_s16 }
 0x4fa   :  { %v3290_v5 = vpop.permute.xlu1 %3289 }
 0x4fb   :  { %v8294_v53 = vadd.f32 %v3290_v5, %v9942_v31 }
 0x4fd   :  { %3449 = vrot.lane.b32.xlu1 %v8294_v53, %s4869_s16 }
 0x4fe   :  { %v3292_v38 = vpop.permute.xlu0 %3291 }
 0x4ff   :  { %v8299_v16 = vadd.f32 %v3292_v38, %v9943_v4 }
 0x501   :  { %3451 = vrot.lane.b32.xlu0 %v8299_v16, %s4869_s16 }
 0x502   :  { %v3294_v26 = vpop.permute.xlu1 %3293 }
 0x503   :  { %v8304_v51 = vadd.f32 %v3294_v26, %v8030_v46 }
 0x505   :  { %3453 = vrot.lane.b32.xlu1 %v8304_v51, %s4869_s16 }
 0x506   :  { %v3296_v34 = vpop.permute.xlu0 %3295 }
 0x507   :  { %v8309_v44 = vadd.f32 %v3296_v34, %v8048_v50 }
 0x509   :  { %3455 = vrot.lane.b32.xlu0 %v8309_v44, %s4869_s16 }
 0x50b   :  { %v3298_v37 = vpop.permute.xlu1 %3297 }
 0x50c   :  { %v8314_v11 = vadd.f32 %v3298_v37, %v8070_v7 }
 0x50e   :  { %3457 = vrot.lane.b32.xlu1 %v8314_v11, %s4869_s16  ;;  %v3300_v24 = vpop.permute.xlu0 %3299 }
 0x50f   :  { %v8319_v46 = vadd.f32 %v3300_v24, %v8088_v48 }
 0x511   :  { %3459 = vrot.lane.b32.xlu0 %v8319_v46, %s4869_s16 }
 0x513   :  { %v3302_v30 = vpop.permute.xlu1 %3301 }
 0x514   :  { %v8324_v50 = vadd.f32 %v3302_v30, %v8110_v41 }
 0x516   :  { %3461 = vrot.lane.b32.xlu1 %v8324_v50, %s4869_s16  ;;  %v3304_v14 = vpop.permute.xlu0 %3303 }
 0x517   :  { %v8329_v7 = vadd.f32 %v3304_v14, %v8128_v20 }
 0x519   :  { %3463 = vrot.lane.b32.xlu0 %v8329_v7, %s4869_s16 }
 0x51b   :  { %v3306_v17 = vpop.permute.xlu1 %3305 }
 0x51c   :  { %v8334_v48 = vadd.f32 %v3306_v17, %v8150_v43 }
 0x51e   :  { %3465 = vrot.lane.b32.xlu1 %v8334_v48, %s4869_s16  ;;  %v3308_v39 = vpop.permute.xlu0 %3307 }
 0x51f   :  { %v8339_v41 = vadd.f32 %v3308_v39, %v8164_v13 }
 0x521   :  { %3467 = vrot.lane.b32.xlu0 %v8339_v41, %s4869_s16 }
 0x523   :  { %v3310_v8 = vpop.permute.xlu1 %3309  ;;  %v3412_v27 = vpop.permute.xlu0 %3411 }
 0x524   :  { %v8344_v20 = vadd.f32 %v3310_v8, %v8184_v56  ;;  %v8349_v43 = vadd.f32 %v3412_v27, %v8187_v36 }
 0x526   :  { %3469 = vrot.lane.b32.xlu1 %v8344_v20, %s4869_s16  ;;  %v3539_v55 = vsel %vm215_vm0, %v8349_v43, 0.0 }
 0x527   :  { %v3414_v13 = vpop.permute.xlu1 %3413  ;;  %v3312_v56 = vpop.permute.xlu0 %3311 }
 0x528   :  { %v8354_v57 = vadd.f32 %v3414_v13, %v8198_v59  ;;  %v8359_v1 = vadd.f32 %v3312_v56, %v8195_v23 }
 0x52a   :  { %v3542_v33 = vsel %vm215_vm0, %v8354_v57, 0.0 }
 0x52b   :  { %v3314_v28 = vpop.permute.xlu1 %3313  ;;  %v3416_v59 = vpop.permute.xlu0 %3415 }
 0x52c   :  { %v8364_v36 = vadd.f32 %v3314_v28, %v8200_v60  ;;  %v8369_v62 = vadd.f32 %v3416_v59, %v8207_v18 }
 0x52e   :  { %v3545_v23 = vsel %vm215_vm0, %v8369_v62, 0.0 }
 0x52f   :  { %v3418_v25 = vpop.permute.xlu1 %3417 }
 0x530   :  { %v8372_v42 = vadd.f32 %v3418_v25, %v8214_v63  ;;  %v3420_v45 = vpop.permute.xlu0 %3419 }
 0x531   :  { %v8382_v18 = vadd.f32 %v3420_v45, %v8219_v6 }
 0x532   :  { %v3548_v29 = vsel %vm215_vm0, %v8372_v42, 0.0 }
 0x533   :  { %v3551_v5 = vsel %vm215_vm0, %v8382_v18, 0.0 }
 0x535   :  { %v3422_v22 = vpop.permute.xlu1 %3421 }
 0x536   :  { %v8377_v60 = vadd.f32 %v3422_v22, %v8224_v9 }
 0x538   :  { %v3554_v15 = vsel %vm215_vm0, %v8377_v60, 0.0 }
 0x539   :  { %v3424_v54 = vpop.permute.xlu0 %3423 }
 0x53a   :  { %v8390_v9 = vadd.f32 %v3424_v54, %v8229_v10 }
 0x53c   :  { %v3557_v10 = vsel %vm215_vm0, %v8390_v9, 0.0 }
 0x53d   :  { %v3426_v12 = vpop.permute.xlu1 %3425 }
 0x53e   :  { %v8385_v63 = vadd.f32 %v3426_v12, %v8234_v0 }
 0x540   :  { %3540 = vadd.xlane.f32.xlu0 %v3539_v55  ;;  %v3560_v0 = vsel %vm215_vm0, %v8385_v63, 0.0 }
 0x541   :  { %v3428_v31 = vpop.permute.xlu0 %3427 }
 0x542   :  { %v8400_v4 = vadd.f32 %v3428_v31, %v8239_v52 }
 0x544   :  { %v3563_v52 = vsel %vm215_vm0, %v8400_v4, 0.0 }
 0x546   :  { %v3430_v61 = vpop.permute.xlu1 %3429 }
 0x547   :  { %v8395_v6 = vadd.f32 %v3430_v61, %v8244_v58 }
 0x549   :  { %v3432_v26 = vpop.permute.xlu0 %3431  ;;  %v3566_v58 = vsel %vm215_vm0, %v8395_v6, 0.0 }
 0x54a   :  { %3543 = vadd.xlane.f32.xlu1 %v3542_v33  ;;  %v8410_v24 = vadd.f32 %v3432_v26, %v8249_v47 }
 0x54c   :  { %v3569_v47 = vsel %vm215_vm0, %v8410_v24, 0.0 }
 0x54e   :  { %v3434_v38 = vpop.permute.xlu1 %3433 }
 0x54f   :  { %v8405_v34 = vadd.f32 %v3434_v38, %v8254_v19 }
 0x551   :  { %v3572_v19 = vsel %vm215_vm0, %v8405_v34, 0.0 }
 0x552   :  { %v3436_v30 = vpop.permute.xlu0 %3435 }
 0x553   :  { %v8420_v39 = vadd.f32 %v3436_v30, %v8259_v49 }
 0x555   :  { %v3575_v49 = vsel %vm215_vm0, %v8420_v39, 0.0 }
 0x556   :  { %3471 = vrot.lane.b32.xlu0 %v8359_v1, %s4869_s16  ;;  %v3438_v37 = vpop.permute.xlu1 %3437 }
 0x557   :  { %v8415_v14 = vadd.f32 %v3438_v37, %v8264_v40 }
 0x559   :  { %v3578_v40 = vsel %vm215_vm0, %v8415_v14, 0.0 }
 0x55a   :  { %v3440_v8 = vpop.permute.xlu0 %3439 }
 0x55b   :  { %3473 = vrot.lane.b32.xlu1 %v8364_v36, %s4869_s16  ;;  %v8430_v13 = vadd.f32 %v3440_v8, %v8269_v21 }
 0x55d   :  { %v3581_v21 = vsel %vm215_vm0, %v8430_v13, 0.0 }
 0x55f   :  { %v3442_v17 = vpop.permute.xlu1 %3441 }
 0x560   :  { %v8425_v27 = vadd.f32 %v3442_v17, %v8274_v3 }
 0x562   :  { %v3444_v33 = vpop.permute.xlu0 %3443  ;;  %v3584_v3 = vsel %vm215_vm0, %v8425_v27, 0.0 }
 0x563   :  { %v8440_v59 = vadd.f32 %v3444_v33, %v8279_v35 }
 0x565   :  { %v3587_v35 = vsel %vm215_vm0, %v8440_v59, 0.0 }
 0x567   :  { %v3446_v55 = vpop.permute.xlu1 %3445 }
 0x568   :  { %v8435_v56 = vadd.f32 %v3446_v55, %v8284_v32 }
 0x56a   :  { %v3590_v32 = vsel %vm215_vm0, %v8435_v56, 0.0 }
 0x56b   :  { %v3448_v25 = vpop.permute.xlu0 %3447 }
 0x56c   :  { %v8450_v45 = vadd.f32 %v3448_v25, %v8289_v2 }
 0x56e   :  { %v3593_v2 = vsel %vm215_vm0, %v8450_v45, 0.0 }
 0x56f   :  { %v3450_v28 = vpop.permute.xlu1 %3449 }
 0x575   :  { %3546 = vadd.xlane.f32.xlu0 %v3545_v23  ;;  %v8445_v23 = vadd.f32 %v3450_v28, %v8294_v53 }
 0x577   :  { %v3454_v22 = vpop.permute.xlu1 %3453  ;;  %v3596_v53 = vsel %vm215_vm0, %v8445_v23, 0.0 }
 0x578   :  { %v8455_v12 = vadd.f32 %v3454_v22, %v8304_v51 }
 0x579   :  { %3549 = vadd.xlane.f32.xlu0 %v3548_v29  ;;  %v3452_v29 = vpop.permute.xlu0 %3451 }
 0x57a   :  { %v3602_v51 = vsel %vm215_vm0, %v8455_v12, 0.0 }
 0x57d   :  { %3555 = vadd.xlane.f32.xlu0 %v3554_v15  ;;  %v8460_v15 = vadd.f32 %v3452_v29, %v8299_v16  ;;  %v3456_v61 = vpop.permute.xlu0 %3455 }
 0x57f   :  { %3552 = vadd.xlane.f32.xlu1 %v3551_v5  ;;  %v3599_v16 = vsel %vm215_vm0, %v8460_v15, 0.0 }
 0x580   :  { %v3458_v54 = vpop.permute.xlu1 %3457 }
 0x581   :  { %3561 = vadd.xlane.f32.xlu0 %v3560_v0  ;;  %v8465_v5 = vadd.f32 %v3458_v54, %v8314_v11  ;;  %v8470_v0 = vadd.f32 %v3456_v61, %v8309_v44 }
 0x583   :  { %3558 = vadd.xlane.f32.xlu1 %v3557_v10  ;;  %v3460_v38 = vpop.permute.xlu0 %3459  ;;  %v3608_v11 = vsel %vm215_vm0, %v8465_v5, 0.0  ;;  %v3605_v44 = vsel %vm215_vm0, %v8470_v0, 0.0 }
 0x585   :  { %3567 = vadd.xlane.f32.xlu0 %v3566_v58  ;;  %v8480_v58 = vadd.f32 %v3460_v38, %v8319_v46 }
 0x587   :  { %3564 = vadd.xlane.f32.xlu1 %v3563_v52  ;;  %v3611_v46 = vsel %vm215_vm0, %v8480_v58, 0.0 }
 0x588   :  { %v3462_v31 = vpop.permute.xlu1 %3461 }
 0x589   :  { %3573 = vadd.xlane.f32.xlu0 %v3572_v19  ;;  %v8475_v10 = vadd.f32 %v3462_v31, %v8324_v50 }
 0x58b   :  { %3570 = vadd.xlane.f32.xlu1 %v3569_v47  ;;  %v3464_v37 = vpop.permute.xlu0 %3463  ;;  %v3614_v50 = vsel %vm215_vm0, %v8475_v10, 0.0 }
 0x58c   :  { %v8490_v19 = vadd.f32 %v3464_v37, %v8329_v7 }
 0x58d   :  { %3579 = vadd.xlane.f32.xlu0 %v3578_v40 }
 0x58e   :  { %v3617_v40 = vsel %vm215_vm0, %v8490_v19, 0.0 }
 0x58f   :  { %3576 = vadd.xlane.f32.xlu1 %v3575_v49 }
 0x590   :  { %v3466_v26 = vpop.permute.xlu1 %3465 }
 0x591   :  { %3585 = vadd.xlane.f32.xlu0 %v3584_v3  ;;  %v8485_v52 = vadd.f32 %v3466_v26, %v8334_v48 }
 0x593   :  { %3582 = vadd.xlane.f32.xlu1 %v3581_v21  ;;  %v3468_v17 = vpop.permute.xlu0 %3467  ;;  %v3620_v48 = vsel %vm215_vm0, %v8485_v52, 0.0 }
 0x594   :  { %v8500_v8 = vadd.f32 %v3468_v17, %v8339_v41 }
 0x595   :  { %3591 = vadd.xlane.f32.xlu0 %v3590_v32 }
 0x596   :  { %v3623_v55 = vsel %vm215_vm0, %v8500_v8, 0.0 }
 0x597   :  { %3588 = vadd.xlane.f32.xlu1 %v3587_v35 }
 0x598   :  { %v3470_v30 = vpop.permute.xlu1 %3469 }
 0x599   :  { %3597 = vadd.xlane.f32.xlu0 %v3596_v53  ;;  %v8495_v47 = vadd.f32 %v3470_v30, %v8344_v20  ;;  %v4800_v20 = vld [vmem:[%s9013_s12] sm:$0xff]  }
 0x59a   :  { %4722 = vmatprep.subr.bf16.mxu0 %v4800_v20 }
 0x59b   :  { %3594 = vadd.xlane.f32.xlu1 %v3593_v2  ;;  %v3626_v7 = vsel %vm215_vm0, %v8495_v47, 0.0  ;;  %4723 = vmatpush3.bf16.msra.mxu0 %v4800_v20 }
 0x59d   :  { %3603 = vadd.xlane.f32.xlu0 %v3602_v51 }
 0x59f   :  { %3600 = vadd.xlane.f32.xlu1 %v3599_v16 }
 0x5a1   :  { %3609 = vadd.xlane.f32.xlu0 %v3608_v11 }
 0x5a3   :  { %3606 = vadd.xlane.f32.xlu1 %v3605_v44 }
 0x5a5   :  { %3615 = vadd.xlane.f32.xlu0 %v3614_v50 }
 0x5a7   :  { %3612 = vadd.xlane.f32.xlu1 %v3611_v46 }
 0x5a9   :  { %3621 = vadd.xlane.f32.xlu0 %v3620_v48 }
 0x5ab   :  { %3618 = vadd.xlane.f32.xlu1 %v3617_v40 }
 0x5ad   :  { %3627 = vadd.xlane.f32.xlu0 %v3626_v7 }
 0x5af   :  { %3624 = vadd.xlane.f32.xlu1 %v3623_v55 }
 0x5cd   :  { %v3541_v41 = vpop.xlane.xlu0 %3540 }
 0x5ce   :  { %v3636_v49 = vmul.f32 0.03125, %v3541_v41 }
 0x5d0   :  { %v8512_v33 = vsub.f32 %v8349_v43, %v3636_v49 }
 0x5d1   :  { %v3472_v3 = vpop.permute.xlu0 %3471 }
 0x5d2   :  { %v8515_v28 = vadd.f32 %v3472_v3, %v8359_v1  ;;  %v3700_v25 = vmul.f32 %v8512_v33, %v8512_v33 }
 0x5d4   :  { %v3629_v21 = vsel %vm215_vm0, %v8515_v28, 0.0  ;;  %v3732_v35 = vsel %vm215_vm0, %v3700_v25, 0.0 }
 0x5d5   :  { %3630 = vadd.xlane.f32.xlu1 %v3629_v21 }
 0x5d7   :  { %v3544_v32 = vpop.xlane.xlu1 %3543 }
 0x5d8   :  { %v3637_v22 = vmul.f32 0.03125, %v3544_v32 }
 0x5d9   :  { %3733 = vadd.xlane.f32.xlu1 %v3732_v35 }
 0x5da   :  { %v8523_v29 = vsub.f32 %v8354_v57, %v3637_v22 }
 0x5db   :  { %v3474_v43 = vpop.permute.xlu1 %3473 }
 0x5dc   :  { %v8526_v53 = vadd.f32 %v3474_v43, %v8364_v36  ;;  %v3701_v54 = vmul.f32 %v8523_v29, %v8523_v29 }
 0x5de   :  { %v3632_v1 = vsel %vm215_vm0, %v8526_v53, 0.0  ;;  %v3735_v2 = vsel %vm215_vm0, %v3701_v54, 0.0 }
 0x5df   :  { %3633 = vadd.xlane.f32.xlu0 %v3632_v1 }
 0x5e3   :  { %3736 = vadd.xlane.f32.xlu0 %v3735_v2 }
 0x602   :  { %v3547_v61 = vpop.xlane.xlu0 %3546 }
 0x603   :  { %v3638_v51 = vmul.f32 0.03125, %v3547_v61 }
 0x605   :  { %v8534_v31 = vsub.f32 %v8369_v62, %v3638_v51 }
 0x606   :  { %v3550_v57 = vpop.xlane.xlu0 %3549 }
 0x607   :  { %v3639_v16 = vmul.f32 0.03125, %v3550_v57  ;;  %v3702_v36 = vmul.f32 %v8534_v31, %v8534_v31 }
 0x609   :  { %v8539_v38 = vsub.f32 %v8372_v42, %v3639_v16  ;;  %v3738_v11 = vsel %vm215_vm0, %v3702_v36, 0.0 }
 0x60a   :  { %3739 = vadd.xlane.f32.xlu1 %v3738_v11  ;;  %v3556_v26 = vpop.xlane.xlu0 %3555 }
 0x60b   :  { %v3641_v44 = vmul.f32 0.03125, %v3556_v26  ;;  %v3703_v37 = vmul.f32 %v8539_v38, %v8539_v38 }
 0x60c   :  { %v3553_v50 = vpop.xlane.xlu1 %3552 }
 0x60d   :  { %v3640_v30 = vmul.f32 0.03125, %v3553_v50  ;;  %v8545_v62 = vsub.f32 %v8377_v60, %v3641_v44  ;;  %v3741_v46 = vsel %vm215_vm0, %v3703_v37, 0.0 }
 0x60e   :  { %3742 = vadd.xlane.f32.xlu0 %v3741_v46  ;;  %v3562_v17 = vpop.xlane.xlu0 %3561 }
 0x60f   :  { %v8549_v42 = vsub.f32 %v8382_v18, %v3640_v30  ;;  %v3643_v48 = vmul.f32 0.03125, %v3562_v17  ;;  %v3705_v40 = vmul.f32 %v8545_v62, %v8545_v62 }
 0x610   :  { %v3559_v7 = vpop.xlane.xlu1 %3558 }
 0x611   :  { %v3642_v55 = vmul.f32 0.03125, %v3559_v7  ;;  %v8554_v20 = vsub.f32 %v8385_v63, %v3643_v48  ;;  %v3704_v60 = vmul.f32 %v8549_v42, %v8549_v42  ;;  %v3747_v41 = vsel %vm215_vm0, %v3705_v40, 0.0 }
 0x612   :  { %3748 = vadd.xlane.f32.xlu0 %v3747_v41  ;;  %v3568_v49 = vpop.xlane.xlu0 %3567 }
 0x613   :  { %v8560_v3 = vsub.f32 %v8390_v9, %v3642_v55  ;;  %v3744_v18 = vsel %vm215_vm0, %v3704_v60, 0.0  ;;  %v3645_v21 = vmul.f32 0.03125, %v3568_v49  ;;  %v3707_v25 = vmul.f32 %v8554_v20, %v8554_v20 }
 0x614   :  { %v3565_v32 = vpop.xlane.xlu1 %3564  ;;  %3745 = vadd.xlane.f32.xlu1 %v3744_v18 }
 0x615   :  { %v3644_v63 = vmul.f32 0.03125, %v3565_v32  ;;  %v8566_v22 = vsub.f32 %v8395_v6, %v3645_v21  ;;  %v3706_v35 = vmul.f32 %v8560_v3, %v8560_v3  ;;  %v3753_v43 = vsel %vm215_vm0, %v3707_v25, 0.0 }
 0x616   :  { %3754 = vadd.xlane.f32.xlu0 %v3753_v43  ;;  %v3574_v9 = vpop.xlane.xlu0 %3573 }
 0x617   :  { %v8572_v1 = vsub.f32 %v8400_v4, %v3644_v63  ;;  %v3750_v54 = vsel %vm215_vm0, %v3706_v35, 0.0  ;;  %v3647_v2 = vmul.f32 0.03125, %v3574_v9  ;;  %v3709_v61 = vmul.f32 %v8566_v22, %v8566_v22 }
 0x618   :  { %v3571_v51 = vpop.xlane.xlu1 %3570  ;;  %3751 = vadd.xlane.f32.xlu1 %v3750_v54 }
 0x619   :  { %v3646_v6 = vmul.f32 0.03125, %v3571_v51  ;;  %v8578_v57 = vsub.f32 %v8405_v34, %v3647_v2  ;;  %v3708_v16 = vmul.f32 %v8572_v1, %v8572_v1  ;;  %v3759_v36 = vsel %vm215_vm0, %v3709_v61, 0.0 }
 0x61a   :  { %3760 = vadd.xlane.f32.xlu0 %v3759_v36  ;;  %v3580_v4 = vpop.xlane.xlu0 %3579 }
 0x61b   :  { %v8584_v11 = vsub.f32 %v8410_v24, %v3646_v6  ;;  %v3756_v26 = vsel %vm215_vm0, %v3708_v16, 0.0  ;;  %v3649_v44 = vmul.f32 0.03125, %v3580_v4  ;;  %v3711_v37 = vmul.f32 %v8578_v57, %v8578_v57 }
 0x61c   :  { %v3577_v50 = vpop.xlane.xlu1 %3576  ;;  %3757 = vadd.xlane.f32.xlu1 %v3756_v26 }
 0x61d   :  { %v3648_v34 = vmul.f32 0.03125, %v3577_v50  ;;  %v8590_v30 = vsub.f32 %v8415_v14, %v3649_v44  ;;  %v3710_v46 = vmul.f32 %v8584_v11, %v8584_v11  ;;  %v3765_v17 = vsel %vm215_vm0, %v3711_v37, 0.0 }
 0x61e   :  { %3766 = vadd.xlane.f32.xlu0 %v3765_v17  ;;  %v3586_v24 = vpop.xlane.xlu0 %3585 }
 0x61f   :  { %v8596_v48 = vsub.f32 %v8420_v39, %v3648_v34  ;;  %v3762_v40 = vsel %vm215_vm0, %v3710_v46, 0.0  ;;  %v3651_v7 = vmul.f32 0.03125, %v3586_v24  ;;  %v3713_v55 = vmul.f32 %v8590_v30, %v8590_v30 }
 0x620   :  { %v3583_v60 = vpop.xlane.xlu1 %3582  ;;  %3763 = vadd.xlane.f32.xlu1 %v3762_v40 }
 0x621   :  { %v3650_v14 = vmul.f32 0.03125, %v3583_v60  ;;  %v8602_v41 = vsub.f32 %v8425_v27, %v3651_v7  ;;  %v3712_v49 = vmul.f32 %v8596_v48, %v8596_v48  ;;  %v3771_v18 = vsel %vm215_vm0, %v3713_v55, 0.0 }
 0x622   :  { %3772 = vadd.xlane.f32.xlu0 %v3771_v18  ;;  %v3592_v39 = vpop.xlane.xlu0 %3591 }
 0x623   :  { %v8608_v21 = vsub.f32 %v8430_v13, %v3650_v14  ;;  %v3768_v25 = vsel %vm215_vm0, %v3712_v49, 0.0  ;;  %v3653_v32 = vmul.f32 0.03125, %v3592_v39  ;;  %v3715_v63 = vmul.f32 %v8602_v41, %v8602_v41 }
 0x624   :  { %v3589_v35 = vpop.xlane.xlu1 %3588  ;;  %3769 = vadd.xlane.f32.xlu1 %v3768_v25 }
 0x625   :  { %v3652_v27 = vmul.f32 0.03125, %v3589_v35  ;;  %v8614_v43 = vsub.f32 %v8435_v56, %v3653_v32  ;;  %v3714_v9 = vmul.f32 %v8608_v21, %v8608_v21  ;;  %v3777_v54 = vsel %vm215_vm0, %v3715_v63, 0.0  ;;  %v4801_v32 = vld [vmem:[%s9013_s12 + $0x8] sm:$0xff]  }
 0x626   :  { %3778 = vadd.xlane.f32.xlu0 %v3777_v54  ;;  %v3598_v13 = vpop.xlane.xlu0 %3597  ;;  %4724 = vmatprep.subr.bf16.mxu0 %v4801_v32 }
 0x627   :  { %v8620_v2 = vsub.f32 %v8440_v59, %v3652_v27  ;;  %v3774_v61 = vsel %vm215_vm0, %v3714_v9, 0.0  ;;  %v3655_v51 = vmul.f32 0.03125, %v3598_v13  ;;  %v3717_v6 = vmul.f32 %v8614_v43, %v8614_v43  ;;  %4725 = vmatpush3.bf16.msra.mxu0 %v4801_v32 }
 0x628   :  { %v3595_v16 = vpop.xlane.xlu1 %3594  ;;  %3775 = vadd.xlane.f32.xlu1 %v3774_v61 }
 0x629   :  { %v3654_v56 = vmul.f32 0.03125, %v3595_v16  ;;  %v8626_v36 = vsub.f32 %v8445_v23, %v3655_v51  ;;  %v3716_v4 = vmul.f32 %v8620_v2, %v8620_v2  ;;  %v3783_v26 = vsel %vm215_vm0, %v3717_v6, 0.0 }
 0x62a   :  { %3784 = vadd.xlane.f32.xlu0 %v3783_v26  ;;  %v3604_v59 = vpop.xlane.xlu0 %3603 }
 0x62b   :  { %v8632_v44 = vsub.f32 %v8450_v45, %v3654_v56  ;;  %v3780_v37 = vsel %vm215_vm0, %v3716_v4, 0.0  ;;  %v3657_v50 = vmul.f32 0.03125, %v3604_v59  ;;  %v3719_v34 = vmul.f32 %v8626_v36, %v8626_v36 }
 0x62c   :  { %v3601_v46 = vpop.xlane.xlu1 %3600  ;;  %3781 = vadd.xlane.f32.xlu1 %v3780_v37 }
 0x62d   :  { %v3656_v23 = vmul.f32 0.03125, %v3601_v46  ;;  %v8638_v17 = vsub.f32 %v8455_v12, %v3657_v50  ;;  %v3718_v24 = vmul.f32 %v8632_v44, %v8632_v44  ;;  %v3789_v40 = vsel %vm215_vm0, %v3719_v34, 0.0 }
 0x62e   :  { %3790 = vadd.xlane.f32.xlu0 %v3789_v40  ;;  %v3610_v45 = vpop.xlane.xlu0 %3609 }
 0x62f   :  { %v8644_v7 = vsub.f32 %v8460_v15, %v3656_v23  ;;  %v3786_v55 = vsel %vm215_vm0, %v3718_v24, 0.0  ;;  %v3659_v60 = vmul.f32 0.03125, %v3610_v45  ;;  %v3721_v14 = vmul.f32 %v8638_v17, %v8638_v17 }
 0x630   :  { %v3607_v49 = vpop.xlane.xlu1 %3606  ;;  %3787 = vadd.xlane.f32.xlu1 %v3786_v55 }
 0x631   :  { %v3658_v12 = vmul.f32 0.03125, %v3607_v49  ;;  %v8650_v18 = vsub.f32 %v8465_v5, %v3659_v60  ;;  %v3720_v39 = vmul.f32 %v8644_v7, %v8644_v7  ;;  %v3795_v25 = vsel %vm215_vm0, %v3721_v14, 0.0 }
 0x632   :  { %3796 = vadd.xlane.f32.xlu0 %v3795_v25  ;;  %v3616_v15 = vpop.xlane.xlu0 %3615 }
 0x633   :  { %v8659_v63 = vsub.f32 %v8470_v0, %v3658_v12  ;;  %v3792_v35 = vsel %vm215_vm0, %v3720_v39, 0.0  ;;  %v3661_v27 = vmul.f32 0.03125, %v3616_v15  ;;  %v3723_v5 = vmul.f32 %v8650_v18, %v8650_v18 }
 0x634   :  { %v3613_v9 = vpop.xlane.xlu1 %3612  ;;  %3793 = vadd.xlane.f32.xlu1 %v3792_v35 }
 0x635   :  { %v3660_v54 = vmul.f32 0.03125, %v3613_v9  ;;  %v8665_v13 = vsub.f32 %v8475_v10, %v3661_v27  ;;  %v3722_v61 = vmul.f32 %v8659_v63, %v8659_v63  ;;  %v3801_v51 = vsel %vm215_vm0, %v3723_v5, 0.0 }
 0x636   :  { %3802 = vadd.xlane.f32.xlu0 %v3801_v51  ;;  %v3622_v0 = vpop.xlane.xlu0 %3621 }
 0x637   :  { %v8671_v6 = vsub.f32 %v8480_v58, %v3660_v54  ;;  %v3798_v16 = vsel %vm215_vm0, %v3722_v61, 0.0  ;;  %v3663_v56 = vmul.f32 0.03125, %v3622_v0  ;;  %v3725_v4 = vmul.f32 %v8665_v13, %v8665_v13 }
 0x638   :  { %v3619_v26 = vpop.xlane.xlu1 %3618  ;;  %3799 = vadd.xlane.f32.xlu1 %v3798_v16 }
 0x639   :  { %v3662_v10 = vmul.f32 0.03125, %v3619_v26  ;;  %v8677_v59 = vsub.f32 %v8485_v52, %v3663_v56  ;;  %v3724_v37 = vmul.f32 %v8671_v6, %v8671_v6  ;;  %v3807_v50 = vsel %vm215_vm0, %v3725_v4, 0.0 }
 0x63a   :  { %3808 = vadd.xlane.f32.xlu0 %v3807_v50  ;;  %v3628_v58 = vpop.xlane.xlu0 %3627 }
 0x63b   :  { %v8683_v34 = vsub.f32 %v8490_v19, %v3662_v10  ;;  %v3804_v46 = vsel %vm215_vm0, %v3724_v37, 0.0  ;;  %v3665_v23 = vmul.f32 0.03125, %v3628_v58  ;;  %v3727_v24 = vmul.f32 %v8677_v59, %v8677_v59  ;;  %v8720_v37 = vld [vmem:[%s9014_s10] ss:$0 sm:$0xff] }
 0x63c   :  { %v3625_v40 = vpop.xlane.xlu1 %3624  ;;  %3805 = vadd.xlane.f32.xlu1 %v3804_v46  ;;  %v8726_v58 = vld [vmem:[%s9015_s11] ss:$0 sm:$0xff] }
 0x63d   :  { %v3664_v52 = vmul.f32 0.03125, %v3625_v40  ;;  %v8689_v45 = vsub.f32 %v8495_v47, %v3665_v23  ;;  %v3726_v55 = vmul.f32 %v8683_v34, %v8683_v34  ;;  %v3813_v60 = vsel %vm215_vm0, %v3727_v24, 0.0 }
 0x63e   :  { %3814 = vadd.xlane.f32.xlu0 %v3813_v60 }
 0x63f   :  { %v8695_v19 = vsub.f32 %v8500_v8, %v3664_v52  ;;  %v3810_v14 = vsel %vm215_vm0, %v3726_v55, 0.0  ;;  %v3729_v49 = vmul.f32 %v8689_v45, %v8689_v45 }
 0x640   :  { %3811 = vadd.xlane.f32.xlu1 %v3810_v14 }
 0x641   :  { %v3728_v12 = vmul.f32 %v8695_v19, %v8695_v19  ;;  %v3819_v47 = vsel %vm215_vm0, %v3729_v49, 0.0 }
 0x642   :  { %3820 = vadd.xlane.f32.xlu0 %v3819_v47 }
 0x643   :  { %v3816_v39 = vsel %vm215_vm0, %v3728_v12, 0.0 }
 0x644   :  { %3817 = vadd.xlane.f32.xlu1 %v3816_v39 }
 0x662   :  { %v3631_v25 = vpop.xlane.xlu1 %3630 }
 0x663   :  { %v3666_v15 = vmul.f32 0.03125, %v3631_v25 }
 0x665   :  { %v8705_v8 = vsub.f32 %v8515_v28, %v3666_v15 }
 0x666   :  { %v3734_v32 = vpop.xlane.xlu1 %3733 }
 0x667   :  { %v3828_v35 = vmul.f32 0.03125, %v3734_v32  ;;  %v3730_v27 = vmul.f32 %v8705_v8, %v8705_v8 }
 0x669   :  { %v3860_v5 = vadd.f32 1e-05, %v3828_v35  ;;  %v3822_v9 = vsel %vm215_vm0, %v3730_v27, 0.0 }
 0x66a   :  { %3823 = vadd.xlane.f32.xlu1 %v3822_v9 }
 0x66b   :  { %4802 = vrsqrt.f32 %v3860_v5 }
 0x66c   :  { %v3634_v54 = vpop.xlane.xlu0 %3633 }
 0x66d   :  { %v3667_v61 = vmul.f32 0.03125, %v3634_v54 }
 0x66f   :  { %v8711_v51 = vsub.f32 %v8526_v53, %v3667_v61 }
 0x670   :  { %v3737_v0 = vpop.xlane.xlu0 %3736 }
 0x671   :  { %v3829_v16 = vmul.f32 0.03125, %v3737_v0  ;;  %v3731_v28 = vmul.f32 %v8711_v51, %v8711_v51 }
 0x673   :  { %v3861_v56 = vadd.f32 1e-05, %v3829_v16  ;;  %v3825_v4 = vsel %vm215_vm0, %v3731_v28, 0.0 }
 0x674   :  { %3826 = vadd.xlane.f32.xlu0 %v3825_v4 }
 0x675   :  { %4804 = vrsqrt.f32 %v3861_v56  ;;  %v4803_v26 = vpop.eup %4802 }
 0x676   :  { %v3924_v10 = vmul.f32 %v4803_v26, %v8512_v33 }
 0x678   :  { %v3963_v53 = vmul.f32 %v8720_v37, %v3924_v10 }
 0x67a   :  { %v4002_v24 = vadd.f32 %v8726_v58, %v3963_v53 }
 0x67c   :  { %v4034_v40 = vmax.f32 %v4002_v24, 0.0 }
 0x67f   :  { %v4805_v50 = vpop.eup %4804 }
 0x680   :  { %v3925_v46 = vmul.f32 %v4805_v50, %v8523_v29 }
 0x682   :  { %v3964_v23 = vmul.f32 %v8720_v37, %v3925_v46 }
 0x684   :  { %v4003_v33 = vadd.f32 %v8726_v58, %v3964_v23 }
 0x686   :  { %v4035_v52 = vmax.f32 %v4003_v33, 0.0 }
 0x688   :  { %v4066_v55 = vpack.c.bf16 %v4035_v52, %v4034_v40 }
 0x68a   :  { %4726 = vmatprep.mubr.msk.bf16.mxu0 %vm215_vm0, %v4066_v55 }
 0x697   :  { %v3740_v60 = vpop.xlane.xlu1 %3739 }
 0x698   :  { %v3830_v14 = vmul.f32 0.03125, %v3740_v60 }
 0x69a   :  { %v3862_v49 = vadd.f32 1e-05, %v3830_v14 }
 0x69b   :  { %v3743_v12 = vpop.xlane.xlu0 %3742 }
 0x69c   :  { %4806 = vrsqrt.f32 %v3862_v49  ;;  %v3831_v47 = vmul.f32 0.03125, %v3743_v12 }
 0x69e   :  { %v3863_v39 = vadd.f32 1e-05, %v3831_v47 }
 0x69f   :  { %v3749_v25 = vpop.xlane.xlu0 %3748 }
 0x6a0   :  { %4808 = vrsqrt.f32 %v3863_v39  ;;  %v3833_v29 = vmul.f32 0.03125, %v3749_v25 }
 0x6a1   :  { %v3746_v15 = vpop.xlane.xlu1 %3745 }
 0x6a2   :  { %v3832_v32 = vmul.f32 0.03125, %v3746_v15  ;;  %v3865_v35 = vadd.f32 1e-05, %v3833_v29 }
 0x6a3   :  { %v3755_v27 = vpop.xlane.xlu0 %3754 }
 0x6a4   :  { %v3864_v5 = vadd.f32 1e-05, %v3832_v32  ;;  %4810 = vrsqrt.f32 %v3865_v35  ;;  %v3835_v9 = vmul.f32 0.03125, %v3755_v27 }
 0x6a5   :  { %v3752_v54 = vpop.xlane.xlu1 %3751 }
 0x6a6   :  { %v4807_v61 = vpop.eup %4806  ;;  %4812 = vrsqrt.f32 %v3864_v5  ;;  %v3834_v0 = vmul.f32 0.03125, %v3752_v54  ;;  %v3867_v16 = vadd.f32 1e-05, %v3835_v9 }
 0x6a7   :  { %v3926_v28 = vmul.f32 %v4807_v61, %v8534_v31  ;;  %v3761_v56 = vpop.xlane.xlu0 %3760 }
 0x6a8   :  { %v3866_v4 = vadd.f32 1e-05, %v3834_v0  ;;  %4814 = vrsqrt.f32 %v3867_v16  ;;  %v3837_v26 = vmul.f32 0.03125, %v3761_v56 }
 0x6a9   :  { %v3965_v10 = vmul.f32 %v8720_v37, %v3926_v28  ;;  %v3758_v53 = vpop.xlane.xlu1 %3757 }
 0x6aa   :  { %v4809_v50 = vpop.eup %4808  ;;  %4816 = vrsqrt.f32 %v3866_v4  ;;  %v3836_v46 = vmul.f32 0.03125, %v3758_v53  ;;  %v3869_v23 = vadd.f32 1e-05, %v3837_v26 }
 0x6ab   :  { %v3927_v24 = vmul.f32 %v4809_v50, %v8539_v38  ;;  %v3767_v33 = vpop.xlane.xlu0 %3766  ;;  %v4004_v55 = vadd.f32 %v8726_v58, %v3965_v10 }
 0x6ac   :  { %v3868_v40 = vadd.f32 1e-05, %v3836_v46  ;;  %4818 = vrsqrt.f32 %v3869_v23  ;;  %v3839_v52 = vmul.f32 0.03125, %v3767_v33 }
 0x6ad   :  { %v3966_v31 = vmul.f32 %v8720_v37, %v3927_v24  ;;  %v3764_v60 = vpop.xlane.xlu1 %3763  ;;  %v4036_v32 = vmax.f32 %v4004_v55, 0.0 }
 0x6ae   :  { %v4811_v14 = vpop.eup %4810  ;;  %4820 = vrsqrt.f32 %v3868_v40  ;;  %v3838_v49 = vmul.f32 0.03125, %v3764_v60  ;;  %v3871_v12 = vadd.f32 1e-05, %v3839_v52 }
 0x6af   :  { %v4005_v47 = vadd.f32 %v8726_v58, %v3966_v31  ;;  %v3929_v39 = vmul.f32 %v4811_v14, %v8545_v62  ;;  %v3773_v25 = vpop.xlane.xlu0 %3772 }
 0x6b0   :  { %v4813_v29 = vpop.eup %4812  ;;  %v3870_v38 = vadd.f32 1e-05, %v3838_v49  ;;  %4822 = vrsqrt.f32 %v3871_v12  ;;  %v3841_v15 = vmul.f32 0.03125, %v3773_v25 }
 0x6b1   :  { %v4037_v35 = vmax.f32 %v4005_v47, 0.0  ;;  %v3928_v27 = vmul.f32 %v4813_v29, %v8549_v42  ;;  %v3770_v5 = vpop.xlane.xlu1 %3769  ;;  %v3968_v9 = vmul.f32 %v8720_v37, %v3929_v39 }
 0x6b2   :  { %v4815_v54 = vpop.eup %4814  ;;  %4824 = vrsqrt.f32 %v3870_v38  ;;  %v3840_v61 = vmul.f32 0.03125, %v3770_v5  ;;  %v3873_v0 = vadd.f32 1e-05, %v3841_v15 }
 0x6b3   :  { %v4067_v16 = vpack.c.bf16 %v4037_v35, %v4036_v32  ;;  %v3931_v28 = vmul.f32 %v4815_v54, %v8554_v20  ;;  %v3779_v62 = vpop.xlane.xlu0 %3778  ;;  %v3967_v56 = vmul.f32 %v8720_v37, %v3928_v27  ;;  %v4007_v4 = vadd.f32 %v8726_v58, %v3968_v9 }
 0x6b4   :  { %v4817_v26 = vpop.eup %4816  ;;  %v3872_v10 = vadd.f32 1e-05, %v3840_v61  ;;  %4826 = vrsqrt.f32 %v3873_v0  ;;  %v3843_v53 = vmul.f32 0.03125, %v3779_v62 }
 0x6b5   :  { %v3930_v42 = vmul.f32 %v4817_v26, %v8560_v3  ;;  %v3970_v50 = vmul.f32 %v8720_v37, %v3931_v28  ;;  %v3776_v46 = vpop.xlane.xlu1 %3775  ;;  %4727 = vmatmul.mubr.msk.bf16.vlgmr.msra.gmra.mrb[16].mxu0 %vm215_vm0, %v4067_v16  ;;  %v4006_v23 = vadd.f32 %v8726_v58, %v3967_v56  ;;  %v4039_v24 = vmax.f32 %v4007_v4, 0.0 }
 0x6b6   :  { %v4819_v20 = vpop.eup %4818  ;;  %4828 = vrsqrt.f32 %v3872_v10  ;;  %v3842_v33 = vmul.f32 0.03125, %v3776_v46  ;;  %v3875_v40 = vadd.f32 1e-05, %v3843_v53 }
 0x6b7   :  { %v3969_v52 = vmul.f32 %v8720_v37, %v3930_v42  ;;  %v4009_v55 = vadd.f32 %v8726_v58, %v3970_v50  ;;  %v3933_v31 = vmul.f32 %v4819_v20, %v8566_v22  ;;  %v3785_v60 = vpop.xlane.xlu0 %3784  ;;  %v4038_v3 = vmax.f32 %v4006_v23, 0.0 }
 0x6b8   :  { %v4821_v14 = vpop.eup %4820  ;;  %v3874_v49 = vadd.f32 1e-05, %v3842_v33  ;;  %4830 = vrsqrt.f32 %v3875_v40  ;;  %v3845_v12 = vmul.f32 0.03125, %v3785_v60 }
 0x6b9   :  { %v4008_v47 = vadd.f32 %v8726_v58, %v3969_v52  ;;  %v4041_v39 = vmax.f32 %v4009_v55, 0.0  ;;  %v3932_v25 = vmul.f32 %v4821_v14, %v8572_v1  ;;  %v3782_v29 = vpop.xlane.xlu1 %3781  ;;  %v4068_v38 = vpack.c.bf16 %v4039_v24, %v4038_v3 }
 0x6ba   :  { %v4823_v15 = vpop.eup %4822  ;;  %4832 = vrsqrt.f32 %v3874_v49  ;;  %v3844_v32 = vmul.f32 0.03125, %v3782_v29  ;;  %v3877_v35 = vadd.f32 1e-05, %v3845_v12  ;;  %v3972_v27 = vmul.f32 %v8720_v37, %v3933_v31 }
 0x6bb   :  { %v4040_v22 = vmax.f32 %v4008_v47, 0.0  ;;  %v3935_v5 = vmul.f32 %v4823_v15, %v8578_v57  ;;  %4730 = vmatprep.mubr.msk.bf16.mxu0 %vm215_vm0, %v4068_v38  ;;  %v3791_v9 = vpop.xlane.xlu0 %3790  ;;  %v3971_v54 = vmul.f32 %v8720_v37, %v3932_v25 }
 0x6bc   :  { %v4825_v61 = vpop.eup %4824  ;;  %v3876_v0 = vadd.f32 1e-05, %v3844_v32  ;;  %4834 = vrsqrt.f32 %v3877_v35  ;;  %v3847_v1 = vmul.f32 0.03125, %v3791_v9  ;;  %v4011_v16 = vadd.f32 %v8726_v58, %v3972_v27 }
 0x6bd   :  { %v4069_v28 = vpack.c.bf16 %v4041_v39, %v4040_v22  ;;  %v3934_v62 = vmul.f32 %v4825_v61, %v8584_v11  ;;  %v3974_v56 = vmul.f32 %v8720_v37, %v3935_v5  ;;  %v3788_v4 = vpop.xlane.xlu1 %3787  ;;  %v4010_v26 = vadd.f32 %v8726_v58, %v3971_v54 }
 0x6be   :  { %v4827_v57 = vpop.eup %4826  ;;  %4836 = vrsqrt.f32 %v3876_v0  ;;  %v3846_v10 = vmul.f32 0.03125, %v3788_v4  ;;  %v3879_v53 = vadd.f32 1e-05, %v3847_v1  ;;  %v4043_v42 = vmax.f32 %v4011_v16, 0.0 }
 0x6bf   :  { %v3973_v50 = vmul.f32 %v8720_v37, %v3934_v62  ;;  %v4013_v46 = vadd.f32 %v8726_v58, %v3974_v56  ;;  %v3937_v23 = vmul.f32 %v4827_v57, %v8590_v30  ;;  %4731 = vmatmul.mubr.msk.bf16.gmra.mrb[20].mxu0 %vm215_vm0, %v4069_v28  ;;  %v3797_v24 = vpop.xlane.xlu0 %3796  ;;  %v4042_v11 = vmax.f32 %v4010_v26, 0.0 }
 0x6c0   :  { %v4829_v20 = vpop.eup %4828  ;;  %v3878_v33 = vadd.f32 1e-05, %v3846_v10  ;;  %4838 = vrsqrt.f32 %v3879_v53  ;;  %v3849_v40 = vmul.f32 0.03125, %v3797_v24 }
 0x6c1   :  { %v4012_v52 = vadd.f32 %v8726_v58, %v3973_v50  ;;  %v4045_v55 = vmax.f32 %v4013_v46, 0.0  ;;  %v3936_v31 = vmul.f32 %v4829_v20, %v8596_v48  ;;  %v3794_v60 = vpop.xlane.xlu1 %3793  ;;  %v4070_v3 = vpack.c.bf16 %v4043_v42, %v4042_v11 }
 0x6c2   :  { %v4831_v14 = vpop.eup %4830  ;;  %4840 = vrsqrt.f32 %v3878_v33  ;;  %v3848_v49 = vmul.f32 0.03125, %v3794_v60  ;;  %v3881_v12 = vadd.f32 1e-05, %v3849_v40  ;;  %v3976_v30 = vmul.f32 %v8720_v37, %v3937_v23 }
 0x6c3   :  { %v4044_v47 = vmax.f32 %v4012_v52, 0.0  ;;  %v3939_v39 = vmul.f32 %v4831_v14, %v8602_v41  ;;  %4734 = vmatprep.mubr.msk.bf16.mxu0 %vm215_vm0, %v4070_v3  ;;  %v3803_v25 = vpop.xlane.xlu0 %3802  ;;  %v3975_v29 = vmul.f32 %v8720_v37, %v3936_v31 }
 0x6c4   :  { %v4833_v38 = vpop.eup %4832  ;;  %v3880_v15 = vadd.f32 1e-05, %v3848_v49  ;;  %4842 = vrsqrt.f32 %v3881_v12  ;;  %v3851_v48 = vmul.f32 0.03125, %v3803_v25  ;;  %v4015_v32 = vadd.f32 %v8726_v58, %v3976_v30 }
 0x6c5   :  { %v4071_v35 = vpack.c.bf16 %v4045_v55, %v4044_v47  ;;  %v3938_v27 = vmul.f32 %v4833_v38, %v8608_v21  ;;  %v3978_v22 = vmul.f32 %v8720_v37, %v3939_v39  ;;  %v3800_v5 = vpop.xlane.xlu1 %3799  ;;  %v4014_v9 = vadd.f32 %v8726_v58, %v3975_v29 }
 0x6c6   :  { %v4835_v41 = vpop.eup %4834  ;;  %4844 = vrsqrt.f32 %v3880_v15  ;;  %v3850_v54 = vmul.f32 0.03125, %v3800_v5  ;;  %v3883_v61 = vadd.f32 1e-05, %v3851_v48  ;;  %v4047_v0 = vmax.f32 %v4015_v32, 0.0 }
 0x6c7   :  { %v3977_v1 = vmul.f32 %v8720_v37, %v3938_v27  ;;  %v4017_v16 = vadd.f32 %v8726_v58, %v3978_v22  ;;  %v3941_v28 = vmul.f32 %v4835_v41, %v8614_v43  ;;  %4735 = vmatmul.mubr.msk.bf16.gmra.mrb[24].mxu0 %vm215_vm0, %v4071_v35  ;;  %v3809_v62 = vpop.xlane.xlu0 %3808  ;;  %v4046_v21 = vmax.f32 %v4014_v9, 0.0 }
 0x6c8   :  { %v4837_v56 = vpop.eup %4836  ;;  %v3882_v4 = vadd.f32 1e-05, %v3850_v54  ;;  %4846 = vrsqrt.f32 %v3883_v61  ;;  %v3853_v26 = vmul.f32 0.03125, %v3809_v62 }
 0x6c9   :  { %v4016_v57 = vadd.f32 %v8726_v58, %v3977_v1  ;;  %v4049_v10 = vmax.f32 %v4017_v16, 0.0  ;;  %v3940_v53 = vmul.f32 %v4837_v56, %v8620_v2  ;;  %v3806_v42 = vpop.xlane.xlu1 %3805  ;;  %v4072_v50 = vpack.c.bf16 %v4047_v0, %v4046_v21 }
 0x6ca   :  { %v4839_v46 = vpop.eup %4838  ;;  %4848 = vrsqrt.f32 %v3882_v4  ;;  %v3852_v23 = vmul.f32 0.03125, %v3806_v42  ;;  %v3885_v24 = vadd.f32 1e-05, %v3853_v26  ;;  %v3980_v43 = vmul.f32 %v8720_v37, %v3941_v28 }
 0x6cb   :  { %v4048_v11 = vmax.f32 %v4016_v57, 0.0  ;;  %v3943_v20 = vmul.f32 %v4839_v46, %v8626_v36  ;;  %4738 = vmatprep.mubr.msk.bf16.mxu0 %vm215_vm0, %v4072_v50  ;;  %v3815_v33 = vpop.xlane.xlu0 %3814  ;;  %v3979_v40 = vmul.f32 %v8720_v37, %v3940_v53 }
 0x6cc   :  { %v4841_v52 = vpop.eup %4840  ;;  %v3884_v55 = vadd.f32 1e-05, %v3852_v23  ;;  %4850 = vrsqrt.f32 %v3885_v24  ;;  %v3855_v2 = vmul.f32 0.03125, %v3815_v33  ;;  %v4019_v31 = vadd.f32 %v8726_v58, %v3980_v43 }
 0x6cd   :  { %v4073_v60 = vpack.c.bf16 %v4049_v10, %v4048_v11  ;;  %v3942_v3 = vmul.f32 %v4841_v52, %v8632_v44  ;;  %v3982_v14 = vmul.f32 %v8720_v37, %v3943_v20  ;;  %v3812_v49 = vpop.xlane.xlu1 %3811  ;;  %v4018_v12 = vadd.f32 %v8726_v58, %v3979_v40 }
 0x6ce   :  { %v4843_v36 = vpop.eup %4842  ;;  %4852 = vrsqrt.f32 %v3884_v55  ;;  %v3854_v30 = vmul.f32 0.03125, %v3812_v49  ;;  %v3887_v47 = vadd.f32 1e-05, %v3855_v2  ;;  %v4051_v39 = vmax.f32 %v4019_v31, 0.0 }
 0x6cf   :  { %v3981_v25 = vmul.f32 %v8720_v37, %v3942_v3  ;;  %v4021_v29 = vadd.f32 %v8726_v58, %v3982_v14  ;;  %v3945_v38 = vmul.f32 %v4843_v36, %v8638_v17  ;;  %4739 = vmatmul.mubr.msk.bf16.gmra.mrb[28].mxu0 %vm215_vm0, %v4073_v60  ;;  %v3821_v15 = vpop.xlane.xlu0 %3820  ;;  %v4050_v44 = vmax.f32 %v4018_v12, 0.0 }
 0x6d0   :  { %v4845_v48 = vpop.eup %4844  ;;  %v3886_v32 = vadd.f32 1e-05, %v3854_v30  ;;  %4854 = vrsqrt.f32 %v3887_v47  ;;  %v3857_v35 = vmul.f32 0.03125, %v3821_v15 }
 0x6d1   :  { %v4020_v27 = vadd.f32 %v8726_v58, %v3981_v25  ;;  %v4053_v22 = vmax.f32 %v4021_v29, 0.0  ;;  %v3944_v5 = vmul.f32 %v4845_v48, %v8644_v7  ;;  %v3818_v9 = vpop.xlane.xlu1 %3817  ;;  %v4074_v41 = vpack.c.bf16 %v4051_v39, %v4050_v44 }
 0x6d2   :  { %v4847_v54 = vpop.eup %4846  ;;  %4856 = vrsqrt.f32 %v3886_v32  ;;  %v3856_v61 = vmul.f32 0.03125, %v3818_v9  ;;  %v3889_v0 = vadd.f32 1e-05, %v3857_v35  ;;  %v3984_v17 = vmul.f32 %v8720_v37, %v3945_v38 }
 0x6d3   :  { %v4052_v1 = vmax.f32 %v4020_v27, 0.0  ;;  %v3947_v16 = vmul.f32 %v4847_v54, %v8650_v18  ;;  %4742 = vmatprep.mubr.msk.bf16.mxu0 %vm215_vm0, %v4074_v41  ;;  %v3983_v28 = vmul.f32 %v8720_v37, %v3944_v5 }
 0x6d4   :  { %v4849_v62 = vpop.eup %4848  ;;  %v3888_v21 = vadd.f32 1e-05, %v3856_v61  ;;  %4858 = vrsqrt.f32 %v3889_v0  ;;  %v4023_v7 = vadd.f32 %v8726_v58, %v3984_v17 }
 0x6d5   :  { %v4075_v56 = vpack.c.bf16 %v4053_v22, %v4052_v1  ;;  %v3946_v4 = vmul.f32 %v4849_v62, %v8659_v63  ;;  %v3986_v26 = vmul.f32 %v8720_v37, %v3947_v16  ;;  %v4022_v57 = vadd.f32 %v8726_v58, %v3983_v28 }
 0x6d6   :  { %v4851_v10 = vpop.eup %4850  ;;  %4860 = vrsqrt.f32 %v3888_v21  ;;  %v4055_v53 = vmax.f32 %v4023_v7, 0.0 }
 0x6d7   :  { %v3985_v18 = vmul.f32 %v8720_v37, %v3946_v4  ;;  %v4025_v42 = vadd.f32 %v8726_v58, %v3986_v26  ;;  %v3949_v50 = vmul.f32 %v4851_v10, %v8665_v13  ;;  %4743 = vmatmul.mubr.msk.bf16.gmra.mrb[32].mxu0 %vm215_vm0, %v4075_v56  ;;  %v4054_v46 = vmax.f32 %v4022_v57, 0.0 }
 0x6d8   :  { %v4853_v23 = vpop.eup %4852 }
 0x6d9   :  { %v4024_v24 = vadd.f32 %v8726_v58, %v3985_v18  ;;  %v4057_v63 = vmax.f32 %v4025_v42, 0.0  ;;  %v3948_v43 = vmul.f32 %v4853_v23, %v8671_v6  ;;  %v4076_v11 = vpack.c.bf16 %v4055_v53, %v4054_v46 }
 0x6da   :  { %v4855_v20 = vpop.eup %4854  ;;  %v3988_v33 = vmul.f32 %v8720_v37, %v3949_v50 }
 0x6db   :  { %v4056_v40 = vmax.f32 %v4024_v24, 0.0  ;;  %v3951_v52 = vmul.f32 %v4855_v20, %v8677_v59  ;;  %4746 = vmatprep.mubr.msk.bf16.mxu0 %vm215_vm0, %v4076_v11  ;;  %v3987_v13 = vmul.f32 %v8720_v37, %v3948_v43 }
 0x6dc   :  { %v4857_v55 = vpop.eup %4856  ;;  %v4027_v2 = vadd.f32 %v8726_v58, %v3988_v33 }
 0x6dd   :  { %v4077_v31 = vpack.c.bf16 %v4057_v63, %v4056_v40  ;;  %v3950_v60 = vmul.f32 %v4857_v55, %v8683_v34  ;;  %v3990_v3 = vmul.f32 %v8720_v37, %v3951_v52  ;;  %v4026_v6 = vadd.f32 %v8726_v58, %v3987_v13 }
 0x6de   :  { %v4859_v14 = vpop.eup %4858  ;;  %v4059_v49 = vmax.f32 %v4027_v2, 0.0 }
 0x6df   :  { %v3989_v12 = vmul.f32 %v8720_v37, %v3950_v60  ;;  %v4029_v59 = vadd.f32 %v8726_v58, %v3990_v3  ;;  %v3953_v36 = vmul.f32 %v4859_v14, %v8689_v45  ;;  %4747 = vmatmul.mubr.msk.bf16.gmra.mrb[36].mxu0 %vm215_vm0, %v4077_v31  ;;  %v4058_v30 = vmax.f32 %v4026_v6, 0.0 }
 0x6e0   :  { %v4861_v47 = vpop.eup %4860 }
 0x6e1   :  { %v4028_v39 = vadd.f32 %v8726_v58, %v3989_v12  ;;  %v4061_v25 = vmax.f32 %v4029_v59, 0.0  ;;  %v3952_v34 = vmul.f32 %v4861_v47, %v8695_v19  ;;  %v4078_v29 = vpack.c.bf16 %v4059_v49, %v4058_v30 }
 0x6e2   :  { %v3992_v38 = vmul.f32 %v8720_v37, %v3953_v36 }
 0x6e3   :  { %v4060_v15 = vmax.f32 %v4028_v39, 0.0  ;;  %4750 = vmatprep.mubr.msk.bf16.mxu0 %vm215_vm0, %v4078_v29  ;;  %v3991_v44 = vmul.f32 %v8720_v37, %v3952_v34 }
 0x6e4   :  { %v4031_v48 = vadd.f32 %v8726_v58, %v3992_v38 }
 0x6e5   :  { %v4079_v45 = vpack.c.bf16 %v4061_v25, %v4060_v15  ;;  %v4030_v32 = vadd.f32 %v8726_v58, %v3991_v44 }
 0x6e6   :  { %v4063_v35 = vmax.f32 %v4031_v48, 0.0 }
 0x6e7   :  { %4751 = vmatmul.mubr.msk.bf16.gmra.mrb[40].mxu0 %vm215_vm0, %v4079_v45  ;;  %v4062_v27 = vmax.f32 %v4030_v32, 0.0 }
 0x6e9   :  { %v4080_v22 = vpack.c.bf16 %v4063_v35, %v4062_v27 }
 0x6eb   :  { %4754 = vmatprep.mubr.msk.bf16.mxu0 %vm215_vm0, %v4080_v22 }
 0x6f7   :  { %v3824_v19 = vpop.xlane.xlu1 %3823 }
 0x6f8   :  { %v3858_v5 = vmul.f32 0.03125, %v3824_v19 }
 0x6fa   :  { %v3890_v9 = vadd.f32 1e-05, %v3858_v5 }
 0x6fc   :  { %4862 = vrsqrt.f32 %v3890_v9 }
 0x701   :  { %v3827_v41 = vpop.xlane.xlu0 %3826 }
 0x702   :  { %v3859_v54 = vmul.f32 0.03125, %v3827_v41 }
 0x704   :  { %v3891_v61 = vadd.f32 1e-05, %v3859_v54 }
 0x706   :  { %4864 = vrsqrt.f32 %v3891_v61  ;;  %v4863_v0 = vpop.eup %4862 }
 0x707   :  { %v3954_v17 = vmul.f32 %v4863_v0, %v8705_v8  ;;  %v8841_v8 = vld [vmem:[%s9016_s13] ss:$0 sm:$0xff] }
 0x709   :  { %v3993_v1 = vmul.f32 %v8720_v37, %v3954_v17 }
 0x70b   :  { %v4032_v62 = vadd.f32 %v8726_v58, %v3993_v1 }
 0x70d   :  { %v4064_v56 = vmax.f32 %v4032_v62, 0.0 }
 0x710   :  { %v4865_v16 = vpop.eup %4864 }
 0x711   :  { %v3955_v28 = vmul.f32 %v4865_v16, %v8711_v51 }
 0x713   :  { %v3994_v21 = vmul.f32 %v8720_v37, %v3955_v28 }
 0x715   :  { %v4033_v7 = vadd.f32 %v8726_v58, %v3994_v21 }
 0x717   :  { %v4065_v4 = vmax.f32 %v4033_v7, 0.0 }
 0x719   :  { %v4081_v26 = vpack.c.bf16 %v4065_v4, %v4064_v56 }
 0x71b   :  { %4755 = vmatmul.mubr.msk.bf16.gmra.mrb[44].mxu0 %vm215_vm0, %v4081_v26 }
 0x788   :  { %v4728_v57 = vpop.f32.mrb[16].mxu0 }
 0x789   :  { %v4196_v10 = vadd.f32 %v4728_v57, %v8841_v8  ;;  %v4187_v51 = vpop.f32.mrb[17].mxu0 }
 0x78a   :  { %v4188_v53 = vadd.f32 %v8841_v8, %v4187_v51  ;;  %v4729_v18 = vpop.f32.mrb[18].mxu0 }
 0x78b   :  { %4316 = vst.msk [vmem:[%s9017_s14 + $0x10] sm:$0xff] %vm215_vm0, %v4196_v10  ;;  %v4199_v37 = vadd.f32 %v4729_v18, %v8841_v8  ;;  %v4190_v58 = vpop.f32.mrb[19].mxu0 }
 0x78c   :  { %4314 = vst.msk [vmem:[%s9017_s14] sm:$0xff] %vm215_vm0, %v4188_v53  ;;  %v4191_v42 = vadd.f32 %v8841_v8, %v4190_v58 }
 0x78d   :  { %4317 = vst.msk [vmem:[%s9017_s14 + $0x18] sm:$0xff] %vm215_vm0, %v4199_v37 }
 0x78e   :  { %4315 = vst.msk [vmem:[%s9017_s14 + $0x8] sm:$0xff] %vm215_vm0, %v4191_v42 }
 0x792   :  { %v4732_v50 = vpop.f32.mrb[20].mxu0 }
 0x793   :  { %v4212_v46 = vadd.f32 %v4732_v50, %v8841_v8  ;;  %v4203_v23 = vpop.f32.mrb[21].mxu0 }
 0x794   :  { %v4204_v24 = vadd.f32 %v8841_v8, %v4203_v23  ;;  %v4733_v63 = vpop.f32.mrb[22].mxu0 }
 0x795   :  { %4320 = vst.msk [vmem:[%s9017_s14 + $0x30] sm:$0xff] %vm215_vm0, %v4212_v46  ;;  %v4215_v43 = vadd.f32 %v4733_v63, %v8841_v8  ;;  %v4206_v11 = vpop.f32.mrb[23].mxu0 }
 0x796   :  { %4318 = vst.msk [vmem:[%s9017_s14 + $0x20] sm:$0xff] %vm215_vm0, %v4204_v24  ;;  %v4207_v20 = vadd.f32 %v8841_v8, %v4206_v11 }
 0x797   :  { %4321 = vst.msk [vmem:[%s9017_s14 + $0x38] sm:$0xff] %vm215_vm0, %v4215_v43 }
 0x798   :  { %4319 = vst.msk [vmem:[%s9017_s14 + $0x28] sm:$0xff] %vm215_vm0, %v4207_v20 }
 0x79a   :  { %v4736_v33 = vpop.f32.mrb[24].mxu0 }
 0x79b   :  { %v4228_v40 = vadd.f32 %v4736_v33, %v8841_v8  ;;  %v4219_v52 = vpop.f32.mrb[25].mxu0 }
 0x79c   :  { %v4220_v13 = vadd.f32 %v8841_v8, %v4219_v52  ;;  %v4737_v55 = vpop.f32.mrb[26].mxu0 }
 0x79d   :  { %4324 = vst.msk [vmem:[%s9017_s14 + $0x50] sm:$0xff] %vm215_vm0, %v4228_v40  ;;  %v4231_v2 = vadd.f32 %v4737_v55, %v8841_v8  ;;  %v4222_v31 = vpop.f32.mrb[27].mxu0 }
 0x79e   :  { %4322 = vst.msk [vmem:[%s9017_s14 + $0x40] sm:$0xff] %vm215_vm0, %v4220_v13  ;;  %v4223_v60 = vadd.f32 %v8841_v8, %v4222_v31 }
 0x79f   :  { %4325 = vst.msk [vmem:[%s9017_s14 + $0x58] sm:$0xff] %vm215_vm0, %v4231_v2 }
 0x7a0   :  { %4323 = vst.msk [vmem:[%s9017_s14 + $0x48] sm:$0xff] %vm215_vm0, %v4223_v60 }
 0x7a2   :  { %v4740_v3 = vpop.f32.mrb[28].mxu0 }
 0x7a3   :  { %v4244_v6 = vadd.f32 %v4740_v3, %v8841_v8  ;;  %v4235_v14 = vpop.f32.mrb[29].mxu0 }
 0x7a4   :  { %v4236_v49 = vadd.f32 %v8841_v8, %v4235_v14  ;;  %v4741_v12 = vpop.f32.mrb[30].mxu0 }
 0x7a5   :  { %4328 = vst.msk [vmem:[%s9017_s14 + $0x70] sm:$0xff] %vm215_vm0, %v4244_v6  ;;  %v4247_v59 = vadd.f32 %v4741_v12, %v8841_v8  ;;  %v4238_v36 = vpop.f32.mrb[31].mxu0 }
 0x7a6   :  { %4326 = vst.msk [vmem:[%s9017_s14 + $0x60] sm:$0xff] %vm215_vm0, %v4236_v49  ;;  %v4239_v30 = vadd.f32 %v8841_v8, %v4238_v36 }
 0x7a7   :  { %4329 = vst.msk [vmem:[%s9017_s14 + $0x78] sm:$0xff] %vm215_vm0, %v4247_v59 }
 0x7a8   :  { %4327 = vst.msk [vmem:[%s9017_s14 + $0x68] sm:$0xff] %vm215_vm0, %v4239_v30 }
 0x7aa   :  { %v4744_v47 = vpop.f32.mrb[32].mxu0 }
 0x7ab   :  { %v4260_v39 = vadd.f32 %v4744_v47, %v8841_v8  ;;  %v4251_v25 = vpop.f32.mrb[33].mxu0 }
 0x7ac   :  { %v4252_v34 = vadd.f32 %v8841_v8, %v4251_v25  ;;  %v4745_v29 = vpop.f32.mrb[34].mxu0 }
 0x7ad   :  { %4332 = vst.msk [vmem:[%s9017_s14 + $0x90] sm:$0xff] %vm215_vm0, %v4260_v39  ;;  %v4263_v38 = vadd.f32 %v4745_v29, %v8841_v8  ;;  %v4254_v15 = vpop.f32.mrb[35].mxu0 }
 0x7ae   :  { %4330 = vst.msk [vmem:[%s9017_s14 + $0x80] sm:$0xff] %vm215_vm0, %v4252_v34  ;;  %v4255_v44 = vadd.f32 %v8841_v8, %v4254_v15 }
 0x7af   :  { %4333 = vst.msk [vmem:[%s9017_s14 + $0x98] sm:$0xff] %vm215_vm0, %v4263_v38 }
 0x7b0   :  { %4331 = vst.msk [vmem:[%s9017_s14 + $0x88] sm:$0xff] %vm215_vm0, %v4255_v44 }
 0x7b2   :  { %v4748_v48 = vpop.f32.mrb[36].mxu0 }
 0x7b3   :  { %v4276_v45 = vadd.f32 %v4748_v48, %v8841_v8  ;;  %v4267_v32 = vpop.f32.mrb[37].mxu0 }
 0x7b4   :  { %v4268_v35 = vadd.f32 %v8841_v8, %v4267_v32  ;;  %v4749_v27 = vpop.f32.mrb[38].mxu0 }
 0x7b5   :  { %4336 = vst.msk [vmem:[%s9017_s14 + $0xb0] sm:$0xff] %vm215_vm0, %v4276_v45  ;;  %v4279_v22 = vadd.f32 %v4749_v27, %v8841_v8  ;;  %v4270_v19 = vpop.f32.mrb[39].mxu0 }
 0x7b6   :  { %4334 = vst.msk [vmem:[%s9017_s14 + $0xa0] sm:$0xff] %vm215_vm0, %v4268_v35  ;;  %v4271_v5 = vadd.f32 %v8841_v8, %v4270_v19 }
 0x7b7   :  { %4337 = vst.msk [vmem:[%s9017_s14 + $0xb8] sm:$0xff] %vm215_vm0, %v4279_v22 }
 0x7b8   :  { %4335 = vst.msk [vmem:[%s9017_s14 + $0xa8] sm:$0xff] %vm215_vm0, %v4271_v5 }
 0x7ba   :  { %v4752_v9 = vpop.f32.mrb[40].mxu0 }
 0x7bb   :  { %v4292_v41 = vadd.f32 %v4752_v9, %v8841_v8  ;;  %v4283_v54 = vpop.f32.mrb[41].mxu0 }
 0x7bc   :  { %v4284_v61 = vadd.f32 %v8841_v8, %v4283_v54  ;;  %v4753_v0 = vpop.f32.mrb[42].mxu0 }
 0x7bd   :  { %4340 = vst.msk [vmem:[%s9017_s14 + $0xd0] sm:$0xff] %vm215_vm0, %v4292_v41  ;;  %v4295_v17 = vadd.f32 %v4753_v0, %v8841_v8  ;;  %v4286_v1 = vpop.f32.mrb[43].mxu0 }
 0x7be   :  { %4338 = vst.msk [vmem:[%s9017_s14 + $0xc0] sm:$0xff] %vm215_vm0, %v4284_v61  ;;  %v4287_v16 = vadd.f32 %v8841_v8, %v4286_v1 }
 0x7bf   :  { %4341 = vst.msk [vmem:[%s9017_s14 + $0xd8] sm:$0xff] %vm215_vm0, %v4295_v17 }
 0x7c0   :  { %4339 = vst.msk [vmem:[%s9017_s14 + $0xc8] sm:$0xff] %vm215_vm0, %v4287_v16 }
 0x7ee   :  { %v4756_v28 = vpop.f32.mrb[44].mxu0 }
 0x7ef   :  { %v4308_v62 = vadd.f32 %v4756_v28, %v8841_v8  ;;  %v4299_v21 = vpop.f32.mrb[45].mxu0 }
 0x7f0   :  { %v4300_v7 = vadd.f32 %v8841_v8, %v4299_v21  ;;  %v4757_v56 = vpop.f32.mrb[46].mxu0 }
 0x7f1   :  { %4344 = vst.msk [vmem:[%s9017_s14 + $0xf0] sm:$0xff] %vm215_vm0, %v4308_v62  ;;  %v4311_v4 = vadd.f32 %v4757_v56, %v8841_v8  ;;  %v4302_v26 = vpop.f32.mrb[47].mxu0 }
 0x7f2   :  { %4342 = vst.msk [vmem:[%s9017_s14 + $0xe0] sm:$0xff] %vm215_vm0, %v4300_v7  ;;  %v4303_v57 = vadd.f32 %v8841_v8, %v4302_v26 }
 0x7f3   :  { %4345 = vst.msk [vmem:[%s9017_s14 + $0xf8] sm:$0xff] %vm215_vm0, %v4311_v4 }
 0x7f4   :  { %4343 = vst.msk [vmem:[%s9017_s14 + $0xe8] sm:$0xff] %vm215_vm0, %v4303_v57 }

</bundles_post_ra>
